<compile_context>
chip_gen: v6e
topology: v6e:2x2x1
jax: 0.10.0
libtpu: 0.0.40
codegen_flags: <defaults>
</compile_context>

<pallas_src>
import functools

import jax
import jax.numpy as jnp
from jax.experimental import pallas as pl
from jax.experimental.pallas import tpu as pltpu

# ----------------------- model configuration (small) -----------------------
IMAGE = 16          # image_size
PATCH = 4           # patch_size
CHANNELS = 4        # channels
DIM = 32            # embedding dim
DEPTH = 2           # transformer depth
HEADS = 4           # attention heads
DIM_HEAD = 8        # per-head dim
INNER = HEADS * DIM_HEAD            # 32 (project_out=True since heads != 1)
MLP = 64            # mlp_dim inside transformer
NUM_CLASSES = 10    # num_classes
N = (IMAGE // PATCH) * (IMAGE // PATCH)       # num_patches = 16
PATCH_DIM = CHANNELS * PATCH * PATCH          # 64
ATTN_SCALE = DIM_HEAD ** -0.5
POOL_SCALE = DIM ** -0.5                      # Softmax(normlization_scale=dim): x / dim**0.5
EPS = 1e-5
HEAD_PAD = 128                                # lane-dense padded classifier width
# dropout / emb_dropout are 0.0 -> identity (inference semantics)


# ----------------------------- in-kernel helpers ----------------------------
def _erf(x):
    # TODO(synk): lax.erf lowering availability on Mosaic varies by version; this is the
    # Abramowitz & Stegun 7.1.26 erf (|abs err| < 1.5e-7), built from exp only.
    # The 1/(1+p*z) term uses the EUP approx reciprocal (~2^-12 rel err); resulting
    # GELU absolute error stays below ~1e-4, fine for inference parity checks.
    a1, a2, a3, a4, a5 = 0.254829592, -0.284496736, 1.421413741, -1.453152027, 1.061405429
    p = 0.3275911
    s = jnp.where(x >= 0.0, 1.0, -1.0)
    z = jnp.abs(x)
    t = pl.reciprocal(1.0 + p * z, approx=True)
    poly = ((((a5 * t + a4) * t + a3) * t + a2) * t + a1) * t
    return s * (1.0 - poly * jnp.exp(-z * z))


def _gelu(x):
    # PyTorch nn.GELU() default = exact erf formulation
    return 0.5 * x * (1.0 + _erf(x * (1.0 / jnp.sqrt(jnp.float32(2.0)))))


def _layernorm(x, g, b):
    mu = jnp.mean(x, axis=-1, keepdims=True)
    var = jnp.mean((x - mu) ** 2, axis=-1, keepdims=True)
    return (x - mu) * jax.lax.rsqrt(var + EPS) * g + b


# --------------------------------- kernel -----------------------------------
def vit_kernel(x_ref, pos_ref, pw_ref, pb_ref,
               ln1g_ref, ln1b_ref, wqkv_ref, wo_ref, bo_ref,
               ln2g_ref, ln2b_ref, w1_ref, b1_ref, w2_ref, b2_ref,
               poolw_ref, poolb_ref, hlng_ref, hlnb_ref, hw_ref, hb_ref,
               o_ref, *, block_b):
    rows = block_b * N
    zbh = block_b * HEADS      # folded (image, head) batch for the attention dots

    # patch embedding (Linear); batch folded into rows
    x = jnp.dot(x_ref[...], pw_ref[...], preferred_element_type=jnp.float32) + pb_ref[...]
    # positional embedding broadcast in-kernel (no host-side tiling)
    x = (x.reshape(block_b, N, DIM) + pos_ref[...]).reshape(rows, DIM)       # (rows, DIM)

    for l in range(DEPTH):
        # ---- PreNorm + multi-head self-attention + residual ----
        xn = _layernorm(x, ln1g_ref[l], ln1b_ref[l])
        # fused QKV projection: one (rows, DIM) @ (DIM, 3*INNER) matmul
        qkv = jnp.dot(xn, wqkv_ref[l], preferred_element_type=jnp.float32)   # (rows, 3*INNER)

        def to_zdn(t2d):
            # (rows, INNER) with lane index c = h*DIM_HEAD + d
            #   -> (block_b*HEADS, DIM_HEAD, N) with the head folded into the batch dim.
            # Only minor-2D transposes + tile-aligned (x8 sublane) reshapes are used.
            t = t2d.reshape(block_b, N, INNER)
            t = jnp.swapaxes(t, 1, 2)                    # (B, INNER, N)
            return t.reshape(zbh, DIM_HEAD, N)           # (B*H, DH, N)

        q = jnp.swapaxes(to_zdn(qkv[:, 0:INNER]), 1, 2)             # (Z, N, DH)
        k = jnp.swapaxes(to_zdn(qkv[:, INNER:2 * INNER]), 1, 2)     # (Z, N, DH)
        v = to_zdn(qkv[:, 2 * INNER:3 * INNER])                     # (Z, DH, N)

        # one batched dot pair for all (image, head) pairs
        dots = jnp.einsum('znd,zmd->znm', q, k,
                          preferred_element_type=jnp.float32) * ATTN_SCALE   # (Z, N, N)
        m = jnp.max(dots, axis=-1, keepdims=True)
        e = jnp.exp(dots - m)
        p = e * pl.reciprocal(jnp.sum(e, axis=-1, keepdims=True), approx=True)

        outT = jnp.einsum('zdm,znm->zdn', v, p,
                          preferred_element_type=jnp.float32)                # (Z, DH, N)
        # back to (rows, INNER) with lane index h*DIM_HEAD + d  (== torch 'b h n d -> b n (h d)')
        attn = jnp.swapaxes(outT.reshape(block_b, INNER, N), 1, 2).reshape(rows, INNER)
        attn = jnp.dot(attn, wo_ref[l], preferred_element_type=jnp.float32) + bo_ref[l]
        x = x + attn

        # ---- PreNorm + FeedForward (Linear, GELU, Linear) + residual ----
        xn = _layernorm(x, ln2g_ref[l], ln2b_ref[l])
        h1 = jnp.dot(xn, w1_ref[l], preferred_element_type=jnp.float32) + b1_ref[l]
        h1 = _gelu(h1)
        h2 = jnp.dot(h1, w2_ref[l], preferred_element_type=jnp.float32) + b2_ref[l]
        x = x + h2

    # ---- sequence pooling: softmax(attention_pool(x)/sqrt(dim), over N)^T @ x ----
    a = (jnp.dot(x, poolw_ref[...], preferred_element_type=jnp.float32)
         + poolb_ref[...]) * POOL_SCALE                                      # (rows, 1)
    a3 = a.reshape(block_b, N, 1)
    x3 = x.reshape(block_b, N, DIM)
    m = jnp.max(a3, axis=1, keepdims=True)
    e = jnp.exp(a3 - m)
    w = e * pl.reciprocal(jnp.sum(e, axis=1, keepdims=True), approx=True)    # (B, N, 1)
    pooled = jnp.sum(w * x3, axis=1)                                         # (B, DIM)

    # ---- mlp head: LayerNorm + Linear (lane-padded to HEAD_PAD) ----
    pooled = _layernorm(pooled, hlng_ref[...], hlnb_ref[...])
    o_ref[...] = (jnp.dot(pooled, hw_ref[...], preferred_element_type=jnp.float32)
                  + hb_ref[...])                                             # (B, HEAD_PAD)


# ------------------------------- host wrapper --------------------------------
def vit_forward(img, params, block_b=None, input_dtype=jnp.float32):
    """input_dtype=jnp.bfloat16 halves the streamed input on v6e/v7x (matmul operands
    only; all element-wise math stays f32).  Default f32 keeps exact parity."""
    B = img.shape[0]
    hh = IMAGE // PATCH
    # einops: 'b c (h p1) (w p2) -> b (h w) (p1 p2 c)'
    x = img.reshape(B, CHANNELS, hh, PATCH, hh, PATCH)
    x = x.transpose(0, 2, 4, 3, 5, 1).reshape(B, N, PATCH_DIM)

    if block_b is None:
        # Big row slabs: rows = block_b*N is the only large matmul dimension.
        block_b = min(B, 256)
        # v7x: >= 2 grid steps so both TensorCores run; keep blocks 8-image aligned
        # so the (block_b, 128) output block stays (8,128)-aligned.
        if B >= 16:
            block_b = min(block_b, (B + 1) // 2)
            block_b = max(8, (block_b // 8) * 8)
    n_blocks = pl.cdiv(B, block_b)
    b_pad = n_blocks * block_b
    if b_pad != B:
        x = jnp.pad(x, ((0, b_pad - B), (0, 0), (0, 0)))
    x2d = x.reshape(b_pad * N, PATCH_DIM).astype(input_dtype)   # batch folded into rows

    # pad classifier to a lane-dense 128-wide output (wrapper slices back)
    head_w = jnp.pad(params['head_w'], ((0, 0), (0, HEAD_PAD - NUM_CLASSES)))
    head_b = jnp.pad(params['head_b'], ((0, 0), (0, HEAD_PAD - NUM_CLASSES)))

    weights = [params['pos'], params['patch_w'].astype(input_dtype), params['patch_b'],
               params['ln1_g'], params['ln1_b'], params['w_qkv'],
               params['w_out'], params['b_out'],
               params['ln2_g'], params['ln2_b'],
               params['w1'], params['b1'], params['w2'], params['b2'],
               params['pool_w'], params['pool_b'],
               params['head_ln_g'], params['head_ln_b'], head_w, head_b]

    def full_spec(shape):
        nd = len(shape)
        return pl.BlockSpec(shape, lambda i, nd=nd: (0,) * nd)

    in_specs = [pl.BlockSpec((block_b * N, PATCH_DIM), lambda i: (i, 0))]
    in_specs += [full_spec(w.shape) for w in weights]

    kern = functools.partial(vit_kernel, block_b=block_b)
    out = pl.pallas_call(
        kern,
        out_shape=jax.ShapeDtypeStruct((b_pad, HEAD_PAD), jnp.float32),
        grid=(n_blocks,),
        in_specs=in_specs,
        out_specs=pl.BlockSpec((block_b, HEAD_PAD), lambda i: (i, 0)),
        compiler_params=pltpu.CompilerParams(
            dimension_semantics=("parallel",),
            # v5e scoped-VMEM default is only 16 MiB; 48 MiB stays under v7x's 64 MiB.
            vmem_limit_bytes=48 * 1024 * 1024),
    )(x2d, *weights)
    return out[:B, :NUM_CLASSES]                                             # (B, NUM_CLASSES)


# --------------------------- deterministic params ----------------------------
def init_params(key):
    ks = jax.random.split(key, 10)

    def nrm(k, shape, scale=0.02):
        return (scale * jax.random.normal(k, shape)).astype(jnp.float32)

    p = {}
    p['patch_w'] = nrm(ks[0], (PATCH_DIM, DIM))
    p['patch_b'] = jnp.zeros((1, DIM), jnp.float32)
    pos_full = jax.random.normal(ks[1], (N + 1, DIM)).astype(jnp.float32)    # (num_patches+1, dim)
    p['pos'] = pos_full[:N]                                                  # reference uses [:, :n]
    p['ln1_g'] = jnp.ones((DEPTH, 1, DIM), jnp.float32)
    p['ln1_b'] = jnp.zeros((DEPTH, 1, DIM), jnp.float32)
    # fused QKV weight, columns = [q heads | k heads | v heads], head h at offset h*DIM_HEAD
    p['w_qkv'] = nrm(ks[2], (DEPTH, DIM, 3 * INNER))
    p['w_out'] = nrm(ks[5], (DEPTH, INNER, DIM))
    p['b_out'] = jnp.zeros((DEPTH, 1, DIM), jnp.float32)
    p['ln2_g'] = jnp.ones((DEPTH, 1, DIM), jnp.float32)
    p['ln2_b'] = jnp.zeros((DEPTH, 1, DIM), jnp.float32)
    p['w1'] = nrm(ks[6], (DEPTH, DIM, MLP))
    p['b1'] = jnp.zeros((DEPTH, 1, MLP), jnp.float32)
    p['w2'] = nrm(ks[7], (DEPTH, MLP, DIM))
    p['b2'] = jnp.zeros((DEPTH, 1, DIM), jnp.float32)
    p['pool_w'] = nrm(ks[8], (DIM, 1))
    p['pool_b'] = jnp.zeros((1, 1), jnp.float32)
    p['head_ln_g'] = jnp.ones((1, DIM), jnp.float32)
    p['head_ln_b'] = jnp.zeros((1, DIM), jnp.float32)
    p['head_w'] = nrm(ks[9], (DIM, NUM_CLASSES))
    p['head_b'] = jnp.zeros((1, NUM_CLASSES), jnp.float32)
    return p


if __name__ == "__main__":
    key = jax.random.PRNGKey(0)
    k_img, k_params = jax.random.split(key)
    img = jax.random.normal(k_img, (2, CHANNELS, IMAGE, IMAGE)).astype(jnp.float32)  # NCHW
    params = init_params(k_params)

    out = vit_forward(img, params)
    out = jax.block_until_ready(out)
    assert out.shape == (2, NUM_CLASSES), out.shape
    assert bool(jnp.all(jnp.isfinite(out)))
    print("KERNEL_OK")
</pallas_src>

<mosaic_0001>
module attributes {stable_mosaic.version = 11 : i64} {
  func.func @vit_kernel(%arg0: i32, %arg1: memref<32x64xf32, #tpu.memory_space<vmem>>, %arg2: memref<16x32xf32, #tpu.memory_space<vmem>>, %arg3: memref<64x32xf32, #tpu.memory_space<vmem>>, %arg4: memref<1x32xf32, #tpu.memory_space<vmem>>, %arg5: memref<2x1x32xf32, #tpu.memory_space<vmem>>, %arg6: memref<2x1x32xf32, #tpu.memory_space<vmem>>, %arg7: memref<2x32x96xf32, #tpu.memory_space<vmem>>, %arg8: memref<2x32x32xf32, #tpu.memory_space<vmem>>, %arg9: memref<2x1x32xf32, #tpu.memory_space<vmem>>, %arg10: memref<2x1x32xf32, #tpu.memory_space<vmem>>, %arg11: memref<2x1x32xf32, #tpu.memory_space<vmem>>, %arg12: memref<2x32x64xf32, #tpu.memory_space<vmem>>, %arg13: memref<2x1x64xf32, #tpu.memory_space<vmem>>, %arg14: memref<2x64x32xf32, #tpu.memory_space<vmem>>, %arg15: memref<2x1x32xf32, #tpu.memory_space<vmem>>, %arg16: memref<32x1xf32, #tpu.memory_space<vmem>>, %arg17: memref<1x1xf32, #tpu.memory_space<vmem>>, %arg18: memref<1x32xf32, #tpu.memory_space<vmem>>, %arg19: memref<1x32xf32, #tpu.memory_space<vmem>>, %arg20: memref<32x128xf32, #tpu.memory_space<vmem>>, %arg21: memref<1x128xf32, #tpu.memory_space<vmem>>, %arg22: memref<2x128xf32, #tpu.memory_space<vmem>>) attributes {dimension_semantics = [#tpu.dimension_semantics<parallel>], iteration_bounds = array<i64: 1>, scalar_prefetch = 0 : i64, scratch_operands = 0 : i64, tpu.core_type = #tpu.core_type<tc>, window_params = [{transform_indices = @transform_0, window_bounds = array<i64: 32, 64>}, {pipeline_mode = #tpu.pipeline_mode<synchronous>, transform_indices = @transform_1, window_bounds = array<i64: 16, 32>}, {pipeline_mode = #tpu.pipeline_mode<synchronous>, transform_indices = @transform_2, window_bounds = array<i64: 64, 32>}, {pipeline_mode = #tpu.pipeline_mode<synchronous>, transform_indices = @transform_3, window_bounds = array<i64: 1, 32>}, {pipeline_mode = #tpu.pipeline_mode<synchronous>, transform_indices = @transform_4, window_bounds = array<i64: 2, 1, 32>}, {pipeline_mode = #tpu.pipeline_mode<synchronous>, transform_indices = @transform_5, window_bounds = array<i64: 2, 1, 32>}, {pipeline_mode = #tpu.pipeline_mode<synchronous>, transform_indices = @transform_6, window_bounds = array<i64: 2, 32, 96>}, {pipeline_mode = #tpu.pipeline_mode<synchronous>, transform_indices = @transform_7, window_bounds = array<i64: 2, 32, 32>}, {pipeline_mode = #tpu.pipeline_mode<synchronous>, transform_indices = @transform_8, window_bounds = array<i64: 2, 1, 32>}, {pipeline_mode = #tpu.pipeline_mode<synchronous>, transform_indices = @transform_9, window_bounds = array<i64: 2, 1, 32>}, {pipeline_mode = #tpu.pipeline_mode<synchronous>, transform_indices = @transform_10, window_bounds = array<i64: 2, 1, 32>}, {pipeline_mode = #tpu.pipeline_mode<synchronous>, transform_indices = @transform_11, window_bounds = array<i64: 2, 32, 64>}, {pipeline_mode = #tpu.pipeline_mode<synchronous>, transform_indices = @transform_12, window_bounds = array<i64: 2, 1, 64>}, {pipeline_mode = #tpu.pipeline_mode<synchronous>, transform_indices = @transform_13, window_bounds = array<i64: 2, 64, 32>}, {pipeline_mode = #tpu.pipeline_mode<synchronous>, transform_indices = @transform_14, window_bounds = array<i64: 2, 1, 32>}, {pipeline_mode = #tpu.pipeline_mode<synchronous>, transform_indices = @transform_15, window_bounds = array<i64: 32, 1>}, {pipeline_mode = #tpu.pipeline_mode<synchronous>, transform_indices = @transform_16, window_bounds = array<i64: 1, 1>}, {pipeline_mode = #tpu.pipeline_mode<synchronous>, transform_indices = @transform_17, window_bounds = array<i64: 1, 32>}, {pipeline_mode = #tpu.pipeline_mode<synchronous>, transform_indices = @transform_18, window_bounds = array<i64: 1, 32>}, {pipeline_mode = #tpu.pipeline_mode<synchronous>, transform_indices = @transform_19, window_bounds = array<i64: 32, 128>}, {pipeline_mode = #tpu.pipeline_mode<synchronous>, transform_indices = @transform_20, window_bounds = array<i64: 1, 128>}, {transform_indices = @transform_21, window_bounds = array<i64: 2, 128>}]} {
    %c0 = arith.constant 0 : index
    %c0_0 = arith.constant 0 : index
    %0 = vector.load %arg1[%c0, %c0_0] : memref<32x64xf32, #tpu.memory_space<vmem>>, vector<32x64xf32>
    %c0_1 = arith.constant 0 : index
    %c0_2 = arith.constant 0 : index
    %1 = vector.load %arg3[%c0_1, %c0_2] : memref<64x32xf32, #tpu.memory_space<vmem>>, vector<64x32xf32>
    %cst = arith.constant dense<0.000000e+00> : vector<32x32xf32>
    %2 = tpu.matmul %0, %1, %cst {dimension_numbers = #tpu.dot_dimension_numbers<[1], [0], [0], [1], [0, 0, 1, 1], [], []>} : vector<32x64xf32>, vector<64x32xf32>, vector<32x32xf32> -> vector<32x32xf32>
    %c0_3 = arith.constant 0 : index
    %c0_4 = arith.constant 0 : index
    %3 = vector.load %arg4[%c0_3, %c0_4] : memref<1x32xf32, #tpu.memory_space<vmem>>, vector<1x32xf32>
    %4 = vector.broadcast %3 : vector<1x32xf32> to vector<32x32xf32>
    %5 = arith.addf %2, %4 : vector<32x32xf32>
    %6 = vector.shape_cast %5 : vector<32x32xf32> to vector<2x16x32xf32>
    %c0_5 = arith.constant 0 : index
    %c0_6 = arith.constant 0 : index
    %7 = vector.load %arg2[%c0_5, %c0_6] : memref<16x32xf32, #tpu.memory_space<vmem>>, vector<16x32xf32>
    %8 = vector.shape_cast %7 : vector<16x32xf32> to vector<1x16x32xf32>
    %9 = vector.broadcast %8 : vector<1x16x32xf32> to vector<2x16x32xf32>
    %10 = arith.addf %6, %9 : vector<2x16x32xf32>
    %11 = vector.shape_cast %10 : vector<2x16x32xf32> to vector<32x32xf32>
    %c0_7 = arith.constant 0 : index
    %c0_8 = arith.constant 0 : index
    %c0_9 = arith.constant 0 : index
    %12 = vector.load %arg5[%c0_7, %c0_8, %c0_9] : memref<2x1x32xf32, #tpu.memory_space<vmem>>, vector<1x1x32xf32>
    %13 = vector.shape_cast %12 : vector<1x1x32xf32> to vector<1x32xf32>
    %c0_10 = arith.constant 0 : index
    %c0_11 = arith.constant 0 : index
    %c0_12 = arith.constant 0 : index
    %14 = vector.load %arg6[%c0_10, %c0_11, %c0_12] : memref<2x1x32xf32, #tpu.memory_space<vmem>>, vector<1x1x32xf32>
    %15 = vector.shape_cast %14 : vector<1x1x32xf32> to vector<1x32xf32>
    %cst_13 = arith.constant dense<0.000000e+00> : vector<32xf32>
    %16 = vector.multi_reduction <add>, %11, %cst_13 [1] : vector<32x32xf32> to vector<32xf32>
    %17 = vector.shape_cast %16 : vector<32xf32> to vector<32x1xf32>
    %cst_14 = arith.constant 3.200000e+01 : f32
    %18 = vector.broadcast %cst_14 : f32 to vector<32x1xf32>
    %19 = arith.divf %17, %18 : vector<32x1xf32>
    %20 = vector.broadcast %19 : vector<32x1xf32> to vector<32x32xf32>
    %21 = arith.subf %11, %20 : vector<32x32xf32>
    %22 = arith.mulf %21, %21 : vector<32x32xf32>
    %cst_15 = arith.constant dense<0.000000e+00> : vector<32xf32>
    %23 = vector.multi_reduction <add>, %22, %cst_15 [1] : vector<32x32xf32> to vector<32xf32>
    %24 = vector.shape_cast %23 : vector<32xf32> to vector<32x1xf32>
    %cst_16 = arith.constant 3.200000e+01 : f32
    %25 = vector.broadcast %cst_16 : f32 to vector<32x1xf32>
    %26 = arith.divf %24, %25 : vector<32x1xf32>
    %27 = vector.broadcast %19 : vector<32x1xf32> to vector<32x32xf32>
    %28 = arith.subf %11, %27 : vector<32x32xf32>
    %cst_17 = arith.constant 9.99999974E-6 : f32
    %29 = vector.broadcast %cst_17 : f32 to vector<32x1xf32>
    %30 = arith.addf %26, %29 : vector<32x1xf32>
    %31 = math.rsqrt %30 : vector<32x1xf32>
    %32 = vector.broadcast %31 : vector<32x1xf32> to vector<32x32xf32>
    %33 = arith.mulf %28, %32 : vector<32x32xf32>
    %34 = vector.broadcast %13 : vector<1x32xf32> to vector<32x32xf32>
    %35 = arith.mulf %33, %34 : vector<32x32xf32>
    %36 = vector.broadcast %15 : vector<1x32xf32> to vector<32x32xf32>
    %37 = arith.addf %35, %36 : vector<32x32xf32>
    %c0_18 = arith.constant 0 : index
    %c0_19 = arith.constant 0 : index
    %c0_20 = arith.constant 0 : index
    %38 = vector.load %arg7[%c0_18, %c0_19, %c0_20] : memref<2x32x96xf32, #tpu.memory_space<vmem>>, vector<1x32x96xf32>
    %39 = vector.shape_cast %38 : vector<1x32x96xf32> to vector<32x96xf32>
    %cst_21 = arith.constant dense<0.000000e+00> : vector<32x96xf32>
    %40 = tpu.matmul %37, %39, %cst_21 {dimension_numbers = #tpu.dot_dimension_numbers<[1], [0], [0], [1], [0, 0, 1, 1], [], []>} : vector<32x32xf32>, vector<32x96xf32>, vector<32x96xf32> -> vector<32x96xf32>
    %41 = vector.extract_strided_slice %40 {offsets = [0, 0], sizes = [32, 32], strides = [1, 1]} : vector<32x96xf32> to vector<32x32xf32>
    %42 = vector.shape_cast %41 : vector<32x32xf32> to vector<2x16x32xf32>
    %43 = tpu.transpose %42, [0, 2, 1] : vector<2x16x32xf32> -> vector<2x32x16xf32>
    %44 = vector.shape_cast %43 : vector<2x32x16xf32> to vector<8x8x16xf32>
    %45 = tpu.transpose %44, [0, 2, 1] : vector<8x8x16xf32> -> vector<8x16x8xf32>
    %46 = vector.extract_strided_slice %40 {offsets = [0, 32], sizes = [32, 32], strides = [1, 1]} : vector<32x96xf32> to vector<32x32xf32>
    %47 = vector.shape_cast %46 : vector<32x32xf32> to vector<2x16x32xf32>
    %48 = tpu.transpose %47, [0, 2, 1] : vector<2x16x32xf32> -> vector<2x32x16xf32>
    %49 = vector.shape_cast %48 : vector<2x32x16xf32> to vector<8x8x16xf32>
    %50 = tpu.transpose %49, [0, 2, 1] : vector<8x8x16xf32> -> vector<8x16x8xf32>
    %51 = vector.extract_strided_slice %40 {offsets = [0, 64], sizes = [32, 32], strides = [1, 1]} : vector<32x96xf32> to vector<32x32xf32>
    %52 = vector.shape_cast %51 : vector<32x32xf32> to vector<2x16x32xf32>
    %53 = tpu.transpose %52, [0, 2, 1] : vector<2x16x32xf32> -> vector<2x32x16xf32>
    %54 = vector.shape_cast %53 : vector<2x32x16xf32> to vector<8x8x16xf32>
    "tpu.trace_start"() <{level = 10 : i32, message = "znd,zmd->znm"}> : () -> ()
    %cst_22 = arith.constant dense<0.000000e+00> : vector<8x16x16xf32>
    %55 = tpu.matmul %45, %50, %cst_22 {dimension_numbers = #tpu.dot_dimension_numbers<[2], [2], [1], [1], [0, 0, 0, 1, 1, 1], [0], [0]>} : vector<8x16x8xf32>, vector<8x16x8xf32>, vector<8x16x16xf32> -> vector<8x16x16xf32>
    "tpu.trace_stop"() : () -> ()
    %cst_23 = arith.constant 0.353553385 : f32
    %56 = vector.broadcast %cst_23 : f32 to vector<8x16x16xf32>
    %57 = arith.mulf %55, %56 : vector<8x16x16xf32>
    %cst_24 = arith.constant dense<0xFF800000> : vector<8x16xf32>
    %58 = vector.multi_reduction <maximumf>, %57, %cst_24 [2] : vector<8x16x16xf32> to vector<8x16xf32>
    %59 = vector.shape_cast %58 : vector<8x16xf32> to vector<8x16x1xf32>
    %60 = vector.broadcast %59 : vector<8x16x1xf32> to vector<8x16x16xf32>
    %61 = arith.subf %57, %60 : vector<8x16x16xf32>
    %62 = math.exp %61 : vector<8x16x16xf32>
    %cst_25 = arith.constant dense<0.000000e+00> : vector<8x16xf32>
    %63 = vector.multi_reduction <add>, %62, %cst_25 [2] : vector<8x16x16xf32> to vector<8x16xf32>
    %64 = vector.shape_cast %63 : vector<8x16xf32> to vector<8x16x1xf32>
    %65 = tpu.reciprocal %64 {approx = true} : vector<8x16x1xf32> -> vector<8x16x1xf32>
    %66 = vector.broadcast %65 : vector<8x16x1xf32> to vector<8x16x16xf32>
    %67 = arith.mulf %62, %66 : vector<8x16x16xf32>
    "tpu.trace_start"() <{level = 10 : i32, message = "zdm,znm->zdn"}> : () -> ()
    %cst_26 = arith.constant dense<0.000000e+00> : vector<8x8x16xf32>
    %68 = tpu.matmul %54, %67, %cst_26 {dimension_numbers = #tpu.dot_dimension_numbers<[2], [2], [1], [1], [0, 0, 0, 1, 1, 1], [0], [0]>} : vector<8x8x16xf32>, vector<8x16x16xf32>, vector<8x8x16xf32> -> vector<8x8x16xf32>
    "tpu.trace_stop"() : () -> ()
    %69 = vector.shape_cast %68 : vector<8x8x16xf32> to vector<2x32x16xf32>
    %70 = tpu.transpose %69, [0, 2, 1] : vector<2x32x16xf32> -> vector<2x16x32xf32>
    %71 = vector.shape_cast %70 : vector<2x16x32xf32> to vector<32x32xf32>
    %c0_27 = arith.constant 0 : index
    %c0_28 = arith.constant 0 : index
    %c0_29 = arith.constant 0 : index
    %72 = vector.load %arg8[%c0_27, %c0_28, %c0_29] : memref<2x32x32xf32, #tpu.memory_space<vmem>>, vector<1x32x32xf32>
    %73 = vector.shape_cast %72 : vector<1x32x32xf32> to vector<32x32xf32>
    %cst_30 = arith.constant dense<0.000000e+00> : vector<32x32xf32>
    %74 = tpu.matmul %71, %73, %cst_30 {dimension_numbers = #tpu.dot_dimension_numbers<[1], [0], [0], [1], [0, 0, 1, 1], [], []>} : vector<32x32xf32>, vector<32x32xf32>, vector<32x32xf32> -> vector<32x32xf32>
    %c0_31 = arith.constant 0 : index
    %c0_32 = arith.constant 0 : index
    %c0_33 = arith.constant 0 : index
    %75 = vector.load %arg9[%c0_31, %c0_32, %c0_33] : memref<2x1x32xf32, #tpu.memory_space<vmem>>, vector<1x1x32xf32>
    %76 = vector.shape_cast %75 : vector<1x1x32xf32> to vector<1x32xf32>
    %77 = vector.broadcast %76 : vector<1x32xf32> to vector<32x32xf32>
    %78 = arith.addf %74, %77 : vector<32x32xf32>
    %79 = arith.addf %11, %78 : vector<32x32xf32>
    %c0_34 = arith.constant 0 : index
    %c0_35 = arith.constant 0 : index
    %c0_36 = arith.constant 0 : index
    %80 = vector.load %arg10[%c0_34, %c0_35, %c0_36] : memref<2x1x32xf32, #tpu.memory_space<vmem>>, vector<1x1x32xf32>
    %81 = vector.shape_cast %80 : vector<1x1x32xf32> to vector<1x32xf32>
    %c0_37 = arith.constant 0 : index
    %c0_38 = arith.constant 0 : index
    %c0_39 = arith.constant 0 : index
    %82 = vector.load %arg11[%c0_37, %c0_38, %c0_39] : memref<2x1x32xf32, #tpu.memory_space<vmem>>, vector<1x1x32xf32>
    %83 = vector.shape_cast %82 : vector<1x1x32xf32> to vector<1x32xf32>
    %cst_40 = arith.constant dense<0.000000e+00> : vector<32xf32>
    %84 = vector.multi_reduction <add>, %79, %cst_40 [1] : vector<32x32xf32> to vector<32xf32>
    %85 = vector.shape_cast %84 : vector<32xf32> to vector<32x1xf32>
    %cst_41 = arith.constant 3.200000e+01 : f32
    %86 = vector.broadcast %cst_41 : f32 to vector<32x1xf32>
    %87 = arith.divf %85, %86 : vector<32x1xf32>
    %88 = vector.broadcast %87 : vector<32x1xf32> to vector<32x32xf32>
    %89 = arith.subf %79, %88 : vector<32x32xf32>
    %90 = arith.mulf %89, %89 : vector<32x32xf32>
    %cst_42 = arith.constant dense<0.000000e+00> : vector<32xf32>
    %91 = vector.multi_reduction <add>, %90, %cst_42 [1] : vector<32x32xf32> to vector<32xf32>
    %92 = vector.shape_cast %91 : vector<32xf32> to vector<32x1xf32>
    %cst_43 = arith.constant 3.200000e+01 : f32
    %93 = vector.broadcast %cst_43 : f32 to vector<32x1xf32>
    %94 = arith.divf %92, %93 : vector<32x1xf32>
    %95 = vector.broadcast %87 : vector<32x1xf32> to vector<32x32xf32>
    %96 = arith.subf %79, %95 : vector<32x32xf32>
    %cst_44 = arith.constant 9.99999974E-6 : f32
    %97 = vector.broadcast %cst_44 : f32 to vector<32x1xf32>
    %98 = arith.addf %94, %97 : vector<32x1xf32>
    %99 = math.rsqrt %98 : vector<32x1xf32>
    %100 = vector.broadcast %99 : vector<32x1xf32> to vector<32x32xf32>
    %101 = arith.mulf %96, %100 : vector<32x32xf32>
    %102 = vector.broadcast %81 : vector<1x32xf32> to vector<32x32xf32>
    %103 = arith.mulf %101, %102 : vector<32x32xf32>
    %104 = vector.broadcast %83 : vector<1x32xf32> to vector<32x32xf32>
    %105 = arith.addf %103, %104 : vector<32x32xf32>
    %c0_45 = arith.constant 0 : index
    %c0_46 = arith.constant 0 : index
    %c0_47 = arith.constant 0 : index
    %106 = vector.load %arg12[%c0_45, %c0_46, %c0_47] : memref<2x32x64xf32, #tpu.memory_space<vmem>>, vector<1x32x64xf32>
    %107 = vector.shape_cast %106 : vector<1x32x64xf32> to vector<32x64xf32>
    %cst_48 = arith.constant dense<0.000000e+00> : vector<32x64xf32>
    %108 = tpu.matmul %105, %107, %cst_48 {dimension_numbers = #tpu.dot_dimension_numbers<[1], [0], [0], [1], [0, 0, 1, 1], [], []>} : vector<32x32xf32>, vector<32x64xf32>, vector<32x64xf32> -> vector<32x64xf32>
    %c0_49 = arith.constant 0 : index
    %c0_50 = arith.constant 0 : index
    %c0_51 = arith.constant 0 : index
    %109 = vector.load %arg13[%c0_49, %c0_50, %c0_51] : memref<2x1x64xf32, #tpu.memory_space<vmem>>, vector<1x1x64xf32>
    %110 = vector.shape_cast %109 : vector<1x1x64xf32> to vector<1x64xf32>
    %111 = vector.broadcast %110 : vector<1x64xf32> to vector<32x64xf32>
    %112 = arith.addf %108, %111 : vector<32x64xf32>
    %cst_52 = arith.constant 5.000000e-01 : f32
    %113 = vector.broadcast %cst_52 : f32 to vector<32x64xf32>
    %114 = arith.mulf %113, %112 : vector<32x64xf32>
    %cst_53 = arith.constant 2.000000e+00 : f32
    %115 = math.sqrt %cst_53 : f32
    %cst_54 = arith.constant 1.000000e+00 : f32
    %116 = arith.divf %cst_54, %115 : f32
    %117 = vector.broadcast %116 : f32 to vector<32x64xf32>
    %118 = arith.mulf %112, %117 : vector<32x64xf32>
    %cst_55 = arith.constant 0.000000e+00 : f32
    %119 = vector.broadcast %cst_55 : f32 to vector<32x64xf32>
    %120 = arith.cmpf oge, %118, %119 : vector<32x64xf32>
    %cst_56 = arith.constant 1.000000e+00 : f32
    %cst_57 = arith.constant -1.000000e+00 : f32
    %121 = vector.broadcast %cst_56 : f32 to vector<32x64xf32>
    %122 = vector.broadcast %cst_57 : f32 to vector<32x64xf32>
    %123 = arith.select %120, %121, %122 : vector<32x64xi1>, vector<32x64xf32>
    %124 = math.absf %118 : vector<32x64xf32>
    %cst_58 = arith.constant 0.327591091 : f32
    %125 = vector.broadcast %cst_58 : f32 to vector<32x64xf32>
    %126 = arith.mulf %125, %124 : vector<32x64xf32>
    %cst_59 = arith.constant 1.000000e+00 : f32
    %127 = vector.broadcast %cst_59 : f32 to vector<32x64xf32>
    %128 = arith.addf %127, %126 : vector<32x64xf32>
    %129 = tpu.reciprocal %128 {approx = true} : vector<32x64xf32> -> vector<32x64xf32>
    %cst_60 = arith.constant 1.06140542 : f32
    %130 = vector.broadcast %cst_60 : f32 to vector<32x64xf32>
    %131 = arith.mulf %130, %129 : vector<32x64xf32>
    %cst_61 = arith.constant -1.45315206 : f32
    %132 = vector.broadcast %cst_61 : f32 to vector<32x64xf32>
    %133 = arith.addf %131, %132 : vector<32x64xf32>
    %134 = arith.mulf %133, %129 : vector<32x64xf32>
    %cst_62 = arith.constant 1.42141378 : f32
    %135 = vector.broadcast %cst_62 : f32 to vector<32x64xf32>
    %136 = arith.addf %134, %135 : vector<32x64xf32>
    %137 = arith.mulf %136, %129 : vector<32x64xf32>
    %cst_63 = arith.constant -0.284496725 : f32
    %138 = vector.broadcast %cst_63 : f32 to vector<32x64xf32>
    %139 = arith.addf %137, %138 : vector<32x64xf32>
    %140 = arith.mulf %139, %129 : vector<32x64xf32>
    %cst_64 = arith.constant 0.254829586 : f32
    %141 = vector.broadcast %cst_64 : f32 to vector<32x64xf32>
    %142 = arith.addf %140, %141 : vector<32x64xf32>
    %143 = arith.mulf %142, %129 : vector<32x64xf32>
    %cst_65 = arith.constant 0.000000e+00 : f32
    %144 = vector.broadcast %cst_65 : f32 to vector<32x64xf32>
    %145 = arith.subf %144, %124 : vector<32x64xf32>
    %146 = arith.mulf %145, %124 : vector<32x64xf32>
    %147 = math.exp %146 : vector<32x64xf32>
    %148 = arith.mulf %143, %147 : vector<32x64xf32>
    %cst_66 = arith.constant 1.000000e+00 : f32
    %149 = vector.broadcast %cst_66 : f32 to vector<32x64xf32>
    %150 = arith.subf %149, %148 : vector<32x64xf32>
    %151 = arith.mulf %123, %150 : vector<32x64xf32>
    %cst_67 = arith.constant 1.000000e+00 : f32
    %152 = vector.broadcast %cst_67 : f32 to vector<32x64xf32>
    %153 = arith.addf %152, %151 : vector<32x64xf32>
    %154 = arith.mulf %114, %153 : vector<32x64xf32>
    %c0_68 = arith.constant 0 : index
    %c0_69 = arith.constant 0 : index
    %c0_70 = arith.constant 0 : index
    %155 = vector.load %arg14[%c0_68, %c0_69, %c0_70] : memref<2x64x32xf32, #tpu.memory_space<vmem>>, vector<1x64x32xf32>
    %156 = vector.shape_cast %155 : vector<1x64x32xf32> to vector<64x32xf32>
    %cst_71 = arith.constant dense<0.000000e+00> : vector<32x32xf32>
    %157 = tpu.matmul %154, %156, %cst_71 {dimension_numbers = #tpu.dot_dimension_numbers<[1], [0], [0], [1], [0, 0, 1, 1], [], []>} : vector<32x64xf32>, vector<64x32xf32>, vector<32x32xf32> -> vector<32x32xf32>
    %c0_72 = arith.constant 0 : index
    %c0_73 = arith.constant 0 : index
    %c0_74 = arith.constant 0 : index
    %158 = vector.load %arg15[%c0_72, %c0_73, %c0_74] : memref<2x1x32xf32, #tpu.memory_space<vmem>>, vector<1x1x32xf32>
    %159 = vector.shape_cast %158 : vector<1x1x32xf32> to vector<1x32xf32>
    %160 = vector.broadcast %159 : vector<1x32xf32> to vector<32x32xf32>
    %161 = arith.addf %157, %160 : vector<32x32xf32>
    %162 = arith.addf %79, %161 : vector<32x32xf32>
    %c1 = arith.constant 1 : index
    %c0_75 = arith.constant 0 : index
    %c0_76 = arith.constant 0 : index
    %163 = vector.load %arg5[%c1, %c0_75, %c0_76] : memref<2x1x32xf32, #tpu.memory_space<vmem>>, vector<1x1x32xf32>
    %164 = vector.shape_cast %163 : vector<1x1x32xf32> to vector<1x32xf32>
    %c1_77 = arith.constant 1 : index
    %c0_78 = arith.constant 0 : index
    %c0_79 = arith.constant 0 : index
    %165 = vector.load %arg6[%c1_77, %c0_78, %c0_79] : memref<2x1x32xf32, #tpu.memory_space<vmem>>, vector<1x1x32xf32>
    %166 = vector.shape_cast %165 : vector<1x1x32xf32> to vector<1x32xf32>
    %cst_80 = arith.constant dense<0.000000e+00> : vector<32xf32>
    %167 = vector.multi_reduction <add>, %162, %cst_80 [1] : vector<32x32xf32> to vector<32xf32>
    %168 = vector.shape_cast %167 : vector<32xf32> to vector<32x1xf32>
    %cst_81 = arith.constant 3.200000e+01 : f32
    %169 = vector.broadcast %cst_81 : f32 to vector<32x1xf32>
    %170 = arith.divf %168, %169 : vector<32x1xf32>
    %171 = vector.broadcast %170 : vector<32x1xf32> to vector<32x32xf32>
    %172 = arith.subf %162, %171 : vector<32x32xf32>
    %173 = arith.mulf %172, %172 : vector<32x32xf32>
    %cst_82 = arith.constant dense<0.000000e+00> : vector<32xf32>
    %174 = vector.multi_reduction <add>, %173, %cst_82 [1] : vector<32x32xf32> to vector<32xf32>
    %175 = vector.shape_cast %174 : vector<32xf32> to vector<32x1xf32>
    %cst_83 = arith.constant 3.200000e+01 : f32
    %176 = vector.broadcast %cst_83 : f32 to vector<32x1xf32>
    %177 = arith.divf %175, %176 : vector<32x1xf32>
    %178 = vector.broadcast %170 : vector<32x1xf32> to vector<32x32xf32>
    %179 = arith.subf %162, %178 : vector<32x32xf32>
    %cst_84 = arith.constant 9.99999974E-6 : f32
    %180 = vector.broadcast %cst_84 : f32 to vector<32x1xf32>
    %181 = arith.addf %177, %180 : vector<32x1xf32>
    %182 = math.rsqrt %181 : vector<32x1xf32>
    %183 = vector.broadcast %182 : vector<32x1xf32> to vector<32x32xf32>
    %184 = arith.mulf %179, %183 : vector<32x32xf32>
    %185 = vector.broadcast %164 : vector<1x32xf32> to vector<32x32xf32>
    %186 = arith.mulf %184, %185 : vector<32x32xf32>
    %187 = vector.broadcast %166 : vector<1x32xf32> to vector<32x32xf32>
    %188 = arith.addf %186, %187 : vector<32x32xf32>
    %c1_85 = arith.constant 1 : index
    %c0_86 = arith.constant 0 : index
    %c0_87 = arith.constant 0 : index
    %189 = vector.load %arg7[%c1_85, %c0_86, %c0_87] : memref<2x32x96xf32, #tpu.memory_space<vmem>>, vector<1x32x96xf32>
    %190 = vector.shape_cast %189 : vector<1x32x96xf32> to vector<32x96xf32>
    %cst_88 = arith.constant dense<0.000000e+00> : vector<32x96xf32>
    %191 = tpu.matmul %188, %190, %cst_88 {dimension_numbers = #tpu.dot_dimension_numbers<[1], [0], [0], [1], [0, 0, 1, 1], [], []>} : vector<32x32xf32>, vector<32x96xf32>, vector<32x96xf32> -> vector<32x96xf32>
    %192 = vector.extract_strided_slice %191 {offsets = [0, 0], sizes = [32, 32], strides = [1, 1]} : vector<32x96xf32> to vector<32x32xf32>
    %193 = vector.shape_cast %192 : vector<32x32xf32> to vector<2x16x32xf32>
    %194 = tpu.transpose %193, [0, 2, 1] : vector<2x16x32xf32> -> vector<2x32x16xf32>
    %195 = vector.shape_cast %194 : vector<2x32x16xf32> to vector<8x8x16xf32>
    %196 = tpu.transpose %195, [0, 2, 1] : vector<8x8x16xf32> -> vector<8x16x8xf32>
    %197 = vector.extract_strided_slice %191 {offsets = [0, 32], sizes = [32, 32], strides = [1, 1]} : vector<32x96xf32> to vector<32x32xf32>
    %198 = vector.shape_cast %197 : vector<32x32xf32> to vector<2x16x32xf32>
    %199 = tpu.transpose %198, [0, 2, 1] : vector<2x16x32xf32> -> vector<2x32x16xf32>
    %200 = vector.shape_cast %199 : vector<2x32x16xf32> to vector<8x8x16xf32>
    %201 = tpu.transpose %200, [0, 2, 1] : vector<8x8x16xf32> -> vector<8x16x8xf32>
    %202 = vector.extract_strided_slice %191 {offsets = [0, 64], sizes = [32, 32], strides = [1, 1]} : vector<32x96xf32> to vector<32x32xf32>
    %203 = vector.shape_cast %202 : vector<32x32xf32> to vector<2x16x32xf32>
    %204 = tpu.transpose %203, [0, 2, 1] : vector<2x16x32xf32> -> vector<2x32x16xf32>
    %205 = vector.shape_cast %204 : vector<2x32x16xf32> to vector<8x8x16xf32>
    "tpu.trace_start"() <{level = 10 : i32, message = "znd,zmd->znm"}> : () -> ()
    %cst_89 = arith.constant dense<0.000000e+00> : vector<8x16x16xf32>
    %206 = tpu.matmul %196, %201, %cst_89 {dimension_numbers = #tpu.dot_dimension_numbers<[2], [2], [1], [1], [0, 0, 0, 1, 1, 1], [0], [0]>} : vector<8x16x8xf32>, vector<8x16x8xf32>, vector<8x16x16xf32> -> vector<8x16x16xf32>
    "tpu.trace_stop"() : () -> ()
    %cst_90 = arith.constant 0.353553385 : f32
    %207 = vector.broadcast %cst_90 : f32 to vector<8x16x16xf32>
    %208 = arith.mulf %206, %207 : vector<8x16x16xf32>
    %cst_91 = arith.constant dense<0xFF800000> : vector<8x16xf32>
    %209 = vector.multi_reduction <maximumf>, %208, %cst_91 [2] : vector<8x16x16xf32> to vector<8x16xf32>
    %210 = vector.shape_cast %209 : vector<8x16xf32> to vector<8x16x1xf32>
    %211 = vector.broadcast %210 : vector<8x16x1xf32> to vector<8x16x16xf32>
    %212 = arith.subf %208, %211 : vector<8x16x16xf32>
    %213 = math.exp %212 : vector<8x16x16xf32>
    %cst_92 = arith.constant dense<0.000000e+00> : vector<8x16xf32>
    %214 = vector.multi_reduction <add>, %213, %cst_92 [2] : vector<8x16x16xf32> to vector<8x16xf32>
    %215 = vector.shape_cast %214 : vector<8x16xf32> to vector<8x16x1xf32>
    %216 = tpu.reciprocal %215 {approx = true} : vector<8x16x1xf32> -> vector<8x16x1xf32>
    %217 = vector.broadcast %216 : vector<8x16x1xf32> to vector<8x16x16xf32>
    %218 = arith.mulf %213, %217 : vector<8x16x16xf32>
    "tpu.trace_start"() <{level = 10 : i32, message = "zdm,znm->zdn"}> : () -> ()
    %cst_93 = arith.constant dense<0.000000e+00> : vector<8x8x16xf32>
    %219 = tpu.matmul %205, %218, %cst_93 {dimension_numbers = #tpu.dot_dimension_numbers<[2], [2], [1], [1], [0, 0, 0, 1, 1, 1], [0], [0]>} : vector<8x8x16xf32>, vector<8x16x16xf32>, vector<8x8x16xf32> -> vector<8x8x16xf32>
    "tpu.trace_stop"() : () -> ()
    %220 = vector.shape_cast %219 : vector<8x8x16xf32> to vector<2x32x16xf32>
    %221 = tpu.transpose %220, [0, 2, 1] : vector<2x32x16xf32> -> vector<2x16x32xf32>
    %222 = vector.shape_cast %221 : vector<2x16x32xf32> to vector<32x32xf32>
    %c1_94 = arith.constant 1 : index
    %c0_95 = arith.constant 0 : index
    %c0_96 = arith.constant 0 : index
    %223 = vector.load %arg8[%c1_94, %c0_95, %c0_96] : memref<2x32x32xf32, #tpu.memory_space<vmem>>, vector<1x32x32xf32>
    %224 = vector.shape_cast %223 : vector<1x32x32xf32> to vector<32x32xf32>
    %cst_97 = arith.constant dense<0.000000e+00> : vector<32x32xf32>
    %225 = tpu.matmul %222, %224, %cst_97 {dimension_numbers = #tpu.dot_dimension_numbers<[1], [0], [0], [1], [0, 0, 1, 1], [], []>} : vector<32x32xf32>, vector<32x32xf32>, vector<32x32xf32> -> vector<32x32xf32>
    %c1_98 = arith.constant 1 : index
    %c0_99 = arith.constant 0 : index
    %c0_100 = arith.constant 0 : index
    %226 = vector.load %arg9[%c1_98, %c0_99, %c0_100] : memref<2x1x32xf32, #tpu.memory_space<vmem>>, vector<1x1x32xf32>
    %227 = vector.shape_cast %226 : vector<1x1x32xf32> to vector<1x32xf32>
    %228 = vector.broadcast %227 : vector<1x32xf32> to vector<32x32xf32>
    %229 = arith.addf %225, %228 : vector<32x32xf32>
    %230 = arith.addf %162, %229 : vector<32x32xf32>
    %c1_101 = arith.constant 1 : index
    %c0_102 = arith.constant 0 : index
    %c0_103 = arith.constant 0 : index
    %231 = vector.load %arg10[%c1_101, %c0_102, %c0_103] : memref<2x1x32xf32, #tpu.memory_space<vmem>>, vector<1x1x32xf32>
    %232 = vector.shape_cast %231 : vector<1x1x32xf32> to vector<1x32xf32>
    %c1_104 = arith.constant 1 : index
    %c0_105 = arith.constant 0 : index
    %c0_106 = arith.constant 0 : index
    %233 = vector.load %arg11[%c1_104, %c0_105, %c0_106] : memref<2x1x32xf32, #tpu.memory_space<vmem>>, vector<1x1x32xf32>
    %234 = vector.shape_cast %233 : vector<1x1x32xf32> to vector<1x32xf32>
    %cst_107 = arith.constant dense<0.000000e+00> : vector<32xf32>
    %235 = vector.multi_reduction <add>, %230, %cst_107 [1] : vector<32x32xf32> to vector<32xf32>
    %236 = vector.shape_cast %235 : vector<32xf32> to vector<32x1xf32>
    %cst_108 = arith.constant 3.200000e+01 : f32
    %237 = vector.broadcast %cst_108 : f32 to vector<32x1xf32>
    %238 = arith.divf %236, %237 : vector<32x1xf32>
    %239 = vector.broadcast %238 : vector<32x1xf32> to vector<32x32xf32>
    %240 = arith.subf %230, %239 : vector<32x32xf32>
    %241 = arith.mulf %240, %240 : vector<32x32xf32>
    %cst_109 = arith.constant dense<0.000000e+00> : vector<32xf32>
    %242 = vector.multi_reduction <add>, %241, %cst_109 [1] : vector<32x32xf32> to vector<32xf32>
    %243 = vector.shape_cast %242 : vector<32xf32> to vector<32x1xf32>
    %cst_110 = arith.constant 3.200000e+01 : f32
    %244 = vector.broadcast %cst_110 : f32 to vector<32x1xf32>
    %245 = arith.divf %243, %244 : vector<32x1xf32>
    %246 = vector.broadcast %238 : vector<32x1xf32> to vector<32x32xf32>
    %247 = arith.subf %230, %246 : vector<32x32xf32>
    %cst_111 = arith.constant 9.99999974E-6 : f32
    %248 = vector.broadcast %cst_111 : f32 to vector<32x1xf32>
    %249 = arith.addf %245, %248 : vector<32x1xf32>
    %250 = math.rsqrt %249 : vector<32x1xf32>
    %251 = vector.broadcast %250 : vector<32x1xf32> to vector<32x32xf32>
    %252 = arith.mulf %247, %251 : vector<32x32xf32>
    %253 = vector.broadcast %232 : vector<1x32xf32> to vector<32x32xf32>
    %254 = arith.mulf %252, %253 : vector<32x32xf32>
    %255 = vector.broadcast %234 : vector<1x32xf32> to vector<32x32xf32>
    %256 = arith.addf %254, %255 : vector<32x32xf32>
    %c1_112 = arith.constant 1 : index
    %c0_113 = arith.constant 0 : index
    %c0_114 = arith.constant 0 : index
    %257 = vector.load %arg12[%c1_112, %c0_113, %c0_114] : memref<2x32x64xf32, #tpu.memory_space<vmem>>, vector<1x32x64xf32>
    %258 = vector.shape_cast %257 : vector<1x32x64xf32> to vector<32x64xf32>
    %cst_115 = arith.constant dense<0.000000e+00> : vector<32x64xf32>
    %259 = tpu.matmul %256, %258, %cst_115 {dimension_numbers = #tpu.dot_dimension_numbers<[1], [0], [0], [1], [0, 0, 1, 1], [], []>} : vector<32x32xf32>, vector<32x64xf32>, vector<32x64xf32> -> vector<32x64xf32>
    %c1_116 = arith.constant 1 : index
    %c0_117 = arith.constant 0 : index
    %c0_118 = arith.constant 0 : index
    %260 = vector.load %arg13[%c1_116, %c0_117, %c0_118] : memref<2x1x64xf32, #tpu.memory_space<vmem>>, vector<1x1x64xf32>
    %261 = vector.shape_cast %260 : vector<1x1x64xf32> to vector<1x64xf32>
    %262 = vector.broadcast %261 : vector<1x64xf32> to vector<32x64xf32>
    %263 = arith.addf %259, %262 : vector<32x64xf32>
    %cst_119 = arith.constant 5.000000e-01 : f32
    %264 = vector.broadcast %cst_119 : f32 to vector<32x64xf32>
    %265 = arith.mulf %264, %263 : vector<32x64xf32>
    %cst_120 = arith.constant 2.000000e+00 : f32
    %266 = math.sqrt %cst_120 : f32
    %cst_121 = arith.constant 1.000000e+00 : f32
    %267 = arith.divf %cst_121, %266 : f32
    %268 = vector.broadcast %267 : f32 to vector<32x64xf32>
    %269 = arith.mulf %263, %268 : vector<32x64xf32>
    %cst_122 = arith.constant 0.000000e+00 : f32
    %270 = vector.broadcast %cst_122 : f32 to vector<32x64xf32>
    %271 = arith.cmpf oge, %269, %270 : vector<32x64xf32>
    %cst_123 = arith.constant 1.000000e+00 : f32
    %cst_124 = arith.constant -1.000000e+00 : f32
    %272 = vector.broadcast %cst_123 : f32 to vector<32x64xf32>
    %273 = vector.broadcast %cst_124 : f32 to vector<32x64xf32>
    %274 = arith.select %271, %272, %273 : vector<32x64xi1>, vector<32x64xf32>
    %275 = math.absf %269 : vector<32x64xf32>
    %cst_125 = arith.constant 0.327591091 : f32
    %276 = vector.broadcast %cst_125 : f32 to vector<32x64xf32>
    %277 = arith.mulf %276, %275 : vector<32x64xf32>
    %cst_126 = arith.constant 1.000000e+00 : f32
    %278 = vector.broadcast %cst_126 : f32 to vector<32x64xf32>
    %279 = arith.addf %278, %277 : vector<32x64xf32>
    %280 = tpu.reciprocal %279 {approx = true} : vector<32x64xf32> -> vector<32x64xf32>
    %cst_127 = arith.constant 1.06140542 : f32
    %281 = vector.broadcast %cst_127 : f32 to vector<32x64xf32>
    %282 = arith.mulf %281, %280 : vector<32x64xf32>
    %cst_128 = arith.constant -1.45315206 : f32
    %283 = vector.broadcast %cst_128 : f32 to vector<32x64xf32>
    %284 = arith.addf %282, %283 : vector<32x64xf32>
    %285 = arith.mulf %284, %280 : vector<32x64xf32>
    %cst_129 = arith.constant 1.42141378 : f32
    %286 = vector.broadcast %cst_129 : f32 to vector<32x64xf32>
    %287 = arith.addf %285, %286 : vector<32x64xf32>
    %288 = arith.mulf %287, %280 : vector<32x64xf32>
    %cst_130 = arith.constant -0.284496725 : f32
    %289 = vector.broadcast %cst_130 : f32 to vector<32x64xf32>
    %290 = arith.addf %288, %289 : vector<32x64xf32>
    %291 = arith.mulf %290, %280 : vector<32x64xf32>
    %cst_131 = arith.constant 0.254829586 : f32
    %292 = vector.broadcast %cst_131 : f32 to vector<32x64xf32>
    %293 = arith.addf %291, %292 : vector<32x64xf32>
    %294 = arith.mulf %293, %280 : vector<32x64xf32>
    %cst_132 = arith.constant 0.000000e+00 : f32
    %295 = vector.broadcast %cst_132 : f32 to vector<32x64xf32>
    %296 = arith.subf %295, %275 : vector<32x64xf32>
    %297 = arith.mulf %296, %275 : vector<32x64xf32>
    %298 = math.exp %297 : vector<32x64xf32>
    %299 = arith.mulf %294, %298 : vector<32x64xf32>
    %cst_133 = arith.constant 1.000000e+00 : f32
    %300 = vector.broadcast %cst_133 : f32 to vector<32x64xf32>
    %301 = arith.subf %300, %299 : vector<32x64xf32>
    %302 = arith.mulf %274, %301 : vector<32x64xf32>
    %cst_134 = arith.constant 1.000000e+00 : f32
    %303 = vector.broadcast %cst_134 : f32 to vector<32x64xf32>
    %304 = arith.addf %303, %302 : vector<32x64xf32>
    %305 = arith.mulf %265, %304 : vector<32x64xf32>
    %c1_135 = arith.constant 1 : index
    %c0_136 = arith.constant 0 : index
    %c0_137 = arith.constant 0 : index
    %306 = vector.load %arg14[%c1_135, %c0_136, %c0_137] : memref<2x64x32xf32, #tpu.memory_space<vmem>>, vector<1x64x32xf32>
    %307 = vector.shape_cast %306 : vector<1x64x32xf32> to vector<64x32xf32>
    %cst_138 = arith.constant dense<0.000000e+00> : vector<32x32xf32>
    %308 = tpu.matmul %305, %307, %cst_138 {dimension_numbers = #tpu.dot_dimension_numbers<[1], [0], [0], [1], [0, 0, 1, 1], [], []>} : vector<32x64xf32>, vector<64x32xf32>, vector<32x32xf32> -> vector<32x32xf32>
    %c1_139 = arith.constant 1 : index
    %c0_140 = arith.constant 0 : index
    %c0_141 = arith.constant 0 : index
    %309 = vector.load %arg15[%c1_139, %c0_140, %c0_141] : memref<2x1x32xf32, #tpu.memory_space<vmem>>, vector<1x1x32xf32>
    %310 = vector.shape_cast %309 : vector<1x1x32xf32> to vector<1x32xf32>
    %311 = vector.broadcast %310 : vector<1x32xf32> to vector<32x32xf32>
    %312 = arith.addf %308, %311 : vector<32x32xf32>
    %313 = arith.addf %230, %312 : vector<32x32xf32>
    %c0_142 = arith.constant 0 : index
    %c0_143 = arith.constant 0 : index
    %314 = vector.load %arg16[%c0_142, %c0_143] : memref<32x1xf32, #tpu.memory_space<vmem>>, vector<32x1xf32>
    %cst_144 = arith.constant dense<0.000000e+00> : vector<32x1xf32>
    %315 = tpu.matmul %313, %314, %cst_144 {dimension_numbers = #tpu.dot_dimension_numbers<[1], [0], [0], [1], [0, 0, 1, 1], [], []>} : vector<32x32xf32>, vector<32x1xf32>, vector<32x1xf32> -> vector<32x1xf32>
    %c0_145 = arith.constant 0 : index
    %c0_146 = arith.constant 0 : index
    %316 = vector.load %arg17[%c0_145, %c0_146] : memref<1x1xf32, #tpu.memory_space<vmem>>, vector<1x1xf32>
    %317 = vector.broadcast %316 : vector<1x1xf32> to vector<32x1xf32>
    %318 = arith.addf %315, %317 : vector<32x1xf32>
    %cst_147 = arith.constant 0.176776692 : f32
    %319 = vector.broadcast %cst_147 : f32 to vector<32x1xf32>
    %320 = arith.mulf %318, %319 : vector<32x1xf32>
    %321 = vector.shape_cast %320 : vector<32x1xf32> to vector<2x16x1xf32>
    %322 = vector.shape_cast %313 : vector<32x32xf32> to vector<2x16x32xf32>
    %cst_148 = arith.constant dense<0xFF800000> : vector<2x1xf32>
    %323 = vector.multi_reduction <maximumf>, %321, %cst_148 [1] : vector<2x16x1xf32> to vector<2x1xf32>
    %324 = vector.shape_cast %323 : vector<2x1xf32> to vector<2x1x1xf32>
    %325 = vector.broadcast %324 : vector<2x1x1xf32> to vector<2x16x1xf32>
    %326 = arith.subf %321, %325 : vector<2x16x1xf32>
    %327 = math.exp %326 : vector<2x16x1xf32>
    %cst_149 = arith.constant dense<0.000000e+00> : vector<2x1xf32>
    %328 = vector.multi_reduction <add>, %327, %cst_149 [1] : vector<2x16x1xf32> to vector<2x1xf32>
    %329 = vector.shape_cast %328 : vector<2x1xf32> to vector<2x1x1xf32>
    %330 = tpu.reciprocal %329 {approx = true} : vector<2x1x1xf32> -> vector<2x1x1xf32>
    %331 = vector.broadcast %330 : vector<2x1x1xf32> to vector<2x16x1xf32>
    %332 = arith.mulf %327, %331 : vector<2x16x1xf32>
    %333 = vector.broadcast %332 : vector<2x16x1xf32> to vector<2x16x32xf32>
    %334 = arith.mulf %333, %322 : vector<2x16x32xf32>
    %cst_150 = arith.constant dense<0.000000e+00> : vector<2x32xf32>
    %335 = vector.multi_reduction <add>, %334, %cst_150 [1] : vector<2x16x32xf32> to vector<2x32xf32>
    %c0_151 = arith.constant 0 : index
    %c0_152 = arith.constant 0 : index
    %336 = vector.load %arg18[%c0_151, %c0_152] : memref<1x32xf32, #tpu.memory_space<vmem>>, vector<1x32xf32>
    %c0_153 = arith.constant 0 : index
    %c0_154 = arith.constant 0 : index
    %337 = vector.load %arg19[%c0_153, %c0_154] : memref<1x32xf32, #tpu.memory_space<vmem>>, vector<1x32xf32>
    %cst_155 = arith.constant dense<0.000000e+00> : vector<2xf32>
    %338 = vector.multi_reduction <add>, %335, %cst_155 [1] : vector<2x32xf32> to vector<2xf32>
    %339 = vector.shape_cast %338 : vector<2xf32> to vector<2x1xf32>
    %cst_156 = arith.constant 3.200000e+01 : f32
    %340 = vector.broadcast %cst_156 : f32 to vector<2x1xf32>
    %341 = arith.divf %339, %340 : vector<2x1xf32>
    %342 = vector.broadcast %341 : vector<2x1xf32> to vector<2x32xf32>
    %343 = arith.subf %335, %342 : vector<2x32xf32>
    %344 = arith.mulf %343, %343 : vector<2x32xf32>
    %cst_157 = arith.constant dense<0.000000e+00> : vector<2xf32>
    %345 = vector.multi_reduction <add>, %344, %cst_157 [1] : vector<2x32xf32> to vector<2xf32>
    %346 = vector.shape_cast %345 : vector<2xf32> to vector<2x1xf32>
    %cst_158 = arith.constant 3.200000e+01 : f32
    %347 = vector.broadcast %cst_158 : f32 to vector<2x1xf32>
    %348 = arith.divf %346, %347 : vector<2x1xf32>
    %349 = vector.broadcast %341 : vector<2x1xf32> to vector<2x32xf32>
    %350 = arith.subf %335, %349 : vector<2x32xf32>
    %cst_159 = arith.constant 9.99999974E-6 : f32
    %351 = vector.broadcast %cst_159 : f32 to vector<2x1xf32>
    %352 = arith.addf %348, %351 : vector<2x1xf32>
    %353 = math.rsqrt %352 : vector<2x1xf32>
    %354 = vector.broadcast %353 : vector<2x1xf32> to vector<2x32xf32>
    %355 = arith.mulf %350, %354 : vector<2x32xf32>
    %356 = vector.broadcast %336 : vector<1x32xf32> to vector<2x32xf32>
    %357 = arith.mulf %355, %356 : vector<2x32xf32>
    %358 = vector.broadcast %337 : vector<1x32xf32> to vector<2x32xf32>
    %359 = arith.addf %357, %358 : vector<2x32xf32>
    %c0_160 = arith.constant 0 : index
    %c0_161 = arith.constant 0 : index
    %360 = vector.load %arg20[%c0_160, %c0_161] : memref<32x128xf32, #tpu.memory_space<vmem>>, vector<32x128xf32>
    %cst_162 = arith.constant dense<0.000000e+00> : vector<2x128xf32>
    %361 = tpu.matmul %359, %360, %cst_162 {dimension_numbers = #tpu.dot_dimension_numbers<[1], [0], [0], [1], [0, 0, 1, 1], [], []>} : vector<2x32xf32>, vector<32x128xf32>, vector<2x128xf32> -> vector<2x128xf32>
    %c0_163 = arith.constant 0 : index
    %c0_164 = arith.constant 0 : index
    %362 = vector.load %arg21[%c0_163, %c0_164] : memref<1x128xf32, #tpu.memory_space<vmem>>, vector<1x128xf32>
    %363 = vector.broadcast %362 : vector<1x128xf32> to vector<2x128xf32>
    %364 = arith.addf %361, %363 : vector<2x128xf32>
    %c0_165 = arith.constant 0 : index
    %c0_166 = arith.constant 0 : index
    %365 = vector.load %arg22[%c0_165, %c0_166] : memref<2x128xf32, #tpu.memory_space<vmem>>, vector<2x128xf32>
    tpu.vector_store %arg22[%c0_165, %c0_166], %364 {strides = array<i32>} : memref<2x128xf32, #tpu.memory_space<vmem>>, vector<2x128xf32>,
    return
  }
  func.func @transform_0(%arg0: i32) -> (i32, i32) {
    %c0_i32 = arith.constant 0 : i32
    %c0_i32_0 = arith.constant 0 : i32
    return %arg0, %c0_i32 : i32, i32
  }
  func.func @transform_1(%arg0: i32) -> (i32, i32) {
    %c0_i32 = arith.constant 0 : i32
    %c0_i32_0 = arith.constant 0 : i32
    %c0_i32_1 = arith.constant 0 : i32
    return %c0_i32, %c0_i32_0 : i32, i32
  }
  func.func @transform_2(%arg0: i32) -> (i32, i32) {
    %c0_i32 = arith.constant 0 : i32
    %c0_i32_0 = arith.constant 0 : i32
    %c0_i32_1 = arith.constant 0 : i32
    return %c0_i32, %c0_i32_0 : i32, i32
  }
  func.func @transform_3(%arg0: i32) -> (i32, i32) {
    %c0_i32 = arith.constant 0 : i32
    %c0_i32_0 = arith.constant 0 : i32
    %c0_i32_1 = arith.constant 0 : i32
    return %c0_i32, %c0_i32_0 : i32, i32
  }
  func.func @transform_4(%arg0: i32) -> (i32, i32, i32) {
    %c0_i32 = arith.constant 0 : i32
    %c0_i32_0 = arith.constant 0 : i32
    %c0_i32_1 = arith.constant 0 : i32
    %c0_i32_2 = arith.constant 0 : i32
    return %c0_i32, %c0_i32_0, %c0_i32_1 : i32, i32, i32
  }
  func.func @transform_5(%arg0: i32) -> (i32, i32, i32) {
    %c0_i32 = arith.constant 0 : i32
    %c0_i32_0 = arith.constant 0 : i32
    %c0_i32_1 = arith.constant 0 : i32
    %c0_i32_2 = arith.constant 0 : i32
    return %c0_i32, %c0_i32_0, %c0_i32_1 : i32, i32, i32
  }
  func.func @transform_6(%arg0: i32) -> (i32, i32, i32) {
    %c0_i32 = arith.constant 0 : i32
    %c0_i32_0 = arith.constant 0 : i32
    %c0_i32_1 = arith.constant 0 : i32
    %c0_i32_2 = arith.constant 0 : i32
    return %c0_i32, %c0_i32_0, %c0_i32_1 : i32, i32, i32
  }
  func.func @transform_7(%arg0: i32) -> (i32, i32, i32) {
    %c0_i32 = arith.constant 0 : i32
    %c0_i32_0 = arith.constant 0 : i32
    %c0_i32_1 = arith.constant 0 : i32
    %c0_i32_2 = arith.constant 0 : i32
    return %c0_i32, %c0_i32_0, %c0_i32_1 : i32, i32, i32
  }
  func.func @transform_8(%arg0: i32) -> (i32, i32, i32) {
    %c0_i32 = arith.constant 0 : i32
    %c0_i32_0 = arith.constant 0 : i32
    %c0_i32_1 = arith.constant 0 : i32
    %c0_i32_2 = arith.constant 0 : i32
    return %c0_i32, %c0_i32_0, %c0_i32_1 : i32, i32, i32
  }
  func.func @transform_9(%arg0: i32) -> (i32, i32, i32) {
    %c0_i32 = arith.constant 0 : i32
    %c0_i32_0 = arith.constant 0 : i32
    %c0_i32_1 = arith.constant 0 : i32
    %c0_i32_2 = arith.constant 0 : i32
    return %c0_i32, %c0_i32_0, %c0_i32_1 : i32, i32, i32
  }
  func.func @transform_10(%arg0: i32) -> (i32, i32, i32) {
    %c0_i32 = arith.constant 0 : i32
    %c0_i32_0 = arith.constant 0 : i32
    %c0_i32_1 = arith.constant 0 : i32
    %c0_i32_2 = arith.constant 0 : i32
    return %c0_i32, %c0_i32_0, %c0_i32_1 : i32, i32, i32
  }
  func.func @transform_11(%arg0: i32) -> (i32, i32, i32) {
    %c0_i32 = arith.constant 0 : i32
    %c0_i32_0 = arith.constant 0 : i32
    %c0_i32_1 = arith.constant 0 : i32
    %c0_i32_2 = arith.constant 0 : i32
    return %c0_i32, %c0_i32_0, %c0_i32_1 : i32, i32, i32
  }
  func.func @transform_12(%arg0: i32) -> (i32, i32, i32) {
    %c0_i32 = arith.constant 0 : i32
    %c0_i32_0 = arith.constant 0 : i32
    %c0_i32_1 = arith.constant 0 : i32
    %c0_i32_2 = arith.constant 0 : i32
    return %c0_i32, %c0_i32_0, %c0_i32_1 : i32, i32, i32
  }
  func.func @transform_13(%arg0: i32) -> (i32, i32, i32) {
    %c0_i32 = arith.constant 0 : i32
    %c0_i32_0 = arith.constant 0 : i32
    %c0_i32_1 = arith.constant 0 : i32
    %c0_i32_2 = arith.constant 0 : i32
    return %c0_i32, %c0_i32_0, %c0_i32_1 : i32, i32, i32
  }
  func.func @transform_14(%arg0: i32) -> (i32, i32, i32) {
    %c0_i32 = arith.constant 0 : i32
    %c0_i32_0 = arith.constant 0 : i32
    %c0_i32_1 = arith.constant 0 : i32
    %c0_i32_2 = arith.constant 0 : i32
    return %c0_i32, %c0_i32_0, %c0_i32_1 : i32, i32, i32
  }
  func.func @transform_15(%arg0: i32) -> (i32, i32) {
    %c0_i32 = arith.constant 0 : i32
    %c0_i32_0 = arith.constant 0 : i32
    %c0_i32_1 = arith.constant 0 : i32
    return %c0_i32, %c0_i32_0 : i32, i32
  }
  func.func @transform_16(%arg0: i32) -> (i32, i32) {
    %c0_i32 = arith.constant 0 : i32
    %c0_i32_0 = arith.constant 0 : i32
    %c0_i32_1 = arith.constant 0 : i32
    return %c0_i32, %c0_i32_0 : i32, i32
  }
  func.func @transform_17(%arg0: i32) -> (i32, i32) {
    %c0_i32 = arith.constant 0 : i32
    %c0_i32_0 = arith.constant 0 : i32
    %c0_i32_1 = arith.constant 0 : i32
    return %c0_i32, %c0_i32_0 : i32, i32
  }
  func.func @transform_18(%arg0: i32) -> (i32, i32) {
    %c0_i32 = arith.constant 0 : i32
    %c0_i32_0 = arith.constant 0 : i32
    %c0_i32_1 = arith.constant 0 : i32
    return %c0_i32, %c0_i32_0 : i32, i32
  }
  func.func @transform_19(%arg0: i32) -> (i32, i32) {
    %c0_i32 = arith.constant 0 : i32
    %c0_i32_0 = arith.constant 0 : i32
    %c0_i32_1 = arith.constant 0 : i32
    return %c0_i32, %c0_i32_0 : i32, i32
  }
  func.func @transform_20(%arg0: i32) -> (i32, i32) {
    %c0_i32 = arith.constant 0 : i32
    %c0_i32_0 = arith.constant 0 : i32
    %c0_i32_1 = arith.constant 0 : i32
    return %c0_i32, %c0_i32_0 : i32, i32
  }
  func.func @transform_21(%arg0: i32) -> (i32, i32) {
    %c0_i32 = arith.constant 0 : i32
    %c0_i32_0 = arith.constant 0 : i32
    return %arg0, %c0_i32 : i32, i32
  }
}

</mosaic_0001>

<bundles_post_ra>
// kernel: tpu_custom_call.1
= control target key start
LH: loop header
LB: loop body
LE: loop exit
PB: predicated region body
PF: predicated region fallthrough
CT: control target
= control target key end

     0   :  { %s8161_s0 = inlined_call_operand.vmem [shape: f32[32,64], index: 0, kind: input, shape index: {}]   ;;  %s8162_s1 = inlined_call_operand.hbm [shape: f32[16,32], index: 1, kind: input, shape index: {}]   ;;  %s8163_s2 = inlined_call_operand.vmem [shape: f32[64,32], index: 2, kind: input, shape index: {}]   ;;  %s8164_s3 = inlined_call_operand.hbm [shape: f32[1,32], index: 3, kind: input, shape index: {}]   ;;  %s8165_s4 = inlined_call_operand.vmem [shape: f32[2,1,32], index: 4, kind: input, shape index: {}]   ;;  %s8166_s5 = inlined_call_operand.vmem [shape: f32[2,1,32], index: 5, kind: input, shape index: {}]   ;;  %s8167_s6 = inlined_call_operand.vmem [shape: f32[2,32,96], index: 6, kind: input, shape index: {}]   ;;  %s8168_s7 = inlined_call_operand.vmem [shape: f32[2,32,32], index: 7, kind: input, shape index: {}]   ;;  %s8169_s8 = inlined_call_operand.vmem [shape: f32[2,1,32], index: 8, kind: input, shape index: {}]   ;;  %s8170_s9 = inlined_call_operand.vmem [shape: f32[2,1,32], index: 9, kind: input, shape index: {}]   ;;  %s8171_s10 = inlined_call_operand.vmem [shape: f32[2,1,32], index: 10, kind: input, shape index: {}]   ;;  %s8172_s11 = inlined_call_operand.vmem [shape: f32[2,32,64], index: 11, kind: input, shape index: {}]   ;;  %s8173_s12 = inlined_call_operand.vmem [shape: f32[2,1,64], index: 12, kind: input, shape index: {}]   ;;  %s8174_s13 = inlined_call_operand.vmem [shape: f32[2,64,32], index: 13, kind: input, shape index: {}]   ;;  %s8175_s14 = inlined_call_operand.vmem [shape: f32[2,1,32], index: 14, kind: input, shape index: {}]   ;;  %s8176_s15 = inlined_call_operand.vmem [shape: f32[32,1], index: 15, kind: input, shape index: {}]   ;;  %s8177_s16 = inlined_call_operand.<no memory space> [shape: f32[1,1], index: 16, kind: input, shape index: {}]   ;;  %s8178_s17 = inlined_call_operand.vmem [shape: f32[1,32], index: 17, kind: input, shape index: {}]   ;;  %s8179_s18 = inlined_call_operand.vmem [shape: f32[1,32], index: 18, kind: input, shape index: {}]   ;;  %s8180_s19 = inlined_call_operand.vmem [shape: f32[32,128], index: 19, kind: input, shape index: {}]   ;;  %s8181_s20 = inlined_call_operand.vmem [shape: f32[1,128], index: 20, kind: input, shape index: {}]   ;;  %s8182_s21 = inlined_call_operand.hbm [shape: f32[2,128], index: 21, kind: output, shape index: {}]  }
   0x1   :  { %8187 = sst [smem:[#allocation12_spill]] %s8161_s0  ;;  %v26_v0 = vstv %s8177_s16 }
   0x2   :  { %8188 = sst [smem:[#allocation13_spill]] %s8162_s1  ;;  %27 = vst [vmem:[#allocation2] sm:$0x1] %v26_v0 }
   0x3   :  { %8189 = sst [smem:[#allocation14_spill]] %s8163_s2 }
   0x4   :  { %8190 = sst [smem:[#allocation15_spill]] %s8164_s3 }
   0x5   :  { %8191 = sst [smem:[#allocation16_spill]] %s8165_s4 }
   0x6   :  { %8192 = sst [smem:[#allocation17_spill]] %s8166_s5 }
   0x7   :  { %28 = vsyncpa [#allocation4], 0 }
   0x8   :  { %29 = vsyncpa [#allocation7], 0 }
   0x9   :  { %30 = vsyncpa [#allocation5], 0  ;;  %s7015_s26 = smov [#allocation3]  }
   0xa   :  { %s38_s27 = sshll.u32 %s7015_s26, 4  ;;  %s39_s27 = int_to_ptr.vmem [resolvable:$true] %s38_s27 }
   0xb   :  { %s6957_s3 = scalar_lea.vmem %s39_s27, 256  ;;  %p6962_p1 = scmp.lt.s32.totalorder %s39_s27, %s39_s27 }
   0xc   :  { %p6958_p0 = scmp.ne.s32.totalorder %s39_s27, %s6957_s3  ;;  %p6963_p2 = scmp.lt.s32.totalorder %s6957_s3, %s6957_s3 }
   0xe   :  { %p6964_p3 = por %p6963_p2, %p6962_p1 }
  0x10   :  { %p6965_p4 = pnand %p6964_p3, %p6958_p0 }
  0x12   :  { %6968 = shalt.err (!%p6965_p4)
}
  0x13   :  { %s7016_s28 = smov 128   ;;  %s7017_s29 = smov 8  }
  0x14   :  { %s8193_s30 = sld [smem:[#allocation13_spill]]  ;;  %s7018_s16 = smov [#allocation6]  }
  0x15   :  { %s53_s5 = sshll.u32 %s7018_s16, 4  ;;  %s54_s5 = int_to_ptr.vmem [resolvable:$true] %s53_s5 }
  0x16   :  { %s6977_s22 = scalar_lea.vmem %s54_s5, 16  ;;  %s6981_s23 = scalar_lea.vmem %s54_s5, 32 }
  0x17   :  { %p6978_p5 = scmp.ne.s32.totalorder %s54_s5, %s6977_s22  ;;  %p6982_p6 = scmp.lt.s32.totalorder %s54_s5, %s54_s5 }
  0x18   :  { %p6983_p7 = scmp.lt.s32.totalorder %s6981_s23, %s6977_s22 }
  0x1a   :  { %44 = dma.hbm_to_vmem [thread:$0]  %s8193_s30, 256, %s39_s27, [#allocation4], %s7016_s28, %s7016_s28, %s7017_s29  }
  0x1b   :  { %p6984_p8 = por %p6983_p7, %p6982_p6 }
  0x1d   :  { %p6985_p9 = pnand %p6984_p8, %p6978_p5 }
  0x1f   :  { %6988 = shalt.err (!%p6985_p9)
}
  0x20   :  { %s8194_s2 = sld [smem:[#allocation15_spill]] }
  0x26   :  { %56 = dma.hbm_to_vmem [thread:$0]  %s8194_s2, 16, %s54_s5, [#allocation7]  }
  0x27   :  { %7009 = dma.done.wait [#allocation4], 256  }
  0x28   :  { %7010 = vsyncadd [#allocation4], 4294967040 }
  0x29   :  { %7011 = dma.done.wait [#allocation7], 16  }
  0x2a   :  { %7012 = vsyncadd [#allocation7], 4294967280  ;;  %s8195_s27 = sld [smem:[#allocation14_spill]]  ;;  %vm116_vm0 = vcmask 523264   ;;  %v6003_v14 = vld [vmem:[#allocation6] ss:$0 sm:$0xff] }
  0x2b   :  { %s8196_s16 = sld [smem:[#allocation12_spill]]  ;;  %v214_v16 = vld [vmem:[#allocation3] sm:$0xff]  ;;  %v215_v19 = vld [vmem:[#allocation3 + $0x8] sm:$0xff]  ;;  %vm222_vm1 = vcmask 261120   ;;  %v299_v52 = vld [vmem:[%s8167_s6 + $0x18] sm:$0xff]  ;;  %s7019_s5 = smov 96  }
  0x2c   :  { %v298_v53 = vld [vmem:[%s8167_s6 + $0x10] sm:$0xff]  ;;  %6385 = vmatprep.subr.mxu1 %v299_v52  ;;  %v297_v54 = vld [vmem:[%s8167_s6 + $0x8] sm:$0xff]  ;;  %v296_v55 = vld [vmem:[%s8167_s6] sm:$0xff]  ;;  %s8197_s29 = sld [smem:[#allocation16_spill]]  ;;  %vm873_vm2 = vcmask 64512   ;;  %vm1538_vm3 = vcmask 130048  }
  0x2d   :  { %6386 = vmatpush3.msra.mxu1 %v299_v52  ;;  %s8198_s30 = sld [smem:[#allocation17_spill]]  ;;  %s7020_s22 = smov 64   ;;  %vm7022_vm4 = vmmov 0   ;;  %vm5749_vm13 = vcmask 7168   ;;  %vm5850_vm14 = vcmask 1041409   ;;  %vm5853_vm15 = vcmask 254976  }
  0x2e   :  { %6387 = vmatprep.subr.mxu1 %v298_v53 }
  0x2f   :  { %6388 = vmatpush3.msra.mxu1 %v298_v53 }
  0x30   :  { %v108_v1 = vld [vmem:[%s8195_s27 + $0x38] sm:$0xff]  ;;  %v107_v2 = vld [vmem:[%s8195_s27 + $0x30] sm:$0xff]  ;;  %v106_v3 = vld [vmem:[%s8195_s27 + $0x28] sm:$0xff]  ;;  %6389 = vmatprep.subr.mxu1 %v297_v54 }
  0x31   :  { %6363 = vmatprep.subr.mxu0 %v108_v1  ;;  %v97_v4 = vld [vmem:[%s8196_s16] sm:$0xff]  ;;  %v104_v6 = vld [vmem:[%s8195_s27 + $0x18] sm:$0xff]  ;;  %v103_v7 = vld [vmem:[%s8195_s27 + $0x10] sm:$0xff]  ;;  %6390 = vmatpush3.msra.mxu1 %v297_v54 }
  0x32   :  { %6364 = vmatpush3.msra.mxu0 %v108_v1  ;;  %6379 = vmatprep.mubr.msk.f32.mxu0 %vm116_vm0, %v97_v4  ;;  %v105_v5 = vld [vmem:[%s8195_s27 + $0x20] sm:$0xff]  ;;  %v102_v8 = vld [vmem:[%s8195_s27 + $0x8] sm:$0xff]  ;;  %v99_v11 = vld [vmem:[%s8196_s16 + $0x10] sm:$0xff] }
  0x33   :  { %6365 = vmatprep.subr.mxu0 %v107_v2  ;;  %v101_v9 = vld [vmem:[%s8195_s27] sm:$0xff]  ;;  %v98_v10 = vld [vmem:[%s8196_s16 + $0x8] sm:$0xff]  ;;  %v100_v12 = vld [vmem:[%s8196_s16 + $0x18] sm:$0xff]  ;;  %6391 = vmatprep.subr.mxu1 %v296_v55 }
  0x34   :  { %6366 = vmatpush3.msra.mxu0 %v107_v2  ;;  %6392 = vmatpush3.msra.mxu1 %v296_v55 }
  0x35   :  { %6367 = vmatprep.subr.mxu0 %v106_v3 }
  0x36   :  { %6368 = vmatpush3.msra.mxu0 %v106_v3 }
  0x37   :  { %6369 = vmatprep.subr.mxu0 %v105_v5 }
  0x38   :  { %6370 = vmatpush3.msra.mxu0 %v105_v5  ;;  %v6008_v5 = vld [vmem:[%s8197_s29] ss:$0 sm:$0xff] }
  0x39   :  { %6371 = vmatprep.subr.mxu0 %v104_v6 }
  0x3a   :  { %6372 = vmatpush3.msra.mxu0 %v104_v6 }
  0x3b   :  { %6373 = vmatprep.subr.mxu0 %v103_v7 }
  0x3c   :  { %6374 = vmatpush3.msra.mxu0 %v103_v7  ;;  %v6009_v7 = vld [vmem:[%s8198_s30] ss:$0 sm:$0xff] }
  0x3d   :  { %6375 = vmatprep.subr.mxu0 %v102_v8 }
  0x3e   :  { %6376 = vmatpush3.msra.mxu0 %v102_v8 }
  0x3f   :  { %6377 = vmatprep.subr.mxu0 %v101_v9 }
  0x40   :  { %6378 = vmatpush3.msra.mxu0 %v101_v9 }
  0x41   :  { %6380 = vmatmul.mubr.msk.f32.vlgmr.msra.gmra.mxu0 %vm116_vm0, %v98_v10 }
  0x42   :  { %6382 = vmatprep.mubr.msk.f32.mxu0 %vm116_vm0, %v99_v11 }
  0x45   :  { %6383 = vmatmul.mubr.msk.f32.gmra.mxu0 %vm116_vm0, %v100_v12 }
 0x101   :  { %v6381_v13 = vpop.f32.mrf.mxu0 }
 0x102   :  { %v201_v17 = vadd.f32 %v6381_v13, %v6003_v14 }
 0x103   :  { %v195_v15 = vpop.f32.mrf.mxu0 }
 0x104   :  { %v196_v18 = vadd.f32 %v6003_v14, %v195_v15  ;;  %v7187_v24 = vadd.f32 %v215_v19, %v201_v17 }
 0x105   :  { %v6384_v20 = vpop.f32.mrf.mxu0 }
 0x106   :  { %v7185_v21 = vadd.f32 %v214_v16, %v196_v18  ;;  %v211_v22 = vadd.f32 %v6384_v20, %v6003_v14  ;;  %v226_v30 = vsel %vm222_vm1, %v7187_v24, 0.0 }
 0x107   :  { %v205_v23 = vpop.f32.mrf.mxu0 }
 0x108   :  { %v206_v25 = vadd.f32 %v6003_v14, %v205_v23  ;;  %v223_v26 = vsel %vm222_vm1, %v7185_v21, 0.0  ;;  %v7191_v27 = vadd.f32 %v215_v19, %v211_v22 }
 0x109   :  { %224 = vadd.xlane.f32.xlu0 %v223_v26 }
 0x10a   :  { %v7193_v28 = vadd.f32 %v214_v16, %v206_v25  ;;  %v232_v31 = vsel %vm222_vm1, %v7191_v27, 0.0 }
 0x10c   :  { %v229_v29 = vsel %vm222_vm1, %v7193_v28, 0.0 }
 0x10d   :  { %230 = vadd.xlane.f32.xlu1 %v229_v29  ;;  %227 = vadd.xlane.f32.xlu0 %v226_v30 }
 0x111   :  { %233 = vadd.xlane.f32.xlu1 %v232_v31 }
 0x192   :  { %v225_v32 = vpop.xlane.xlu0 %224 }
 0x193   :  { %v236_v33 = vmul.f32 0.03125, %v225_v32 }
 0x195   :  { %v240_v34 = vsub.f32 %v7185_v21, %v236_v33 }
 0x196   :  { %v231_v35 = vpop.xlane.xlu1 %230  ;;  %v228_v36 = vpop.xlane.xlu0 %227 }
 0x197   :  { %v238_v37 = vmul.f32 0.03125, %v231_v35  ;;  %v237_v38 = vmul.f32 0.03125, %v228_v36  ;;  %v244_v39 = vmul.f32 %v240_v34, %v240_v34 }
 0x199   :  { %v242_v40 = vsub.f32 %v7193_v28, %v238_v37  ;;  %v241_v41 = vsub.f32 %v7187_v24, %v237_v38  ;;  %v248_v42 = vsel %vm222_vm1, %v244_v39, 0.0 }
 0x19a   :  { %v234_v43 = vpop.xlane.xlu1 %233  ;;  %249 = vadd.xlane.f32.xlu0 %v248_v42 }
 0x19b   :  { %v239_v44 = vmul.f32 0.03125, %v234_v43  ;;  %v246_v45 = vmul.f32 %v242_v40, %v242_v40  ;;  %v245_v46 = vmul.f32 %v241_v41, %v241_v41 }
 0x19d   :  { %v243_v47 = vsub.f32 %v7191_v27, %v239_v44  ;;  %v254_v48 = vsel %vm222_vm1, %v246_v45, 0.0  ;;  %v251_v49 = vsel %vm222_vm1, %v245_v46, 0.0 }
 0x19e   :  { %255 = vadd.xlane.f32.xlu0 %v254_v48  ;;  %252 = vadd.xlane.f32.xlu1 %v251_v49 }
 0x19f   :  { %v247_v50 = vmul.f32 %v243_v47, %v243_v47 }
 0x1a1   :  { %v257_v51 = vsel %vm222_vm1, %v247_v50, 0.0 }
 0x1a2   :  { %258 = vadd.xlane.f32.xlu1 %v257_v51 }
 0x223   :  { %v250_v56 = vpop.xlane.xlu0 %249 }
 0x224   :  { %v260_v57 = vmul.f32 0.03125, %v250_v56 }
 0x226   :  { %v264_v58 = vadd.f32 1e-05, %v260_v57 }
 0x227   :  { %v253_v59 = vpop.xlane.xlu1 %252  ;;  %v256_v60 = vpop.xlane.xlu0 %255 }
 0x228   :  { %6743 = vrsqrt.f32 %v264_v58  ;;  %v261_v61 = vmul.f32 0.03125, %v253_v59  ;;  %v262_v62 = vmul.f32 0.03125, %v256_v60 }
 0x22a   :  { %v265_v63 = vadd.f32 1e-05, %v261_v61  ;;  %v266_v0 = vadd.f32 1e-05, %v262_v62 }
 0x22b   :  { %v259_v1 = vpop.xlane.xlu1 %258 }
 0x22c   :  { %6745 = vrsqrt.f32 %v265_v63  ;;  %v263_v2 = vmul.f32 0.03125, %v259_v1 }
 0x22d   :  { %6747 = vrsqrt.f32 %v266_v0 }
 0x22e   :  { %v267_v3 = vadd.f32 1e-05, %v263_v2 }
 0x230   :  { %6749 = vrsqrt.f32 %v267_v3 }
 0x235   :  { %v6744_v4 = vpop.eup %6743 }
 0x236   :  { %v272_v6 = vmul.f32 %v6744_v4, %v240_v34 }
 0x238   :  { %v282_v8 = vmul.f32 %v6008_v5, %v272_v6 }
 0x239   :  { %v6746_v9 = vpop.eup %6745 }
 0x23a   :  { %v6748_v10 = vpop.eup %6747  ;;  %v292_v11 = vadd.f32 %v6009_v7, %v282_v8  ;;  %v273_v12 = vmul.f32 %v6746_v9, %v241_v41 }
 0x23b   :  { %v274_v13 = vmul.f32 %v6748_v10, %v242_v40 }
 0x23c   :  { %6393 = vmatprep.mubr.msk.f32.mxu1 %vm222_vm1, %v292_v11  ;;  %v283_v14 = vmul.f32 %v6008_v5, %v273_v12 }
 0x23d   :  { %v6750_v15 = vpop.eup %6749  ;;  %v284_v16 = vmul.f32 %v6008_v5, %v274_v13 }
 0x23e   :  { %v293_v17 = vadd.f32 %v6009_v7, %v283_v14  ;;  %v275_v18 = vmul.f32 %v6750_v15, %v243_v47 }
 0x23f   :  { %v294_v19 = vadd.f32 %v6009_v7, %v284_v16 }
 0x240   :  { %6394 = vmatmul.mubr.msk.f32.vlgmr.msra.gmra.mxu1 %vm222_vm1, %v293_v17  ;;  %v285_v20 = vmul.f32 %v6008_v5, %v275_v18 }
 0x241   :  { %6396 = vmatprep.mubr.msk.f32.mxu1 %vm222_vm1, %v294_v19 }
 0x242   :  { %v295_v22 = vadd.f32 %v6009_v7, %v285_v20 }
 0x244   :  { %6397 = vmatmul.mubr.msk.f32.gmra.mxu1 %vm222_vm1, %v295_v22 }
 0x300   :  { %v7231_v23 = vpop.f32.mrf.mxu1 }
 0x301   :  { %723 = vrot.lane.b32.xlu1 %v7231_v23, %s7019_s5 }
 0x302   :  { %v7235_v25 = vpop.f32.mrf.mxu1 }
 0x303   :  { %721 = vrot.lane.b32.xlu0 %v7235_v25, %s7019_s5 }
 0x304   :  { %v7239_v26 = vpop.f32.mrf.mxu1 }
 0x305   :  { %727 = vrot.lane.b32.xlu1 %v7239_v26, %s7019_s5 }
 0x306   :  { %v7243_v29 = vpop.f32.mrf.mxu1 }
 0x309   :  { %725 = vrot.lane.b32.xlu1 %v7243_v29, %s7019_s5 }
 0x321   :  { %397 = vxpose.xlu0.b32.start [1/2] (short) (narrow) %v7235_v25, 32 }
 0x325   :  { %398 = vxpose.xlu0.b32.end [2/2] (short) (narrow) %v7231_v23, 32 }
 0x332   :  { %429 = vxpose.xlu1.b32.start [1/2] (short) (narrow) %v7243_v29, 32 }
 0x336   :  { %430 = vxpose.xlu1.b32.end [2/2] (short) (narrow) %v7239_v26, 32 }
 0x373   :  { %v724_v32 = vpop.permute.xlu1 %723 }
 0x375   :  { %v722_v30 = vpop.permute.xlu0 %721 }
 0x377   :  { %v728_v34 = vpop.permute.xlu1 %727 }
 0x37b   :  { %v726_v37 = vpop.permute.xlu1 %725 }
 0x39d   :  { %v413_v31 = vpop.trf.xlu0 }
 0x39e   :  { %461 = vxpose.xlu0.b32.start.end [1/1] (short) (narrow) %v413_v31, 16 }
 0x3a1   :  { %v414_v33 = vpop.trf.xlu0 }
 0x3a2   :  { %493 = vxpose.xlu1.b32.start.end [1/1] (short) (narrow) %v414_v33, 16 }
 0x3a3   :  { %733 = vxpose.xlu0.b32.start [1/2] (short) (narrow) %v722_v30, 32 }
 0x3a5   :  { %v415_v35 = vpop.trf.xlu0 }
 0x3a7   :  { %734 = vxpose.xlu0.b32.end [2/2] (short) (narrow) %v724_v32, 32 }
 0x3a9   :  { %v416_v36 = vpop.trf.xlu0 }
 0x3aa   :  { %557 = vxpose.xlu1.b32.start.end [1/1] (short) (narrow) %v416_v36, 16 }
 0x3ae   :  { %v445_v38 = vpop.trf.xlu1 }
 0x3af   :  { %765 = vxpose.xlu1.b32.start [1/2] (short) (narrow) %v726_v37, 32 }
 0x3b0   :  { %525 = vxpose.xlu0.b32.start.end [1/1] (short) (narrow) %v415_v35, 16 }
 0x3b2   :  { %v446_v39 = vpop.trf.xlu1 }
 0x3b3   :  { %766 = vxpose.xlu1.b32.end [2/2] (short) (narrow) %v728_v34, 32 }
 0x3b5   :  { %589 = vxpose.xlu0.b32.start.end [1/1] (short) (narrow) %v445_v38, 16 }
 0x3b6   :  { %v447_v40 = vpop.trf.xlu1 }
 0x3ba   :  { %621 = vxpose.xlu0.b32.start.end [1/1] (short) (narrow) %v446_v39, 16  ;;  %v448_v41 = vpop.trf.xlu1 }
 0x3bc   :  { %685 = vxpose.xlu1.b32.start.end [1/1] (short) (narrow) %v448_v41, 16 }
 0x3bf   :  { %653 = vxpose.xlu0.b32.start.end [1/1] (short) (narrow) %v447_v40, 16 }
 0x41a   :  { %v477_v42 = vpop.trf.xlu0 }
 0x41b   :  { %6401 = vmatprep.mubr.msk.f32.mxu1 %vm873_vm2, %v477_v42 }
 0x41e   :  { %v478_v43 = vpop.trf.xlu0  ;;  %v509_v44 = vpop.trf.xlu1 }
 0x422   :  { %v749_v45 = vpop.trf.xlu0  ;;  %v510_v46 = vpop.trf.xlu1 }
 0x423   :  { %6399 = vmatprep.subr.mxu1 %v749_v45 }
 0x424   :  { %6400 = vmatpush3.msra.mxu1 %v749_v45 }
 0x425   :  { %6402 = vmatmul.mubr.msk.f32.vlgmr.msra.gmra.mxu1 %vm873_vm2, %v478_v43 }
 0x426   :  { %v750_v47 = vpop.trf.xlu0  ;;  %6406 = vmatprep.mubr.msk.f32.mxu1 %vm873_vm2, %v509_v44  ;;  %v573_v48 = vpop.trf.xlu1 }
 0x427   :  { %6404 = vmatprep.subr.mxu1 %v750_v47 }
 0x428   :  { %6405 = vmatpush3.msra.mxu1 %v750_v47 }
 0x429   :  { %6407 = vmatmul.mubr.msk.f32.vlgmr.msra.gmra.mxu1 %vm873_vm2, %v510_v46 }
 0x42a   :  { %v751_v49 = vpop.trf.xlu0  ;;  %v574_v50 = vpop.trf.xlu1  ;;  %6416 = vmatprep.mubr.msk.f32.mxu1 %vm873_vm2, %v573_v48 }
 0x42b   :  { %6409 = vmatprep.subr.mxu0 %v751_v49 }
 0x42c   :  { %6410 = vmatpush3.msra.mxu0 %v751_v49 }
 0x42e   :  { %v752_v51 = vpop.trf.xlu0  ;;  %v781_v52 = vpop.trf.xlu1 }
 0x42f   :  { %6414 = vmatprep.subr.mxu1 %v752_v51  ;;  %6419 = vmatprep.subr.mxu0 %v781_v52 }
 0x430   :  { %6415 = vmatpush3.msra.mxu1 %v752_v51 }
 0x431   :  { %6417 = vmatmul.mubr.msk.f32.vlgmr.msra.gmra.mxu1 %vm873_vm2, %v574_v50 }
 0x432   :  { %v541_v53 = vpop.trf.xlu0  ;;  %v782_v54 = vpop.trf.xlu1 }
 0x433   :  { %6411 = vmatprep.mubr.msk.f32.mxu0 %vm873_vm2, %v541_v53  ;;  %6424 = vmatprep.subr.mxu1 %v782_v54 }
 0x434   :  { %6425 = vmatpush3.msra.mxu1 %v782_v54 }
 0x436   :  { %v542_v55 = vpop.trf.xlu0  ;;  %v783_v56 = vpop.trf.xlu1 }
 0x437   :  { %6412 = vmatmul.mubr.msk.f32.vlgmr.msra.gmra.mxu0 %vm873_vm2, %v542_v55 }
 0x438   :  { %6420 = vmatpush3.msra.mxu0 %v781_v52 }
 0x439   :  { %6429 = vmatprep.subr.mxu0 %v783_v56 }
 0x43a   :  { %v605_v57 = vpop.trf.xlu0  ;;  %v784_v58 = vpop.trf.xlu1 }
 0x43b   :  { %6421 = vmatprep.mubr.msk.f32.mxu0 %vm873_vm2, %v605_v57  ;;  %6434 = vmatprep.subr.mxu1 %v784_v58 }
 0x43e   :  { %v606_v59 = vpop.trf.xlu0  ;;  %v701_v61 = vpop.trf.xlu1 }
 0x43f   :  { %6422 = vmatmul.mubr.msk.f32.vlgmr.msra.gmra.mxu0 %vm873_vm2, %v606_v59 }
 0x440   :  { %6430 = vmatpush3.msra.mxu0 %v783_v56 }
 0x442   :  { %v637_v60 = vpop.trf.xlu0  ;;  %v702_v63 = vpop.trf.xlu1 }
 0x443   :  { %6426 = vmatprep.mubr.msk.f32.mxu1 %vm873_vm2, %v637_v60 }
 0x446   :  { %v638_v62 = vpop.trf.xlu0 }
 0x447   :  { %6427 = vmatmul.mubr.msk.f32.vlgmr.msra.gmra.mxu1 %vm873_vm2, %v638_v62 }
 0x448   :  { %6435 = vmatpush3.msra.mxu1 %v784_v58  ;;  %6436 = vmatprep.mubr.msk.f32.mxu1 %vm873_vm2, %v701_v61 }
 0x44a   :  { %v669_v0 = vpop.trf.xlu0 }
 0x44b   :  { %6431 = vmatprep.mubr.msk.f32.mxu0 %vm873_vm2, %v669_v0  ;;  %6437 = vmatmul.mubr.msk.f32.vlgmr.msra.gmra.mxu1 %vm873_vm2, %v702_v63 }
 0x44e   :  { %v670_v1 = vpop.trf.xlu0 }
 0x44f   :  { %6432 = vmatmul.mubr.msk.f32.vlgmr.msra.gmra.mxu0 %vm873_vm2, %v670_v1 }
 0x4e5   :  { %v6403_v2 = vpop.f32.mrf.mxu1 }
 0x4e6   :  { %v7267_v3 = vmul.f32 0.35355338, %v6403_v2 }
 0x4e7   :  { %v946_v4 = vpop.f32.mrf.mxu1 }
 0x4e8   :  { %v7269_v5 = vmul.f32 0.35355338, %v946_v4  ;;  %v1542_v6 = vsel %vm1538_vm3, %v7267_v3, -inf }
 0x4e9   :  { %1543 = vmax.xlane.f32.xlu0 %v1542_v6  ;;  %v6408_v7 = vpop.f32.mrf.mxu1 }
 0x4ea   :  { %v7273_v8 = vmul.f32 0.35355338, %v6408_v7  ;;  %v1539_v9 = vsel %vm1538_vm3, %v7269_v5, -inf }
 0x4eb   :  { %1540 = vmax.xlane.f32.xlu1 %v1539_v9  ;;  %v1027_v10 = vpop.f32.mrf.mxu1 }
 0x4ec   :  { %v7277_v11 = vmul.f32 0.35355338, %v1027_v10  ;;  %v1548_v12 = vsel %vm1538_vm3, %v7273_v8, -inf }
 0x4ee   :  { %v1545_v13 = vsel %vm1538_vm3, %v7277_v11, -inf }
 0x4ef   :  { %1549 = vmax.xlane.f32.xlu1 %v1548_v12  ;;  %1546 = vmax.xlane.f32.xlu0 %v1545_v13 }
 0x4f1   :  { %v6418_v14 = vpop.f32.mrf.mxu1 }
 0x4f2   :  { %v7283_v15 = vmul.f32 0.35355338, %v6418_v14 }
 0x4f3   :  { %v1189_v16 = vpop.f32.mrf.mxu1 }
 0x4f4   :  { %v1560_v17 = vsel %vm1538_vm3, %v7283_v15, -inf  ;;  %v7287_v18 = vmul.f32 0.35355338, %v1189_v16 }
 0x4f5   :  { %1561 = vmax.xlane.f32.xlu0 %v1560_v17 }
 0x4f6   :  { %v1557_v19 = vsel %vm1538_vm3, %v7287_v18, -inf }
 0x4f7   :  { %v6413_v20 = vpop.f32.mrf.mxu0 }
 0x4f8   :  { %v7291_v22 = vmul.f32 0.35355338, %v6413_v20 }
 0x4f9   :  { %1558 = vmax.xlane.f32.xlu0 %v1557_v19  ;;  %v1108_v30 = vpop.f32.mrf.mxu0 }
 0x4fa   :  { %v7293_v31 = vmul.f32 0.35355338, %v1108_v30  ;;  %v1554_v32 = vsel %vm1538_vm3, %v7291_v22, -inf }
 0x4fb   :  { %1555 = vmax.xlane.f32.xlu1 %v1554_v32 }
 0x4fc   :  { %v1551_v33 = vsel %vm1538_vm3, %v7293_v31, -inf }
 0x4ff   :  { %1552 = vmax.xlane.f32.xlu1 %v1551_v33  ;;  %v6423_v34 = vpop.f32.mrf.mxu0 }
 0x500   :  { %v7299_v35 = vmul.f32 0.35355338, %v6423_v34 }
 0x501   :  { %v1270_v36 = vpop.f32.mrf.mxu0 }
 0x502   :  { %v7301_v37 = vmul.f32 0.35355338, %v1270_v36  ;;  %v1566_v38 = vsel %vm1538_vm3, %v7299_v35, -inf }
 0x503   :  { %1567 = vmax.xlane.f32.xlu1 %v1566_v38 }
 0x504   :  { %v1563_v39 = vsel %vm1538_vm3, %v7301_v37, -inf }
 0x507   :  { %1564 = vmax.xlane.f32.xlu1 %v1563_v39  ;;  %v6428_v40 = vpop.f32.mrf.mxu1 }
 0x508   :  { %v7307_v41 = vmul.f32 0.35355338, %v6428_v40 }
 0x509   :  { %v1351_v42 = vpop.f32.mrf.mxu1 }
 0x50a   :  { %v7309_v43 = vmul.f32 0.35355338, %v1351_v42  ;;  %v1572_v44 = vsel %vm1538_vm3, %v7307_v41, -inf }
 0x50b   :  { %1573 = vmax.xlane.f32.xlu0 %v1572_v44  ;;  %v6438_v45 = vpop.f32.mrf.mxu1 }
 0x50c   :  { %v7313_v46 = vmul.f32 0.35355338, %v6438_v45  ;;  %v1569_v48 = vsel %vm1538_vm3, %v7309_v43, -inf }
 0x50d   :  { %v1513_v47 = vpop.f32.mrf.mxu1 }
 0x50e   :  { %v1584_v51 = vsel %vm1538_vm3, %v7313_v46, -inf  ;;  %v7321_v52 = vmul.f32 0.35355338, %v1513_v47 }
 0x50f   :  { %1570 = vmax.xlane.f32.xlu0 %v1569_v48  ;;  %v6433_v49 = vpop.f32.mrf.mxu0 }
 0x510   :  { %v7317_v50 = vmul.f32 0.35355338, %v6433_v49  ;;  %v1581_v56 = vsel %vm1538_vm3, %v7321_v52, -inf }
 0x511   :  { %v1432_v53 = vpop.f32.mrf.mxu0 }
 0x512   :  { %v7323_v54 = vmul.f32 0.35355338, %v1432_v53  ;;  %v1578_v55 = vsel %vm1538_vm3, %v7317_v50, -inf }
 0x513   :  { %1585 = vmax.xlane.f32.xlu0 %v1584_v51  ;;  %1579 = vmax.xlane.f32.xlu1 %v1578_v55  ;;  %v7021_v51 = vmov 0.0  }
 0x514   :  { %v1575_v57 = vsel %vm1538_vm3, %v7323_v54, -inf  ;;  %6439 = vmatprep.subr.mxu0 %v7021_v51  ;;  %6446 = vmatprep.subr.mxu1 %v7021_v51 }
 0x515   :  { %6443 = vmatprep.mubr.msk.f32.mxu0 %vm7022_vm4, %v7021_v51  ;;  %6450 = vmatprep.mubr.msk.f32.mxu1 %vm7022_vm4, %v7021_v51 }
 0x517   :  { %1582 = vmax.xlane.f32.xlu0 %v1581_v56  ;;  %1576 = vmax.xlane.f32.xlu1 %v1575_v57 }
 0x528   :  { %799 = vrot.lane.b32.xlu1 %v7231_v23, %s7020_s22 }
 0x52c   :  { %803 = vrot.lane.b32.xlu1 %v7239_v26, %s7020_s22 }
 0x52d   :  { %797 = vrot.lane.b32.xlu0 %v7235_v25, %s7020_s22 }
 0x531   :  { %801 = vrot.lane.b32.xlu0 %v7243_v29, %s7020_s22 }
 0x572   :  { %v1544_v58 = vpop.xlane.xlu0 %1543 }
 0x573   :  { %v1588_v59 = vsub.f32 %v7267_v3, %v1544_v58 }
 0x574   :  { %v1541_v60 = vpop.xlane.xlu1 %1540 }
 0x575   :  { %v1605_v61 = vmul.f32 1.442695, %v1588_v59  ;;  %v1587_v62 = vsub.f32 %v7269_v5, %v1541_v60 }
 0x577   :  { %6751 = vpow2.f32 %v1605_v61  ;;  %v1603_v63 = vmul.f32 1.442695, %v1587_v62 }
 0x578   :  { %v1550_v0 = vpop.xlane.xlu1 %1549  ;;  %v1547_v23 = vpop.xlane.xlu0 %1546 }
 0x579   :  { %6753 = vpow2.f32 %v1603_v63  ;;  %v1590_v26 = vsub.f32 %v7273_v8, %v1550_v0  ;;  %v1589_v1 = vsub.f32 %v7277_v11, %v1547_v23 }
 0x57b   :  { %v1609_v25 = vmul.f32 1.442695, %v1590_v26  ;;  %v1607_v2 = vmul.f32 1.442695, %v1589_v1 }
 0x57d   :  { %6755 = vpow2.f32 %v1609_v25 }
 0x57e   :  { %v1562_v29 = vpop.xlane.xlu0 %1561  ;;  %6757 = vpow2.f32 %v1607_v2 }
 0x57f   :  { %v1594_v3 = vsub.f32 %v7283_v15, %v1562_v29 }
 0x581   :  { %v1617_v8 = vmul.f32 1.442695, %v1594_v3 }
 0x582   :  { %v1559_v6 = vpop.xlane.xlu0 %1558 }
 0x583   :  { %v1593_v11 = vsub.f32 %v7287_v18, %v1559_v6 }
 0x584   :  { %v7344_v4 = vpop.eup %6751  ;;  %v1556_v5 = vpop.xlane.xlu1 %1555 }
 0x585   :  { %v1592_v7 = vsub.f32 %v7291_v22, %v1556_v5  ;;  %v1638_v9 = vsel %vm1538_vm3, %v7344_v4, 0.0  ;;  %v1615_v17 = vmul.f32 1.442695, %v1593_v11 }
 0x586   :  { %v7349_v10 = vpop.eup %6753  ;;  %1639 = vadd.xlane.f32.xlu1 %v1638_v9 }
 0x587   :  { %v1613_v12 = vmul.f32 1.442695, %v1592_v7  ;;  %v1635_v13 = vsel %vm1538_vm3, %v7349_v10, 0.0 }
 0x588   :  { %v1553_v14 = vpop.xlane.xlu1 %1552  ;;  %1636 = vadd.xlane.f32.xlu0 %v1635_v13 }
 0x589   :  { %6759 = vpow2.f32 %v1613_v12  ;;  %v1591_v15 = vsub.f32 %v7293_v31, %v1553_v14 }
 0x58a   :  { %v7355_v16 = vpop.eup %6755  ;;  %6761 = vpow2.f32 %v1617_v8 }
 0x58b   :  { %v1611_v19 = vmul.f32 1.442695, %v1591_v15  ;;  %v1644_v20 = vsel %vm1538_vm3, %v7355_v16, 0.0  ;;  %v7359_v22 = vpop.eup %6757 }
 0x58c   :  { %v1568_v18 = vpop.xlane.xlu1 %1567  ;;  %1645 = vadd.xlane.f32.xlu1 %v1644_v20  ;;  %v1641_v31 = vsel %vm1538_vm3, %v7359_v22, 0.0 }
 0x58d   :  { %6763 = vpow2.f32 %v1611_v19  ;;  %v1596_v30 = vsub.f32 %v7299_v35, %v1568_v18 }
 0x58e   :  { %6765 = vpow2.f32 %v1615_v17 }
 0x58f   :  { %v1621_v32 = vmul.f32 1.442695, %v1596_v30 }
 0x590   :  { %v1565_v33 = vpop.xlane.xlu1 %1564  ;;  %1642 = vadd.xlane.f32.xlu1 %v1641_v31 }
 0x591   :  { %6767 = vpow2.f32 %v1621_v32  ;;  %v1595_v34 = vsub.f32 %v7301_v37, %v1565_v33 }
 0x593   :  { %v1619_v36 = vmul.f32 1.442695, %v1595_v34 }
 0x594   :  { %v1574_v38 = vpop.xlane.xlu0 %1573 }
 0x595   :  { %6769 = vpow2.f32 %v1619_v36  ;;  %v1598_v39 = vsub.f32 %v7307_v41, %v1574_v38 }
 0x596   :  { %v7366_v40 = vpop.eup %6759 }
 0x597   :  { %v1625_v42 = vmul.f32 1.442695, %v1598_v39  ;;  %v1650_v35 = vsel %vm1538_vm3, %v7366_v40, 0.0  ;;  %v7370_v44 = vpop.eup %6761 }
 0x598   :  { %1651 = vadd.xlane.f32.xlu0 %v1650_v35  ;;  %v1571_v45 = vpop.xlane.xlu0 %1570  ;;  %v1656_v41 = vsel %vm1538_vm3, %v7370_v44, 0.0 }
 0x599   :  { %6771 = vpow2.f32 %v1625_v42  ;;  %v1597_v47 = vsub.f32 %v7309_v43, %v1571_v45 }
 0x59a   :  { %v7373_v48 = vpop.eup %6763 }
 0x59b   :  { %v1623_v37 = vmul.f32 1.442695, %v1597_v47  ;;  %v1647_v49 = vsel %vm1538_vm3, %v7373_v48, 0.0  ;;  %v7381_v53 = vpop.eup %6765 }
 0x59c   :  { %v1580_v55 = vpop.xlane.xlu1 %1579  ;;  %1648 = vadd.xlane.f32.xlu1 %v1647_v49  ;;  %1657 = vadd.xlane.f32.xlu0 %v1656_v41  ;;  %v1586_v43 = vpop.xlane.xlu0 %1585  ;;  %v1653_v62 = vsel %vm1538_vm3, %v7381_v53, 0.0 }
 0x59d   :  { %6773 = vpow2.f32 %v1623_v37  ;;  %v1600_v56 = vsub.f32 %v7317_v50, %v1580_v55  ;;  %v1602_v57 = vsub.f32 %v7313_v46, %v1586_v43 }
 0x59e   :  { %v7385_v58 = vpop.eup %6767 }
 0x59f   :  { %v1629_v59 = vmul.f32 1.442695, %v1600_v56  ;;  %v1633_v60 = vmul.f32 1.442695, %v1602_v57  ;;  %v1662_v61 = vsel %vm1538_vm3, %v7385_v58, 0.0 }
 0x5a0   :  { %v1577_v63 = vpop.xlane.xlu1 %1576  ;;  %1663 = vadd.xlane.f32.xlu1 %v1662_v61  ;;  %1654 = vadd.xlane.f32.xlu0 %v1653_v62  ;;  %v1583_v0 = vpop.xlane.xlu0 %1582 }
 0x5a1   :  { %6775 = vpow2.f32 %v1629_v59  ;;  %v1599_v23 = vsub.f32 %v7323_v54, %v1577_v63  ;;  %v1601_v50 = vsub.f32 %v7321_v52, %v1583_v0 }
 0x5a2   :  { %v7393_v46 = vpop.eup %6769  ;;  %6777 = vpow2.f32 %v1633_v60 }
 0x5a3   :  { %v1627_v26 = vmul.f32 1.442695, %v1599_v23  ;;  %v1631_v1 = vmul.f32 1.442695, %v1601_v50  ;;  %v1659_v25 = vsel %vm1538_vm3, %v7393_v46, 0.0 }
 0x5a4   :  { %1660 = vadd.xlane.f32.xlu0 %v1659_v25  ;;  %v798_v13 = vpop.permute.xlu0 %797  ;;  %v800_v14 = vpop.permute.xlu1 %799 }
 0x5a5   :  { %6779 = vpow2.f32 %v1627_v26 }
 0x5a6   :  { %v7397_v2 = vpop.eup %6771  ;;  %6781 = vpow2.f32 %v1631_v1 }
 0x5a7   :  { %v1668_v29 = vsel %vm1538_vm3, %v7397_v2, 0.0 }
 0x5a8   :  { %1669 = vadd.xlane.f32.xlu1 %v1668_v29  ;;  %v802_v15 = vpop.permute.xlu0 %801  ;;  %v804_v17 = vpop.permute.xlu1 %803 }
 0x5aa   :  { %v7401_v54 = vpop.eup %6773 }
 0x5ab   :  { %v1665_v52 = vsel %vm1538_vm3, %v7401_v54, 0.0 }
 0x5ac   :  { %1666 = vadd.xlane.f32.xlu1 %v1665_v52 }
 0x5ae   :  { %v7405_v3 = vpop.eup %6775 }
 0x5af   :  { %v1674_v6 = vsel %vm1538_vm3, %v7405_v3, 0.0  ;;  %v7409_v5 = vpop.eup %6777 }
 0x5b0   :  { %1675 = vadd.xlane.f32.xlu0 %v1674_v6  ;;  %v1680_v8 = vsel %vm1538_vm3, %v7409_v5, 0.0 }
 0x5b2   :  { %v7411_v7 = vpop.eup %6779 }
 0x5b3   :  { %v1671_v9 = vsel %vm1538_vm3, %v7411_v7, 0.0  ;;  %v7417_v11 = vpop.eup %6781 }
 0x5b4   :  { %1672 = vadd.xlane.f32.xlu1 %v1671_v9  ;;  %1681 = vadd.xlane.f32.xlu0 %v1680_v8  ;;  %v1677_v12 = vsel %vm1538_vm3, %v7417_v11, 0.0 }
 0x5b8   :  { %1678 = vadd.xlane.f32.xlu0 %v1677_v12 }
 0x5e5   :  { %841 = vxpose.xlu0.b32.start [1/2] (short) (narrow) %v802_v15, 32  ;;  %v2414_v15 = vld [vmem:[%s8168_s7 + $0x18] sm:$0xff] }
 0x5e7   :  { %809 = vxpose.xlu1.b32.start [1/2] (short) (narrow) %v798_v13, 32 }
 0x5e9   :  { %842 = vxpose.xlu0.b32.end [2/2] (short) (narrow) %v804_v17, 32  ;;  %v2413_v17 = vld [vmem:[%s8168_s7 + $0x10] sm:$0xff] }
 0x5eb   :  { %810 = vxpose.xlu1.b32.end [2/2] (short) (narrow) %v800_v14, 32 }
 0x60f   :  { %v1640_v19 = vpop.xlane.xlu1 %1639 }
 0x610   :  { %6783 = vrcp.f32 %v1640_v19  ;;  %v2411_v19 = vld [vmem:[%s8168_s7] sm:$0xff] }
 0x611   :  { %v1637_v20 = vpop.xlane.xlu0 %1636 }
 0x612   :  { %6785 = vrcp.f32 %v1637_v20 }
 0x615   :  { %v1646_v18 = vpop.xlane.xlu1 %1645 }
 0x616   :  { %6787 = vrcp.f32 %v1646_v18 }
 0x619   :  { %v1643_v30 = vpop.xlane.xlu1 %1642 }
 0x61a   :  { %6789 = vrcp.f32 %v1643_v30 }
 0x61d   :  { %v6784_v32 = vpop.eup %6783 }
 0x61e   :  { %v1700_v31 = vmul.f32 %v6784_v32, %v7344_v4 }
 0x61f   :  { %v6786_v33 = vpop.eup %6785 }
 0x620   :  { %6440 = vmatpush3.xpose.msk.msra.mxu0 %vm1538_vm3, %v1700_v31  ;;  %v1699_v34 = vmul.f32 %v6786_v33, %v7349_v10 }
 0x621   :  { %6441 = vmatprep.subr.mxu0 %v7021_v51  ;;  %v1652_v42 = vpop.xlane.xlu0 %1651 }
 0x622   :  { %6791 = vrcp.f32 %v1652_v42 }
 0x623   :  { %v6788_v36 = vpop.eup %6787 }
 0x624   :  { %6442 = vmatpush3.xpose.msk.msra.mxu0 %vm1538_vm3, %v1699_v34  ;;  %v1702_v38 = vmul.f32 %v6788_v36, %v7355_v16 }
 0x625   :  { %6453 = vmatprep.subr.mxu0 %v7021_v51  ;;  %v1649_v10 = vpop.xlane.xlu1 %1648  ;;  %v1658_v35 = vpop.xlane.xlu0 %1657 }
 0x626   :  { %6447 = vmatpush3.xpose.msk.msra.mxu1 %vm1538_vm3, %v1702_v38  ;;  %6793 = vrcp.f32 %v1649_v10 }
 0x627   :  { %v6790_v39 = vpop.eup %6789  ;;  %6448 = vmatprep.subr.mxu1 %v7021_v51  ;;  %6795 = vrcp.f32 %v1658_v35 }
 0x628   :  { %v1701_v4 = vmul.f32 %v6790_v39, %v7359_v22 }
 0x629   :  { %v1664_v45 = vpop.xlane.xlu1 %1663  ;;  %v1655_v47 = vpop.xlane.xlu0 %1654 }
 0x62a   :  { %6449 = vmatpush3.xpose.msk.msra.mxu1 %vm1538_vm3, %v1701_v4  ;;  %6797 = vrcp.f32 %v1664_v45 }
 0x62b   :  { %6460 = vmatprep.subr.mxu1 %v7021_v51  ;;  %6799 = vrcp.f32 %v1655_v47 }
 0x62d   :  { %v1661_v37 = vpop.xlane.xlu0 %1660 }
 0x62e   :  { %6801 = vrcp.f32 %v1661_v37 }
 0x62f   :  { %v6792_v55 = vpop.eup %6791 }
 0x630   :  { %v1704_v59 = vmul.f32 %v6792_v55, %v7366_v40 }
 0x631   :  { %v1670_v16 = vpop.xlane.xlu1 %1669 }
 0x632   :  { %6803 = vrcp.f32 %v1670_v16 }
 0x633   :  { %v6794_v56 = vpop.eup %6793 }
 0x634   :  { %v6796_v60 = vpop.eup %6795  ;;  %v1703_v0 = vmul.f32 %v6794_v56, %v7373_v48 }
 0x635   :  { %v1667_v49 = vpop.xlane.xlu1 %1666  ;;  %v1706_v23 = vmul.f32 %v6796_v60, %v7370_v44 }
 0x636   :  { %6805 = vrcp.f32 %v1667_v49 }
 0x637   :  { %v6798_v61 = vpop.eup %6797 }
 0x638   :  { %v6800_v40 = vpop.eup %6799  ;;  %v1708_v48 = vmul.f32 %v6798_v61, %v7385_v58 }
 0x639   :  { %v1676_v41 = vpop.xlane.xlu0 %1675  ;;  %v1705_v1 = vmul.f32 %v6800_v40, %v7381_v53 }
 0x63a   :  { %6807 = vrcp.f32 %v1676_v41 }
 0x63b   :  { %v6802_v50 = vpop.eup %6801 }
 0x63c   :  { %v1707_v53 = vmul.f32 %v6802_v50, %v7393_v46 }
 0x63d   :  { %v1673_v22 = vpop.xlane.xlu1 %1672  ;;  %v1682_v43 = vpop.xlane.xlu0 %1681 }
 0x63e   :  { %6809 = vrcp.f32 %v1673_v22  ;;  %v6054_v22 = vld [vmem:[%s8169_s8] ss:$0 sm:$0xff] }
 0x63f   :  { %6811 = vrcp.f32 %v1682_v43  ;;  %v6804_v25 = vpop.eup %6803 }
 0x640   :  { %v1710_v58 = vmul.f32 %v6804_v25, %v7397_v2 }
 0x641   :  { %v1679_v62 = vpop.xlane.xlu0 %1678 }
 0x642   :  { %6813 = vrcp.f32 %v1679_v62 }
 0x643   :  { %v6806_v29 = vpop.eup %6805 }
 0x644   :  { %v1709_v46 = vmul.f32 %v6806_v29, %v7401_v54 }
 0x647   :  { %v6808_v6 = vpop.eup %6807 }
 0x648   :  { %v1712_v2 = vmul.f32 %v6808_v6, %v7405_v3 }
 0x64b   :  { %v6810_v8 = vpop.eup %6809 }
 0x64c   :  { %v6812_v12 = vpop.eup %6811  ;;  %v1711_v13 = vmul.f32 %v6810_v8, %v7411_v7 }
 0x64d   :  { %v1714_v54 = vmul.f32 %v6812_v12, %v7409_v5 }
 0x64f   :  { %v6814_v14 = vpop.eup %6813 }
 0x650   :  { %v1713_v7 = vmul.f32 %v6814_v14, %v7417_v11  ;;  %v2412_v11 = vld [vmem:[%s8168_s7 + $0x8] sm:$0xff] }
 0x661   :  { %v857_v44 = vpop.trf.xlu0 }
 0x663   :  { %v825_v57 = vpop.trf.xlu1 }
 0x664   :  { %6444 = vmatmul.mubr.msk.f32.vlgmr.msra.gmra.mxu0 %vm1538_vm3, %v825_v57 }
 0x665   :  { %6454 = vmatpush3.xpose.msk.msra.mxu0 %vm1538_vm3, %v1704_v59  ;;  %6457 = vmatprep.mubr.msk.f32.mxu0 %vm7022_vm4, %v7021_v51  ;;  %v858_v9 = vpop.trf.xlu0 }
 0x666   :  { %6455 = vmatprep.subr.mxu0 %v7021_v51 }
 0x667   :  { %v826_v63 = vpop.trf.xlu1 }
 0x668   :  { %6451 = vmatmul.mubr.msk.f32.vlgmr.msra.gmra.mxu1 %vm1538_vm3, %v826_v63 }
 0x669   :  { %6456 = vmatpush3.xpose.msk.msra.mxu0 %vm1538_vm3, %v1703_v0  ;;  %6461 = vmatpush3.xpose.msk.msra.mxu1 %vm1538_vm3, %v1706_v23  ;;  %v859_v3 = vpop.trf.xlu0 }
 0x66a   :  { %6462 = vmatprep.subr.mxu1 %v7021_v51  ;;  %6467 = vmatprep.subr.mxu0 %v7021_v51 }
 0x66b   :  { %v827_v26 = vpop.trf.xlu1  ;;  %6464 = vmatprep.mubr.msk.f32.mxu1 %vm7022_vm4, %v7021_v51 }
 0x66c   :  { %6458 = vmatmul.mubr.msk.f32.vlgmr.msra.gmra.mxu0 %vm1538_vm3, %v827_v26 }
 0x66d   :  { %6463 = vmatpush3.xpose.msk.msra.mxu1 %vm1538_vm3, %v1705_v1  ;;  %6468 = vmatpush3.xpose.msk.msra.mxu0 %vm1538_vm3, %v1708_v48  ;;  %v860_v5 = vpop.trf.xlu0 }
 0x66e   :  { %6469 = vmatprep.subr.mxu0 %v7021_v51  ;;  %6474 = vmatprep.subr.mxu1 %v7021_v51 }
 0x66f   :  { %v828_v52 = vpop.trf.xlu1  ;;  %6471 = vmatprep.mubr.msk.f32.mxu0 %vm7022_vm4, %v7021_v51 }
 0x670   :  { %6465 = vmatmul.mubr.msk.f32.vlgmr.msra.gmra.mxu1 %vm1538_vm3, %v828_v52 }
 0x671   :  { %6470 = vmatpush3.xpose.msk.msra.mxu0 %vm1538_vm3, %v1707_v53  ;;  %6475 = vmatpush3.xpose.msk.msra.mxu1 %vm1538_vm3, %v1710_v58 }
 0x672   :  { %6476 = vmatprep.subr.mxu1 %v7021_v51  ;;  %6481 = vmatprep.subr.mxu0 %v7021_v51 }
 0x673   :  { %6478 = vmatprep.mubr.msk.f32.mxu1 %vm7022_vm4, %v7021_v51 }
 0x674   :  { %6472 = vmatmul.mubr.msk.f32.vlgmr.msra.gmra.mxu0 %vm1538_vm3, %v857_v44 }
 0x675   :  { %6477 = vmatpush3.xpose.msk.msra.mxu1 %vm1538_vm3, %v1709_v46  ;;  %6482 = vmatpush3.xpose.msk.msra.mxu0 %vm1538_vm3, %v1712_v2 }
 0x676   :  { %6483 = vmatprep.subr.mxu0 %v7021_v51  ;;  %6488 = vmatprep.subr.mxu1 %v7021_v51 }
 0x677   :  { %6485 = vmatprep.mubr.msk.f32.mxu0 %vm7022_vm4, %v7021_v51 }
 0x678   :  { %6479 = vmatmul.mubr.msk.f32.vlgmr.msra.gmra.mxu1 %vm1538_vm3, %v858_v9 }
 0x679   :  { %6484 = vmatpush3.xpose.msk.msra.mxu0 %vm1538_vm3, %v1711_v13  ;;  %6489 = vmatpush3.xpose.msk.msra.mxu1 %vm1538_vm3, %v1714_v54 }
 0x67a   :  { %6490 = vmatprep.subr.mxu1 %v7021_v51  ;;  %6492 = vmatprep.mubr.msk.f32.mxu1 %vm7022_vm4, %v7021_v51 }
 0x67b   :  { %6495 = vmatprep.subr.mxu0 %v2414_v15 }
 0x67c   :  { %6486 = vmatmul.mubr.msk.f32.vlgmr.msra.gmra.mxu0 %vm1538_vm3, %v859_v3 }
 0x67d   :  { %6491 = vmatpush3.xpose.msk.msra.mxu1 %vm1538_vm3, %v1713_v7  ;;  %6496 = vmatpush3.msra.mxu0 %v2414_v15  ;;  %v2600_v7 = vld [vmem:[%s8172_s11 + $0x18] sm:$0xff]  ;;  %v2598_v15 = vld [vmem:[%s8172_s11 + $0x8] sm:$0xff] }
 0x67e   :  { %6497 = vmatprep.subr.mxu0 %v2413_v17  ;;  %6509 = vmatprep.subr.mxu1 %v2600_v7 }
 0x67f   :  { %6498 = vmatpush3.msra.mxu0 %v2413_v17  ;;  %v2597_v17 = vld [vmem:[%s8172_s11] sm:$0xff] }
 0x680   :  { %6493 = vmatmul.mubr.msk.f32.vlgmr.msra.gmra.mxu1 %vm1538_vm3, %v860_v5  ;;  %6499 = vmatprep.subr.mxu0 %v2412_v11  ;;  %v2599_v5 = vld [vmem:[%s8172_s11 + $0x10] sm:$0xff] }
 0x681   :  { %6500 = vmatpush3.msra.mxu0 %v2412_v11  ;;  %6510 = vmatpush3.msra.mxu1 %v2600_v7 }
 0x682   :  { %6501 = vmatprep.subr.mxu0 %v2411_v19  ;;  %6511 = vmatprep.subr.mxu1 %v2599_v5 }
 0x683   :  { %6502 = vmatpush3.msra.mxu0 %v2411_v19  ;;  %6512 = vmatpush3.msra.mxu1 %v2599_v5 }
 0x684   :  { %6513 = vmatprep.subr.mxu1 %v2598_v15 }
 0x685   :  { %6514 = vmatpush3.msra.mxu1 %v2598_v15 }
 0x686   :  { %6515 = vmatprep.subr.mxu1 %v2597_v17 }
 0x687   :  { %6516 = vmatpush3.msra.mxu1 %v2597_v17 }
 0x724   :  { %v1790_v20 = vpop.f32.mrf.mxu0 }
 0x725   :  { %2347 = vxpose.xlu0.b32.start [1/4] (short) (narrow) %v1790_v20, 16 }
 0x726   :  { %v6445_v18 = vpop.f32.mrf.mxu0 }
 0x728   :  { %v1869_v30 = vpop.f32.mrf.mxu1 }
 0x729   :  { %2348 = vxpose.xlu0.b32.cont [2/4] (short) (narrow) %v1869_v30, 16 }
 0x72a   :  { %v6452_v32 = vpop.f32.mrf.mxu1 }
 0x72c   :  { %v1948_v31 = vpop.f32.mrf.mxu0 }
 0x72d   :  { %2349 = vxpose.xlu0.b32.cont [3/4] (short) (narrow) %v1948_v31, 16 }
 0x72e   :  { %v6459_v33 = vpop.f32.mrf.mxu0 }
 0x730   :  { %v2027_v34 = vpop.f32.mrf.mxu1 }
 0x731   :  { %2350 = vxpose.xlu0.b32.end [4/4] (short) (narrow) %v2027_v34, 16 }
 0x732   :  { %v6466_v36 = vpop.f32.mrf.mxu1 }
 0x734   :  { %v2106_v38 = vpop.f32.mrf.mxu0 }
 0x735   :  { %2379 = vxpose.xlu1.b32.start [1/4] (short) (narrow) %v2106_v38, 16 }
 0x736   :  { %v6473_v39 = vpop.f32.mrf.mxu0 }
 0x738   :  { %v2185_v4 = vpop.f32.mrf.mxu1 }
 0x739   :  { %2380 = vxpose.xlu1.b32.cont [2/4] (short) (narrow) %v2185_v4, 16  ;;  %v6059_v4 = vld [vmem:[%s8170_s9] ss:$0 sm:$0xff] }
 0x73a   :  { %v6480_v42 = vpop.f32.mrf.mxu1 }
 0x73c   :  { %v2264_v10 = vpop.f32.mrf.mxu0 }
 0x73d   :  { %2381 = vxpose.xlu1.b32.cont [3/4] (short) (narrow) %v2264_v10, 16 }
 0x73e   :  { %v6487_v35 = vpop.f32.mrf.mxu0 }
 0x740   :  { %v2343_v45 = vpop.f32.mrf.mxu1 }
 0x741   :  { %2382 = vxpose.xlu1.b32.end [4/4] (short) (narrow) %v2343_v45, 16 }
 0x742   :  { %v6494_v47 = vpop.f32.mrf.mxu1 }
 0x7a1   :  { %v2363_v16 = vpop.trf.xlu0 }
 0x7a2   :  { %6503 = vmatprep.mubr.msk.f32.mxu0 %vm222_vm1, %v2363_v16  ;;  %v6060_v16 = vld [vmem:[%s8171_s10] ss:$0 sm:$0xff] }
 0x7a5   :  { %v2364_v37 = vpop.trf.xlu0 }
 0x7a6   :  { %6504 = vmatmul.mubr.msk.f32.vlgmr.msra.gmra.mxu0 %vm222_vm1, %v2364_v37 }
 0x7b1   :  { %v2395_v49 = vpop.trf.xlu1 }
 0x7b2   :  { %6506 = vmatprep.mubr.msk.f32.mxu0 %vm222_vm1, %v2395_v49 }
 0x7b5   :  { %v2396_v41 = vpop.trf.xlu1 }
 0x7b6   :  { %6507 = vmatmul.mubr.msk.f32.gmra.mxu0 %vm222_vm1, %v2396_v41 }
 0x866   :  { %v6505_v55 = vpop.f32.mrf.mxu0 }
 0x867   :  { %v2506_v43 = vadd.f32 %v6505_v55, %v6054_v22 }
 0x868   :  { %v2500_v56 = vpop.f32.mrf.mxu0 }
 0x869   :  { %v7511_v57 = vadd.f32 %v2506_v43, %v7187_v24  ;;  %v2501_v59 = vadd.f32 %v6054_v22, %v2500_v56 }
 0x86b   :  { %v7514_v60 = vadd.f32 %v2501_v59, %v7185_v21  ;;  %v2528_v61 = vsel %vm222_vm1, %v7511_v57, 0.0 }
 0x86c   :  { %2529 = vadd.xlane.f32.xlu1 %v2528_v61 }
 0x86d   :  { %v2525_v62 = vsel %vm222_vm1, %v7514_v60, 0.0 }
 0x86e   :  { %2526 = vadd.xlane.f32.xlu0 %v2525_v62 }
 0x876   :  { %v6508_v63 = vpop.f32.mrf.mxu0 }
 0x877   :  { %v2516_v0 = vadd.f32 %v6508_v63, %v6054_v22 }
 0x878   :  { %v2510_v23 = vpop.f32.mrf.mxu0 }
 0x879   :  { %v7521_v40 = vadd.f32 %v2516_v0, %v7191_v27  ;;  %v2511_v24 = vadd.f32 %v6054_v22, %v2510_v23  ;;  %v2816_v0 = vld [vmem:[%s8174_s13 + $0x38] sm:$0xff]  ;;  %v2815_v23 = vld [vmem:[%s8174_s13 + $0x30] sm:$0xff] }
 0x87a   :  { %6523 = vmatprep.subr.mxu0 %v2816_v0 }
 0x87b   :  { %v7524_v50 = vadd.f32 %v2511_v24, %v7193_v28  ;;  %v2534_v21 = vsel %vm222_vm1, %v7521_v40, 0.0  ;;  %6524 = vmatpush3.msra.mxu0 %v2816_v0  ;;  %v2814_v24 = vld [vmem:[%s8174_s13 + $0x28] sm:$0xff] }
 0x87c   :  { %2535 = vadd.xlane.f32.xlu0 %v2534_v21  ;;  %6525 = vmatprep.subr.mxu0 %v2815_v23  ;;  %v2813_v21 = vld [vmem:[%s8174_s13 + $0x20] sm:$0xff] }
 0x87d   :  { %v2531_v26 = vsel %vm222_vm1, %v7524_v50, 0.0  ;;  %6526 = vmatpush3.msra.mxu0 %v2815_v23 }
 0x87e   :  { %2532 = vadd.xlane.f32.xlu1 %v2531_v26  ;;  %6527 = vmatprep.subr.mxu0 %v2814_v24  ;;  %v2812_v26 = vld [vmem:[%s8174_s13 + $0x18] sm:$0xff] }
 0x87f   :  { %6528 = vmatpush3.msra.mxu0 %v2814_v24 }
 0x880   :  { %6529 = vmatprep.subr.mxu0 %v2813_v21 }
 0x881   :  { %6530 = vmatpush3.msra.mxu0 %v2813_v21 }
 0x882   :  { %6531 = vmatprep.subr.mxu0 %v2812_v26 }
 0x883   :  { %6532 = vmatpush3.msra.mxu0 %v2812_v26 }
 0x8f5   :  { %v2530_v1 = vpop.xlane.xlu1 %2529 }
 0x8f6   :  { %v2538_v48 = vmul.f32 0.03125, %v2530_v1  ;;  %v2811_v1 = vld [vmem:[%s8174_s13 + $0x10] sm:$0xff] }
 0x8f7   :  { %v2527_v44 = vpop.xlane.xlu0 %2526  ;;  %6533 = vmatprep.subr.mxu0 %v2811_v1 }
 0x8f8   :  { %v2542_v25 = vsub.f32 %v7511_v57, %v2538_v48  ;;  %v2537_v29 = vmul.f32 0.03125, %v2527_v44  ;;  %6534 = vmatpush3.msra.mxu0 %v2811_v1  ;;  %v2810_v48 = vld [vmem:[%s8174_s13 + $0x8] sm:$0xff]  ;;  %v2809_v44 = vld [vmem:[%s8174_s13] sm:$0xff] }
 0x8f9   :  { %6535 = vmatprep.subr.mxu0 %v2810_v48 }
 0x8fa   :  { %v2541_v27 = vsub.f32 %v7514_v60, %v2537_v29  ;;  %v2546_v52 = vmul.f32 %v2542_v25, %v2542_v25  ;;  %6536 = vmatpush3.msra.mxu0 %v2810_v48 }
 0x8fb   :  { %6537 = vmatprep.subr.mxu0 %v2809_v44 }
 0x8fc   :  { %v2552_v28 = vsel %vm222_vm1, %v2546_v52, 0.0  ;;  %v2545_v53 = vmul.f32 %v2541_v27, %v2541_v27  ;;  %6538 = vmatpush3.msra.mxu0 %v2809_v44 }
 0x8fd   :  { %2553 = vadd.xlane.f32.xlu0 %v2552_v28 }
 0x8fe   :  { %v2549_v58 = vsel %vm222_vm1, %v2545_v53, 0.0 }
 0x8ff   :  { %2550 = vadd.xlane.f32.xlu1 %v2549_v58 }
 0x905   :  { %v2536_v6 = vpop.xlane.xlu0 %2535 }
 0x906   :  { %v2540_v9 = vmul.f32 0.03125, %v2536_v6 }
 0x907   :  { %v2533_v8 = vpop.xlane.xlu1 %2532 }
 0x908   :  { %v2544_v46 = vsub.f32 %v7521_v40, %v2540_v9  ;;  %v2539_v2 = vmul.f32 0.03125, %v2533_v8 }
 0x90a   :  { %v2543_v12 = vsub.f32 %v7524_v50, %v2539_v2  ;;  %v2548_v13 = vmul.f32 %v2544_v46, %v2544_v46 }
 0x90c   :  { %v2558_v54 = vsel %vm222_vm1, %v2548_v13, 0.0  ;;  %v2547_v3 = vmul.f32 %v2543_v12, %v2543_v12 }
 0x90d   :  { %2559 = vadd.xlane.f32.xlu0 %v2558_v54 }
 0x90e   :  { %v2555_v14 = vsel %vm222_vm1, %v2547_v3, 0.0 }
 0x90f   :  { %2556 = vadd.xlane.f32.xlu1 %v2555_v14 }
 0x986   :  { %v2554_v11 = vpop.xlane.xlu0 %2553 }
 0x987   :  { %v2562_v19 = vmul.f32 0.03125, %v2554_v11 }
 0x988   :  { %v2551_v20 = vpop.xlane.xlu1 %2550 }
 0x989   :  { %v2566_v18 = vadd.f32 1e-05, %v2562_v19  ;;  %v2561_v30 = vmul.f32 0.03125, %v2551_v20 }
 0x98b   :  { %6815 = vrsqrt.f32 %v2566_v18  ;;  %v2565_v32 = vadd.f32 1e-05, %v2561_v30 }
 0x98d   :  { %6817 = vrsqrt.f32 %v2565_v32 }
 0x996   :  { %v2560_v31 = vpop.xlane.xlu0 %2559 }
 0x997   :  { %v2564_v33 = vmul.f32 0.03125, %v2560_v31 }
 0x998   :  { %v6816_v34 = vpop.eup %6815  ;;  %v2557_v36 = vpop.xlane.xlu1 %2556 }
 0x999   :  { %v2568_v38 = vadd.f32 1e-05, %v2564_v33  ;;  %v2563_v39 = vmul.f32 0.03125, %v2557_v36  ;;  %v2574_v42 = vmul.f32 %v6816_v34, %v2542_v25  ;;  %v6061_v25 = vld [vmem:[%s8173_s12] ss:$0 sm:$0xff] }
 0x99a   :  { %v6818_v10 = vpop.eup %6817 }
 0x99b   :  { %6819 = vrsqrt.f32 %v2568_v38  ;;  %v2567_v35 = vadd.f32 1e-05, %v2563_v39  ;;  %v2573_v45 = vmul.f32 %v6818_v10, %v2541_v27  ;;  %v2584_v47 = vmul.f32 %v6059_v4, %v2574_v42 }
 0x99d   :  { %6821 = vrsqrt.f32 %v2567_v35  ;;  %v2583_v37 = vmul.f32 %v6059_v4, %v2573_v45  ;;  %v2594_v41 = vadd.f32 %v6060_v16, %v2584_v47 }
 0x99f   :  { %v2593_v49 = vadd.f32 %v6060_v16, %v2583_v37 }
 0x9a1   :  { %6517 = vmatprep.mubr.msk.f32.mxu1 %vm222_vm1, %v2593_v49 }
 0x9a2   :  { %6518 = vmatmul.mubr.msk.f32.vlgmr.msra.gmra.mxu1 %vm222_vm1, %v2594_v41 }
 0x9a8   :  { %v6820_v22 = vpop.eup %6819 }
 0x9a9   :  { %v2576_v55 = vmul.f32 %v6820_v22, %v2544_v46 }
 0x9aa   :  { %v6822_v43 = vpop.eup %6821 }
 0x9ab   :  { %v2575_v56 = vmul.f32 %v6822_v43, %v2543_v12  ;;  %v2586_v59 = vmul.f32 %v6059_v4, %v2576_v55 }
 0x9ad   :  { %v2585_v61 = vmul.f32 %v6059_v4, %v2575_v56  ;;  %v2596_v63 = vadd.f32 %v6060_v16, %v2586_v59 }
 0x9af   :  { %v2595_v62 = vadd.f32 %v6060_v16, %v2585_v61 }
 0x9b1   :  { %6520 = vmatprep.mubr.msk.f32.mxu1 %vm222_vm1, %v2595_v62 }
 0x9b2   :  { %6521 = vmatmul.mubr.msk.f32.gmra.mxu1 %vm222_vm1, %v2596_v63 }
 0xa62   :  { %v6519_v29 = vpop.f32.mrf.mxu1 }
 0xa63   :  { %v7587_v27 = vadd.f32 %v6519_v29, %v6061_v25 }
 0xa64   :  { %v2686_v52 = vpop.f32.mrf.mxu1 }
 0xa65   :  { %v7590_v28 = vmul.f32 0.70710677, %v7587_v27  ;;  %v7592_v53 = vadd.f32 %v6061_v25, %v2686_v52 }
 0xa67   :  { %v2722_v58 = vand.u32 2147483647, %v7590_v28  ;;  %v7596_v6 = vmul.f32 0.70710677, %v7592_v53  ;;  %vm2714_vm5 = vcmp.ge.f32.partialorder %v7590_v28, 0.0 }
 0xa69   :  { %v2726_v9 = vmul.f32 0.3275911, %v2722_v58  ;;  %v2721_v8 = vand.u32 2147483647, %v7596_v6  ;;  %v2774_v13 = vsub.f32 0.0, %v2722_v58  ;;  %vm2713_vm6 = vcmp.ge.f32.partialorder %v7596_v6, 0.0 }
 0xa6a   :  { %v2706_v6 = vmul.f32 0.5, %v7587_v27 }
 0xa6b   :  { %v2730_v46 = vadd.f32 1.0, %v2726_v9  ;;  %v2725_v2 = vmul.f32 0.3275911, %v2721_v8  ;;  %v2778_v15 = vmul.f32 %v2774_v13, %v2722_v58  ;;  %v2773_v17 = vsub.f32 0.0, %v2721_v8 }
 0xa6d   :  { %6823 = vrcp.f32 %v2730_v46  ;;  %v2729_v12 = vadd.f32 1.0, %v2725_v2  ;;  %v2783_v32 = vmul.f32 1.442695, %v2778_v15  ;;  %v2777_v31 = vmul.f32 %v2773_v17, %v2721_v8 }
 0xa6f   :  { %6825 = vrcp.f32 %v2729_v12  ;;  %v2781_v10 = vmul.f32 1.442695, %v2777_v31  ;;  %v7023_v12 = vmov -1.0  }
 0xa70   :  { %v2718_v13 = vsel %vm2714_vm5, 1.0, %v7023_v12 }
 0xa72   :  { %v6522_v54 = vpop.f32.mrf.mxu1 }
 0xa73   :  { %v7599_v3 = vadd.f32 %v6522_v54, %v6061_v25 }
 0xa74   :  { %v2696_v14 = vpop.f32.mrf.mxu1 }
 0xa75   :  { %v7602_v7 = vmul.f32 0.70710677, %v7599_v3  ;;  %v7604_v5 = vadd.f32 %v6061_v25, %v2696_v14 }
 0xa77   :  { %v2724_v11 = vand.u32 2147483647, %v7602_v7  ;;  %v7608_v19 = vmul.f32 0.70710677, %v7604_v5  ;;  %vm2716_vm7 = vcmp.ge.f32.partialorder %v7602_v7, 0.0  ;;  %v2708_v7 = vmul.f32 0.5, %v7599_v3 }
 0xa78   :  { %v2720_v27 = vsel %vm2716_vm7, 1.0, %v7023_v12 }
 0xa79   :  { %v2728_v20 = vmul.f32 0.3275911, %v2724_v11  ;;  %v2723_v18 = vand.u32 2147483647, %v7608_v19  ;;  %v2776_v49 = vsub.f32 0.0, %v2724_v11  ;;  %vm2715_vm8 = vcmp.ge.f32.partialorder %v7608_v19, 0.0 }
 0xa7a   :  { %v6824_v30 = vpop.eup %6823  ;;  %v6066_v19 = vld [vmem:[%s8175_s14] ss:$0 sm:$0xff] }
 0xa7b   :  { %v2738_v33 = vmul.f32 1.0614054, %v6824_v30  ;;  %v2732_v34 = vadd.f32 1.0, %v2728_v20  ;;  %v2727_v36 = vmul.f32 0.3275911, %v2723_v18  ;;  %v2775_v43 = vsub.f32 0.0, %v2723_v18 }
 0xa7c   :  { %v6826_v38 = vpop.eup %6825  ;;  %v2780_v59 = vmul.f32 %v2776_v49, %v2724_v11  ;;  %v2717_v20 = vsel %vm2713_vm6, 1.0, %v7023_v12 }
 0xa7d   :  { %v2742_v39 = vadd.f32 -1.4531521, %v2738_v33  ;;  %6827 = vrcp.f32 %v2732_v34  ;;  %v2731_v4 = vadd.f32 1.0, %v2727_v36  ;;  %v2737_v42 = vmul.f32 1.0614054, %v6826_v38 }
 0xa7e   :  { %6829 = vpow2.f32 %v2783_v32  ;;  %v2779_v23 = vmul.f32 %v2775_v43, %v2723_v18  ;;  %v2787_v26 = vmul.f32 1.442695, %v2780_v59  ;;  %v2705_v34 = vmul.f32 0.5, %v7592_v53 }
 0xa7f   :  { %v2746_v35 = vmul.f32 %v6824_v30, %v2742_v39  ;;  %v2741_v45 = vadd.f32 -1.4531521, %v2737_v42  ;;  %6831 = vrcp.f32 %v2731_v4  ;;  %v2719_v59 = vsel %vm2715_vm8, 1.0, %v7023_v12 }
 0xa80   :  { %6833 = vpow2.f32 %v2781_v10  ;;  %v2785_v9 = vmul.f32 1.442695, %v2779_v23 }
 0xa81   :  { %v2750_v47 = vadd.f32 1.4214138, %v2746_v35  ;;  %v2745_v16 = vmul.f32 %v6826_v38, %v2741_v45  ;;  %6835 = vpow2.f32 %v2787_v26 }
 0xa82   :  { %6837 = vpow2.f32 %v2785_v9 }
 0xa83   :  { %v2754_v37 = vmul.f32 %v6824_v30, %v2750_v47  ;;  %v2749_v41 = vadd.f32 1.4214138, %v2745_v16 }
 0xa85   :  { %v2758_v22 = vadd.f32 -0.28449672, %v2754_v37  ;;  %v2753_v55 = vmul.f32 %v6826_v38, %v2749_v41 }
 0xa87   :  { %v2762_v56 = vmul.f32 %v6824_v30, %v2758_v22  ;;  %v2757_v61 = vadd.f32 -0.28449672, %v2753_v55 }
 0xa89   :  { %v2766_v62 = vadd.f32 0.2548296, %v2762_v56  ;;  %v2761_v0 = vmul.f32 %v6826_v38, %v2757_v61 }
 0xa8a   :  { %v6828_v63 = vpop.eup %6827 }
 0xa8b   :  { %v2770_v24 = vmul.f32 %v6824_v30, %v2766_v62  ;;  %v2740_v21 = vmul.f32 1.0614054, %v6828_v63  ;;  %v6830_v1 = vpop.eup %6829  ;;  %v2765_v48 = vadd.f32 0.2548296, %v2761_v0 }
 0xa8c   :  { %v6832_v44 = vpop.eup %6831 }
 0xa8d   :  { %v2790_v25 = vmul.f32 %v6830_v1, %v2770_v24  ;;  %v2744_v29 = vadd.f32 -1.4531521, %v2740_v21  ;;  %v2769_v52 = vmul.f32 %v6826_v38, %v2765_v48  ;;  %v2739_v58 = vmul.f32 1.0614054, %v6832_v44  ;;  %v6834_v8 = vpop.eup %6833 }
 0xa8e   :  { %v6836_v16 = vpop.eup %6835 }
 0xa8f   :  { %v2794_v46 = vsub.f32 1.0, %v2790_v25  ;;  %v2748_v2 = vmul.f32 %v6828_v63, %v2744_v29  ;;  %v2789_v54 = vmul.f32 %v6834_v8, %v2769_v52  ;;  %v2743_v14 = vadd.f32 -1.4531521, %v2739_v58  ;;  %v6838_v41 = vpop.eup %6837 }
 0xa91   :  { %v2798_v15 = vmul.f32 %v2794_v46, %v2718_v13  ;;  %v2752_v17 = vadd.f32 1.4214138, %v2748_v2  ;;  %v2793_v11 = vsub.f32 1.0, %v2789_v54  ;;  %v2747_v28 = vmul.f32 %v6832_v44, %v2743_v14 }
 0xa93   :  { %v2756_v18 = vmul.f32 %v6828_v63, %v2752_v17  ;;  %v2797_v30 = vmul.f32 %v2793_v11, %v2717_v20  ;;  %v2751_v32 = vadd.f32 1.4214138, %v2747_v28  ;;  %v2802_v31 = vadd.f32 1.0, %v2798_v15 }
 0xa95   :  { %v2760_v33 = vadd.f32 -0.28449672, %v2756_v18  ;;  %v2801_v36 = vadd.f32 1.0, %v2797_v30  ;;  %v2755_v38 = vmul.f32 %v6832_v44, %v2751_v32  ;;  %v2806_v10 = vmul.f32 %v2802_v31, %v2706_v6 }
 0xa97   :  { %v2764_v39 = vmul.f32 %v6828_v63, %v2760_v33  ;;  %v2805_v4 = vmul.f32 %v2801_v36, %v2705_v34  ;;  %v2759_v42 = vadd.f32 -0.28449672, %v2755_v38 }
 0xa99   :  { %v2768_v35 = vadd.f32 0.2548296, %v2764_v39  ;;  %v2763_v45 = vmul.f32 %v6832_v44, %v2759_v42  ;;  %6539 = vmatprep.mubr.msk.f32.mxu0 %vm116_vm0, %v2805_v4  ;;  %v6078_v39 = vld [vmem:[%s8167_s6 + $0x38] sm:$0xff]  ;;  %v6077_v4 = vld [vmem:[%s8167_s6 + $0x30] sm:$0xff]  ;;  %v6076_v42 = vld [vmem:[%s8167_s6 + $0x28] sm:$0xff] }
 0xa9a   :  { %6540 = vmatmul.mubr.msk.f32.vlgmr.msra.gmra.mxu0 %vm116_vm0, %v2806_v10  ;;  %6545 = vmatprep.subr.mxu1 %v6078_v39  ;;  %v6075_v10 = vld [vmem:[%s8167_s6 + $0x20] sm:$0xff]  ;;  %s7025_s6 = smov [#allocation8]  }
 0xa9b   :  { %v2772_v47 = vmul.f32 %v6828_v63, %v2768_v35  ;;  %v2767_v37 = vadd.f32 0.2548296, %v2763_v45  ;;  %v2707_v63 = vmul.f32 0.5, %v7604_v5  ;;  %6546 = vmatpush3.msra.mxu1 %v6078_v39 }
 0xa9c   :  { %6547 = vmatprep.subr.mxu1 %v6077_v4 }
 0xa9d   :  { %v2792_v53 = vmul.f32 %v6836_v16, %v2772_v47  ;;  %v2771_v49 = vmul.f32 %v6832_v44, %v2767_v37  ;;  %6548 = vmatpush3.msra.mxu1 %v6077_v4 }
 0xa9e   :  { %6549 = vmatprep.subr.mxu1 %v6076_v42 }
 0xa9f   :  { %v2796_v22 = vsub.f32 1.0, %v2792_v53  ;;  %v2791_v55 = vmul.f32 %v6838_v41, %v2771_v49  ;;  %6550 = vmatpush3.msra.mxu1 %v6076_v42 }
 0xaa0   :  { %6551 = vmatprep.subr.mxu1 %v6075_v10 }
 0xaa1   :  { %v2800_v43 = vmul.f32 %v2796_v22, %v2720_v27  ;;  %v2795_v56 = vsub.f32 1.0, %v2791_v55  ;;  %6552 = vmatpush3.msra.mxu1 %v6075_v10 }
 0xaa3   :  { %v2799_v61 = vmul.f32 %v2795_v56, %v2719_v59  ;;  %v2804_v62 = vadd.f32 1.0, %v2800_v43  ;;  %v6073_v59 = vld [vmem:[%s8197_s29 + $0x1] ss:$0 sm:$0xff] }
 0xaa5   :  { %v2803_v0 = vadd.f32 1.0, %v2799_v61  ;;  %v2808_v24 = vmul.f32 %v2804_v62, %v2708_v7  ;;  %v6074_v7 = vld [vmem:[%s8198_s30 + $0x1] ss:$0 sm:$0xff] }
 0xaa7   :  { %v2807_v23 = vmul.f32 %v2803_v0, %v2707_v63 }
 0xaa9   :  { %6542 = vmatprep.mubr.msk.f32.mxu0 %vm116_vm0, %v2807_v23 }
 0xaaa   :  { %6543 = vmatmul.mubr.msk.f32.gmra.mxu0 %vm116_vm0, %v2808_v24 }
 0xb5a   :  { %v6541_v21 = vpop.f32.mrf.mxu0 }
 0xb5b   :  { %v2908_v26 = vadd.f32 %v6541_v21, %v6066_v19 }
 0xb5c   :  { %v2902_v1 = vpop.f32.mrf.mxu0 }
 0xb5d   :  { %v7631_v48 = vadd.f32 %v2908_v26, %v7511_v57  ;;  %v2903_v5 = vadd.f32 %v6066_v19, %v2902_v1 }
 0xb5f   :  { %v7634_v44 = vadd.f32 %v2903_v5, %v7514_v60  ;;  %v2932_v3 = vsel %vm222_vm1, %v7631_v48, 0.0 }
 0xb60   :  { %2933 = vadd.xlane.f32.xlu0 %v2932_v3 }
 0xb61   :  { %v2929_v25 = vsel %vm222_vm1, %v7634_v44, 0.0 }
 0xb62   :  { %2930 = vadd.xlane.f32.xlu1 %v2929_v25 }
 0xb6a   :  { %v6544_v29 = vpop.f32.mrf.mxu0 }
 0xb6b   :  { %v2918_v52 = vadd.f32 %v6544_v29, %v6066_v19 }
 0xb6c   :  { %v2912_v58 = vpop.f32.mrf.mxu0 }
 0xb6d   :  { %v7641_v9 = vadd.f32 %v2918_v52, %v7521_v40  ;;  %v2913_v57 = vadd.f32 %v6066_v19, %v2912_v58 }
 0xb6f   :  { %v7644_v8 = vadd.f32 %v2913_v57, %v7524_v50  ;;  %v2938_v60 = vsel %vm222_vm1, %v7641_v9, 0.0 }
 0xb70   :  { %2939 = vadd.xlane.f32.xlu0 %v2938_v60 }
 0xb71   :  { %v2935_v46 = vsel %vm222_vm1, %v7644_v8, 0.0 }
 0xb72   :  { %2936 = vadd.xlane.f32.xlu1 %v2935_v46 }
 0xbe9   :  { %v2934_v2 = vpop.xlane.xlu0 %2933 }
 0xbea   :  { %v2942_v13 = vmul.f32 0.03125, %v2934_v2 }
 0xbeb   :  { %v2931_v54 = vpop.xlane.xlu1 %2930 }
 0xbec   :  { %v2946_v14 = vsub.f32 %v7631_v48, %v2942_v13  ;;  %v2941_v15 = vmul.f32 0.03125, %v2931_v54 }
 0xbee   :  { %v2945_v40 = vsub.f32 %v7634_v44, %v2941_v15  ;;  %v2950_v17 = vmul.f32 %v2946_v14, %v2946_v14 }
 0xbf0   :  { %v2956_v50 = vsel %vm222_vm1, %v2950_v17, 0.0  ;;  %v2949_v11 = vmul.f32 %v2945_v40, %v2945_v40 }
 0xbf1   :  { %2957 = vadd.xlane.f32.xlu0 %v2956_v50 }
 0xbf2   :  { %v2953_v28 = vsel %vm222_vm1, %v2949_v11, 0.0 }
 0xbf3   :  { %2954 = vadd.xlane.f32.xlu1 %v2953_v28 }
 0xbf9   :  { %v2940_v20 = vpop.xlane.xlu0 %2939 }
 0xbfa   :  { %v2944_v18 = vmul.f32 0.03125, %v2940_v20 }
 0xbfb   :  { %v2937_v30 = vpop.xlane.xlu1 %2936 }
 0xbfc   :  { %v2948_v32 = vsub.f32 %v7641_v9, %v2944_v18  ;;  %v2943_v31 = vmul.f32 0.03125, %v2937_v30 }
 0xbfe   :  { %v2947_v33 = vsub.f32 %v7644_v8, %v2943_v31  ;;  %v2952_v34 = vmul.f32 %v2948_v32, %v2948_v32 }
 0xc00   :  { %v2962_v36 = vsel %vm222_vm1, %v2952_v34, 0.0  ;;  %v2951_v38 = vmul.f32 %v2947_v33, %v2947_v33 }
 0xc01   :  { %2963 = vadd.xlane.f32.xlu0 %v2962_v36 }
 0xc02   :  { %v2959_v6 = vsel %vm222_vm1, %v2951_v38, 0.0 }
 0xc03   :  { %2960 = vadd.xlane.f32.xlu1 %v2959_v6 }
 0xc7a   :  { %v2958_v35 = vpop.xlane.xlu0 %2957 }
 0xc7b   :  { %v2966_v45 = vmul.f32 0.03125, %v2958_v35 }
 0xc7c   :  { %v2955_v47 = vpop.xlane.xlu1 %2954 }
 0xc7d   :  { %v2970_v16 = vadd.f32 1e-05, %v2966_v45  ;;  %v2965_v37 = vmul.f32 0.03125, %v2955_v47 }
 0xc7f   :  { %6839 = vrsqrt.f32 %v2970_v16  ;;  %v2969_v53 = vadd.f32 1e-05, %v2965_v37 }
 0xc81   :  { %6841 = vrsqrt.f32 %v2969_v53 }
 0xc8a   :  { %v2964_v49 = vpop.xlane.xlu0 %2963 }
 0xc8b   :  { %v2968_v41 = vmul.f32 0.03125, %v2964_v49 }
 0xc8c   :  { %v6840_v22 = vpop.eup %6839  ;;  %v2961_v27 = vpop.xlane.xlu1 %2960 }
 0xc8d   :  { %v2978_v55 = vmul.f32 %v6840_v22, %v2946_v14  ;;  %v2972_v43 = vadd.f32 1e-05, %v2968_v41  ;;  %v2967_v56 = vmul.f32 0.03125, %v2961_v27 }
 0xc8e   :  { %v6842_v61 = vpop.eup %6841 }
 0xc8f   :  { %6843 = vrsqrt.f32 %v2972_v43  ;;  %v2971_v62 = vadd.f32 1e-05, %v2967_v56  ;;  %v2977_v63 = vmul.f32 %v6842_v61, %v2945_v40  ;;  %v2988_v0 = vmul.f32 %v6073_v59, %v2978_v55 }
 0xc91   :  { %6845 = vrsqrt.f32 %v2971_v62  ;;  %v2987_v23 = vmul.f32 %v6073_v59, %v2977_v63  ;;  %v2998_v19 = vadd.f32 %v6074_v7, %v2988_v0 }
 0xc93   :  { %v2997_v24 = vadd.f32 %v6074_v7, %v2987_v23 }
 0xc95   :  { %6553 = vmatprep.mubr.msk.f32.mxu1 %vm222_vm1, %v2997_v24 }
 0xc96   :  { %6554 = vmatmul.mubr.msk.f32.vlgmr.msra.gmra.mxu1 %vm222_vm1, %v2998_v19 }
 0xc9c   :  { %v6844_v21 = vpop.eup %6843 }
 0xc9d   :  { %v2980_v26 = vmul.f32 %v6844_v21, %v2948_v32 }
 0xc9e   :  { %v6846_v1 = vpop.eup %6845 }
 0xc9f   :  { %v2979_v5 = vmul.f32 %v6846_v1, %v2947_v33  ;;  %v2990_v3 = vmul.f32 %v6073_v59, %v2980_v26 }
 0xca1   :  { %v2989_v25 = vmul.f32 %v6073_v59, %v2979_v5  ;;  %v3000_v52 = vadd.f32 %v6074_v7, %v2990_v3 }
 0xca3   :  { %v2999_v29 = vadd.f32 %v6074_v7, %v2989_v25 }
 0xca5   :  { %6556 = vmatprep.mubr.msk.f32.mxu1 %vm222_vm1, %v2999_v29 }
 0xca6   :  { %6557 = vmatmul.mubr.msk.f32.gmra.mxu1 %vm222_vm1, %v3000_v52 }
 0xd56   :  { %v7680_v58 = vpop.f32.mrf.mxu1 }
 0xd57   :  { %3429 = vrot.lane.b32.xlu0 %v7680_v58, %s7019_s5 }
 0xd58   :  { %v7684_v57 = vpop.f32.mrf.mxu1 }
 0xd59   :  { %3427 = vrot.lane.b32.xlu1 %v7684_v57, %s7019_s5 }
 0xd66   :  { %v7688_v60 = vpop.f32.mrf.mxu1 }
 0xd67   :  { %3433 = vrot.lane.b32.xlu1 %v7688_v60, %s7019_s5 }
 0xd68   :  { %v7692_v46 = vpop.f32.mrf.mxu1 }
 0xd6b   :  { %3431 = vrot.lane.b32.xlu1 %v7692_v46, %s7019_s5 }
 0xd75   :  { %3103 = vxpose.xlu0.b32.start [1/2] (short) (narrow) %v7684_v57, 32 }
 0xd79   :  { %3104 = vxpose.xlu0.b32.end [2/2] (short) (narrow) %v7680_v58, 32 }
 0xd94   :  { %3135 = vxpose.xlu1.b32.start [1/2] (short) (narrow) %v7692_v46, 32 }
 0xd98   :  { %3136 = vxpose.xlu1.b32.end [2/2] (short) (narrow) %v7688_v60, 32 }
 0xdc9   :  { %v3430_v2 = vpop.permute.xlu0 %3429 }
 0xdcb   :  { %v3428_v14 = vpop.permute.xlu1 %3427 }
 0xdd9   :  { %v3434_v17 = vpop.permute.xlu1 %3433 }
 0xddd   :  { %v3432_v50 = vpop.permute.xlu1 %3431 }
 0xdf1   :  { %v3119_v13 = vpop.trf.xlu0 }
 0xdf2   :  { %3167 = vxpose.xlu0.b32.start.end [1/1] (short) (narrow) %v3119_v13, 16 }
 0xdf5   :  { %v3120_v54 = vpop.trf.xlu0 }
 0xdf6   :  { %3199 = vxpose.xlu1.b32.start.end [1/1] (short) (narrow) %v3120_v54, 16 }
 0xdf7   :  { %3439 = vxpose.xlu0.b32.start [1/2] (short) (narrow) %v3428_v14, 32 }
 0xdf9   :  { %v3121_v15 = vpop.trf.xlu0 }
 0xdfb   :  { %3440 = vxpose.xlu0.b32.end [2/2] (short) (narrow) %v3430_v2, 32 }
 0xdfd   :  { %v3122_v40 = vpop.trf.xlu0 }
 0xdfe   :  { %3263 = vxpose.xlu1.b32.start.end [1/1] (short) (narrow) %v3122_v40, 16 }
 0xe04   :  { %3231 = vxpose.xlu0.b32.start.end [1/1] (short) (narrow) %v3121_v15, 16 }
 0xe09   :  { %3471 = vxpose.xlu0.b32.start [1/2] (short) (narrow) %v3432_v50, 32 }
 0xe0d   :  { %3472 = vxpose.xlu0.b32.end [2/2] (short) (narrow) %v3434_v17, 32 }
 0xe10   :  { %v3151_v11 = vpop.trf.xlu1 }
 0xe11   :  { %3295 = vxpose.xlu1.b32.start.end [1/1] (short) (narrow) %v3151_v11, 16 }
 0xe14   :  { %v3152_v28 = vpop.trf.xlu1 }
 0xe16   :  { %3327 = vxpose.xlu1.b32.start.end [1/1] (short) (narrow) %v3152_v28, 16 }
 0xe18   :  { %v3153_v20 = vpop.trf.xlu1 }
 0xe19   :  { %3359 = vxpose.xlu0.b32.start.end [1/1] (short) (narrow) %v3153_v20, 16 }
 0xe1c   :  { %v3154_v18 = vpop.trf.xlu1 }
 0xe1d   :  { %3391 = vxpose.xlu1.b32.start.end [1/1] (short) (narrow) %v3154_v18, 16 }
 0xe6e   :  { %v3183_v30 = vpop.trf.xlu0 }
 0xe6f   :  { %6561 = vmatprep.mubr.msk.f32.mxu1 %vm873_vm2, %v3183_v30 }
 0xe72   :  { %v3184_v32 = vpop.trf.xlu0  ;;  %v3215_v31 = vpop.trf.xlu1 }
 0xe76   :  { %v3455_v33 = vpop.trf.xlu0  ;;  %v3216_v34 = vpop.trf.xlu1 }
 0xe77   :  { %6559 = vmatprep.subr.mxu1 %v3455_v33 }
 0xe78   :  { %6560 = vmatpush3.msra.mxu1 %v3455_v33 }
 0xe79   :  { %6562 = vmatmul.mubr.msk.f32.vlgmr.msra.gmra.mxu1 %vm873_vm2, %v3184_v32 }
 0xe7a   :  { %v3456_v36 = vpop.trf.xlu0  ;;  %6566 = vmatprep.mubr.msk.f32.mxu1 %vm873_vm2, %v3215_v31  ;;  %v3279_v38 = vpop.trf.xlu1 }
 0xe7b   :  { %6564 = vmatprep.subr.mxu1 %v3456_v36 }
 0xe7c   :  { %6565 = vmatpush3.msra.mxu1 %v3456_v36 }
 0xe7d   :  { %6567 = vmatmul.mubr.msk.f32.vlgmr.msra.gmra.mxu1 %vm873_vm2, %v3216_v34 }
 0xe7e   :  { %v3457_v6 = vpop.trf.xlu0  ;;  %6576 = vmatprep.mubr.msk.f32.mxu1 %vm873_vm2, %v3279_v38  ;;  %v3280_v4 = vpop.trf.xlu1 }
 0xe7f   :  { %6569 = vmatprep.subr.mxu0 %v3457_v6 }
 0xe80   :  { %6570 = vmatpush3.msra.mxu0 %v3457_v6 }
 0xe82   :  { %v3458_v39 = vpop.trf.xlu0 }
 0xe83   :  { %6574 = vmatprep.subr.mxu1 %v3458_v39 }
 0xe84   :  { %6575 = vmatpush3.msra.mxu1 %v3458_v39 }
 0xe85   :  { %6577 = vmatmul.mubr.msk.f32.vlgmr.msra.gmra.mxu1 %vm873_vm2, %v3280_v4 }
 0xe86   :  { %v3247_v42 = vpop.trf.xlu0 }
 0xe87   :  { %6571 = vmatprep.mubr.msk.f32.mxu0 %vm873_vm2, %v3247_v42 }
 0xe8a   :  { %v3248_v10 = vpop.trf.xlu0 }
 0xe8b   :  { %6572 = vmatmul.mubr.msk.f32.vlgmr.msra.gmra.mxu0 %vm873_vm2, %v3248_v10 }
 0xe8d   :  { %v3311_v35 = vpop.trf.xlu1 }
 0xe8e   :  { %v3487_v45 = vpop.trf.xlu0  ;;  %6581 = vmatprep.mubr.msk.f32.mxu0 %vm873_vm2, %v3311_v35 }
 0xe8f   :  { %6579 = vmatprep.subr.mxu0 %v3487_v45 }
 0xe90   :  { %6580 = vmatpush3.msra.mxu0 %v3487_v45 }
 0xe91   :  { %v3312_v47 = vpop.trf.xlu1 }
 0xe92   :  { %v3488_v16 = vpop.trf.xlu0  ;;  %6582 = vmatmul.mubr.msk.f32.vlgmr.msra.gmra.mxu0 %vm873_vm2, %v3312_v47 }
 0xe93   :  { %6584 = vmatprep.subr.mxu1 %v3488_v16 }
 0xe94   :  { %6585 = vmatpush3.msra.mxu1 %v3488_v16 }
 0xe95   :  { %v3343_v37 = vpop.trf.xlu1 }
 0xe96   :  { %v3489_v53 = vpop.trf.xlu0  ;;  %6586 = vmatprep.mubr.msk.f32.mxu1 %vm873_vm2, %v3343_v37 }
 0xe97   :  { %6589 = vmatprep.subr.mxu0 %v3489_v53 }
 0xe98   :  { %6590 = vmatpush3.msra.mxu0 %v3489_v53 }
 0xe99   :  { %v3344_v49 = vpop.trf.xlu1  ;;  %6599 = vmatprep.subr.mxu0 %v7021_v51 }
 0xe9a   :  { %6587 = vmatmul.mubr.msk.f32.vlgmr.msra.gmra.mxu1 %vm873_vm2, %v3344_v49  ;;  %v3490_v41 = vpop.trf.xlu0 }
 0xe9b   :  { %6594 = vmatprep.subr.mxu1 %v3490_v41 }
 0xe9c   :  { %6595 = vmatpush3.msra.mxu1 %v3490_v41 }
 0xe9d   :  { %v3407_v22 = vpop.trf.xlu1  ;;  %6606 = vmatprep.subr.mxu1 %v7021_v51 }
 0xe9e   :  { %v3375_v27 = vpop.trf.xlu0  ;;  %6596 = vmatprep.mubr.msk.f32.mxu1 %vm873_vm2, %v3407_v22 }
 0xe9f   :  { %6591 = vmatprep.mubr.msk.f32.mxu0 %vm873_vm2, %v3375_v27 }
 0xea1   :  { %v3408_v55 = vpop.trf.xlu1 }
 0xea2   :  { %6597 = vmatmul.mubr.msk.f32.vlgmr.msra.gmra.mxu1 %vm873_vm2, %v3408_v55  ;;  %v3376_v43 = vpop.trf.xlu0 }
 0xea3   :  { %6592 = vmatmul.mubr.msk.f32.vlgmr.msra.gmra.mxu0 %vm873_vm2, %v3376_v43  ;;  %6610 = vmatprep.mubr.msk.f32.mxu1 %vm7022_vm4, %v7021_v51 }
 0xea4   :  { %6603 = vmatprep.mubr.msk.f32.mxu0 %vm7022_vm4, %v7021_v51 }
 0xf39   :  { %v6563_v56 = vpop.f32.mrf.mxu1 }
 0xf3a   :  { %v7722_v59 = vmul.f32 0.35355338, %v6563_v56 }
 0xf3b   :  { %v3651_v61 = vpop.f32.mrf.mxu1 }
 0xf3c   :  { %v7724_v62 = vmul.f32 0.35355338, %v3651_v61  ;;  %v4246_v63 = vsel %vm1538_vm3, %v7722_v59, -inf }
 0xf3d   :  { %4247 = vmax.xlane.f32.xlu1 %v4246_v63  ;;  %v6568_v0 = vpop.f32.mrf.mxu1 }
 0xf3e   :  { %v7728_v7 = vmul.f32 0.35355338, %v6568_v0  ;;  %v4243_v24 = vsel %vm1538_vm3, %v7724_v62, -inf }
 0xf3f   :  { %v3732_v23 = vpop.f32.mrf.mxu1 }
 0xf40   :  { %v4252_v19 = vsel %vm1538_vm3, %v7728_v7, -inf  ;;  %v7734_v21 = vmul.f32 0.35355338, %v3732_v23 }
 0xf41   :  { %4244 = vmax.xlane.f32.xlu1 %v4243_v24  ;;  %4253 = vmax.xlane.f32.xlu0 %v4252_v19 }
 0xf42   :  { %v4249_v26 = vsel %vm1538_vm3, %v7734_v21, -inf }
 0xf45   :  { %4250 = vmax.xlane.f32.xlu1 %v4249_v26  ;;  %v6578_v1 = vpop.f32.mrf.mxu1 }
 0xf46   :  { %v7738_v5 = vmul.f32 0.35355338, %v6578_v1 }
 0xf47   :  { %v3894_v3 = vpop.f32.mrf.mxu1 }
 0xf48   :  { %v4264_v25 = vsel %vm1538_vm3, %v7738_v5, -inf  ;;  %v7742_v29 = vmul.f32 0.35355338, %v3894_v3 }
 0xf49   :  { %4265 = vmax.xlane.f32.xlu0 %v4264_v25 }
 0xf4a   :  { %v4261_v52 = vsel %vm1538_vm3, %v7742_v29, -inf }
 0xf4b   :  { %v6573_v2 = vpop.f32.mrf.mxu0 }
 0xf4c   :  { %v7746_v13 = vmul.f32 0.35355338, %v6573_v2 }
 0xf4d   :  { %4262 = vmax.xlane.f32.xlu0 %v4261_v52  ;;  %v3813_v54 = vpop.f32.mrf.mxu0 }
 0xf4e   :  { %v7748_v14 = vmul.f32 0.35355338, %v3813_v54  ;;  %v4258_v15 = vsel %vm1538_vm3, %v7746_v13, -inf }
 0xf4f   :  { %4259 = vmax.xlane.f32.xlu1 %v4258_v15 }
 0xf50   :  { %v4255_v40 = vsel %vm1538_vm3, %v7748_v14, -inf }
 0xf52   :  { %v6583_v17 = vpop.f32.mrf.mxu0 }
 0xf53   :  { %4256 = vmax.xlane.f32.xlu1 %v4255_v40  ;;  %v7754_v50 = vmul.f32 0.35355338, %v6583_v17 }
 0xf54   :  { %v3975_v11 = vpop.f32.mrf.mxu0 }
 0xf55   :  { %v4270_v28 = vsel %vm1538_vm3, %v7754_v50, -inf  ;;  %v7758_v20 = vmul.f32 0.35355338, %v3975_v11 }
 0xf57   :  { %4271 = vmax.xlane.f32.xlu1 %v4270_v28  ;;  %v4267_v18 = vsel %vm1538_vm3, %v7758_v20, -inf }
 0xf5a   :  { %v6588_v30 = vpop.f32.mrf.mxu1 }
 0xf5b   :  { %v7762_v32 = vmul.f32 0.35355338, %v6588_v30  ;;  %4268 = vmax.xlane.f32.xlu1 %v4267_v18 }
 0xf5c   :  { %v4056_v31 = vpop.f32.mrf.mxu1 }
 0xf5d   :  { %v4276_v33 = vsel %vm1538_vm3, %v7762_v32, -inf  ;;  %v7766_v34 = vmul.f32 0.35355338, %v4056_v31 }
 0xf5e   :  { %4277 = vmax.xlane.f32.xlu0 %v4276_v33 }
 0xf5f   :  { %v4273_v36 = vsel %vm1538_vm3, %v7766_v34, -inf }
 0xf62   :  { %4274 = vmax.xlane.f32.xlu0 %v4273_v36  ;;  %v6598_v38 = vpop.f32.mrf.mxu1 }
 0xf63   :  { %v7770_v6 = vmul.f32 0.35355338, %v6598_v38  ;;  %v6593_v39 = vpop.f32.mrf.mxu0 }
 0xf64   :  { %v7772_v4 = vmul.f32 0.35355338, %v6593_v39  ;;  %v4218_v42 = vpop.f32.mrf.mxu1 }
 0xf65   :  { %v4288_v10 = vsel %vm1538_vm3, %v7770_v6, -inf  ;;  %v4137_v35 = vpop.f32.mrf.mxu0  ;;  %v7776_v45 = vmul.f32 0.35355338, %v4218_v42 }
 0xf66   :  { %4289 = vmax.xlane.f32.xlu0 %v4288_v10  ;;  %v7778_v47 = vmul.f32 0.35355338, %v4137_v35  ;;  %v4282_v16 = vsel %vm1538_vm3, %v7772_v4, -inf }
 0xf67   :  { %4283 = vmax.xlane.f32.xlu1 %v4282_v16  ;;  %v4285_v37 = vsel %vm1538_vm3, %v7776_v45, -inf }
 0xf68   :  { %v4279_v53 = vsel %vm1538_vm3, %v7778_v47, -inf }
 0xf6a   :  { %4286 = vmax.xlane.f32.xlu0 %v4285_v37 }
 0xf6b   :  { %4280 = vmax.xlane.f32.xlu1 %v4279_v53 }
 0xf7c   :  { %3505 = vrot.lane.b32.xlu1 %v7680_v58, %s7020_s22 }
 0xf80   :  { %3503 = vrot.lane.b32.xlu0 %v7684_v57, %s7020_s22  ;;  %3509 = vrot.lane.b32.xlu1 %v7688_v60, %s7020_s22 }
 0xf84   :  { %3507 = vrot.lane.b32.xlu0 %v7692_v46, %s7020_s22 }
 0xfc6   :  { %v4248_v49 = vpop.xlane.xlu1 %4247 }
 0xfc7   :  { %v4292_v41 = vsub.f32 %v7722_v59, %v4248_v49 }
 0xfc9   :  { %v4309_v22 = vmul.f32 1.442695, %v4292_v41 }
 0xfca   :  { %v4245_v27 = vpop.xlane.xlu1 %4244  ;;  %v4254_v55 = vpop.xlane.xlu0 %4253 }
 0xfcb   :  { %6847 = vpow2.f32 %v4309_v22  ;;  %v4291_v43 = vsub.f32 %v7724_v62, %v4245_v27  ;;  %v4294_v58 = vsub.f32 %v7728_v7, %v4254_v55 }
 0xfcd   :  { %v4307_v56 = vmul.f32 1.442695, %v4291_v43  ;;  %v4313_v61 = vmul.f32 1.442695, %v4294_v58 }
 0xfce   :  { %v4251_v57 = vpop.xlane.xlu1 %4250 }
 0xfcf   :  { %6849 = vpow2.f32 %v4307_v56  ;;  %v4293_v60 = vsub.f32 %v7734_v21, %v4251_v57 }
 0xfd0   :  { %6851 = vpow2.f32 %v4313_v61 }
 0xfd1   :  { %v4311_v63 = vmul.f32 1.442695, %v4293_v60 }
 0xfd2   :  { %v4266_v46 = vpop.xlane.xlu0 %4265 }
 0xfd3   :  { %6853 = vpow2.f32 %v4311_v63  ;;  %v4298_v59 = vsub.f32 %v7738_v5, %v4266_v46 }
 0xfd5   :  { %v4321_v19 = vmul.f32 1.442695, %v4298_v59 }
 0xfd6   :  { %v4263_v23 = vpop.xlane.xlu0 %4262 }
 0xfd7   :  { %v4297_v26 = vsub.f32 %v7742_v29, %v4263_v23 }
 0xfd8   :  { %v7799_v0 = vpop.eup %6847  ;;  %v4260_v24 = vpop.xlane.xlu1 %4259 }
 0xfd9   :  { %v4296_v62 = vsub.f32 %v7746_v13, %v4260_v24  ;;  %v4342_v7 = vsel %vm1538_vm3, %v7799_v0, 0.0  ;;  %v4319_v13 = vmul.f32 1.442695, %v4297_v26 }
 0xfda   :  { %4343 = vadd.xlane.f32.xlu1 %v4342_v7 }
 0xfdb   :  { %v4317_v21 = vmul.f32 1.442695, %v4296_v62 }
 0xfdc   :  { %v7805_v1 = vpop.eup %6849  ;;  %v4257_v3 = vpop.xlane.xlu1 %4256 }
 0xfdd   :  { %v7807_v25 = vpop.eup %6851  ;;  %6855 = vpow2.f32 %v4317_v21  ;;  %v4295_v5 = vsub.f32 %v7748_v14, %v4257_v3  ;;  %v4339_v52 = vsel %vm1538_vm3, %v7805_v1, 0.0 }
 0xfde   :  { %4340 = vadd.xlane.f32.xlu0 %v4339_v52  ;;  %v4348_v2 = vsel %vm1538_vm3, %v7807_v25, 0.0  ;;  %6857 = vpow2.f32 %v4321_v19 }
 0xfdf   :  { %v4315_v54 = vmul.f32 1.442695, %v4295_v5  ;;  %4349 = vadd.xlane.f32.xlu1 %v4348_v2 }
 0xfe0   :  { %v7814_v29 = vpop.eup %6853  ;;  %v4272_v15 = vpop.xlane.xlu1 %4271 }
 0xfe1   :  { %6859 = vpow2.f32 %v4315_v54  ;;  %v4300_v40 = vsub.f32 %v7754_v50, %v4272_v15  ;;  %v4345_v14 = vsel %vm1538_vm3, %v7814_v29, 0.0 }
 0xfe2   :  { %6861 = vpow2.f32 %v4319_v13 }
 0xfe3   :  { %v4325_v17 = vmul.f32 1.442695, %v4300_v40  ;;  %4346 = vadd.xlane.f32.xlu1 %v4345_v14 }
 0xfe4   :  { %v4269_v11 = vpop.xlane.xlu1 %4268 }
 0xfe5   :  { %6863 = vpow2.f32 %v4325_v17  ;;  %v4299_v28 = vsub.f32 %v7758_v20, %v4269_v11 }
 0xfe7   :  { %v4323_v18 = vmul.f32 1.442695, %v4299_v28  ;;  %v4278_v30 = vpop.xlane.xlu0 %4277 }
 0xfe8   :  { %v4302_v31 = vsub.f32 %v7762_v32, %v4278_v30 }
 0xfe9   :  { %6865 = vpow2.f32 %v4323_v18 }
 0xfea   :  { %v7821_v33 = vpop.eup %6855  ;;  %v4329_v36 = vmul.f32 1.442695, %v4302_v31 }
 0xfeb   :  { %v4275_v38 = vpop.xlane.xlu0 %4274  ;;  %v4354_v50 = vsel %vm1538_vm3, %v7821_v33, 0.0  ;;  %v7825_v39 = vpop.eup %6857 }
 0xfec   :  { %6867 = vpow2.f32 %v4329_v36  ;;  %v4301_v42 = vsub.f32 %v7766_v34, %v4275_v38  ;;  %4355 = vadd.xlane.f32.xlu0 %v4354_v50  ;;  %v4360_v16 = vsel %vm1538_vm3, %v7825_v39, 0.0 }
 0xfee   :  { %v7828_v10 = vpop.eup %6859  ;;  %v4327_v20 = vmul.f32 1.442695, %v4301_v42 }
 0xfef   :  { %v4290_v35 = vpop.xlane.xlu0 %4289  ;;  %v4351_v32 = vsel %vm1538_vm3, %v7828_v10, 0.0  ;;  %v7834_v37 = vpop.eup %6861 }
 0xff0   :  { %6869 = vpow2.f32 %v4327_v20  ;;  %v4306_v53 = vsub.f32 %v7770_v6, %v4290_v35  ;;  %v4284_v49 = vpop.xlane.xlu1 %4283  ;;  %4352 = vadd.xlane.f32.xlu1 %v4351_v32  ;;  %4361 = vadd.xlane.f32.xlu0 %v4360_v16  ;;  %v4357_v58 = vsel %vm1538_vm3, %v7834_v37, 0.0 }
 0xff1   :  { %v4304_v34 = vsub.f32 %v7772_v4, %v4284_v49 }
 0xff2   :  { %v7838_v41 = vpop.eup %6863  ;;  %v4337_v22 = vmul.f32 1.442695, %v4306_v53 }
 0xff3   :  { %v4333_v27 = vmul.f32 1.442695, %v4304_v34  ;;  %v4287_v55 = vpop.xlane.xlu0 %4286  ;;  %v4366_v43 = vsel %vm1538_vm3, %v7838_v41, 0.0 }
 0xff4   :  { %v4305_v56 = vsub.f32 %v7776_v45, %v4287_v55  ;;  %v4281_v61 = vpop.xlane.xlu1 %4280  ;;  %4367 = vadd.xlane.f32.xlu1 %v4366_v43  ;;  %4358 = vadd.xlane.f32.xlu0 %v4357_v58 }
 0xff5   :  { %6871 = vpow2.f32 %v4333_v27  ;;  %v4303_v6 = vsub.f32 %v7778_v47, %v4281_v61 }
 0xff6   :  { %v7846_v4 = vpop.eup %6865  ;;  %6873 = vpow2.f32 %v4337_v22  ;;  %v4335_v57 = vmul.f32 1.442695, %v4305_v56 }
 0xff7   :  { %v4331_v60 = vmul.f32 1.442695, %v4303_v6  ;;  %v4363_v63 = vsel %vm1538_vm3, %v7846_v4, 0.0  ;;  %v3504_v5 = vpop.permute.xlu0 %3503 }
 0xff8   :  { %4364 = vadd.xlane.f32.xlu0 %v4363_v63  ;;  %v3506_v52 = vpop.permute.xlu1 %3505 }
 0xff9   :  { %v7850_v46 = vpop.eup %6867  ;;  %6875 = vpow2.f32 %v4331_v60 }
 0xffa   :  { %v4372_v45 = vsel %vm1538_vm3, %v7850_v46, 0.0  ;;  %6877 = vpow2.f32 %v4335_v57 }
 0xffb   :  { %4373 = vadd.xlane.f32.xlu1 %v4372_v45  ;;  %v3508_v2 = vpop.permute.xlu0 %3507 }
 0xffc   :  { %v3510_v13 = vpop.permute.xlu1 %3509 }
 0xffd   :  { %v7854_v59 = vpop.eup %6869 }
 0xffe   :  { %v4369_v47 = vsel %vm1538_vm3, %v7854_v59, 0.0 }
 0xfff   :  { %4370 = vadd.xlane.f32.xlu1 %v4369_v47 }
0x1002   :  { %v7858_v23 = vpop.eup %6871 }
0x1003   :  { %v4378_v24 = vsel %vm1538_vm3, %v7858_v23, 0.0  ;;  %v7862_v62 = vpop.eup %6873 }
0x1004   :  { %4379 = vadd.xlane.f32.xlu0 %v4378_v24  ;;  %v4384_v26 = vsel %vm1538_vm3, %v7862_v62, 0.0 }
0x1006   :  { %v7864_v7 = vpop.eup %6875 }
0x1007   :  { %v4375_v19 = vsel %vm1538_vm3, %v7864_v7, 0.0  ;;  %v7870_v21 = vpop.eup %6877 }
0x1008   :  { %4376 = vadd.xlane.f32.xlu1 %v4375_v19  ;;  %4385 = vadd.xlane.f32.xlu0 %v4384_v26  ;;  %v4381_v3 = vsel %vm1538_vm3, %v7870_v21, 0.0 }
0x100c   :  { %4382 = vadd.xlane.f32.xlu0 %v4381_v3 }
0x1039   :  { %3547 = vxpose.xlu0.b32.start [1/2] (short) (narrow) %v3508_v2, 32 }
0x103b   :  { %3515 = vxpose.xlu1.b32.start [1/2] (short) (narrow) %v3504_v5, 32 }
0x103d   :  { %3548 = vxpose.xlu0.b32.end [2/2] (short) (narrow) %v3510_v13, 32  ;;  %v6126_v13 = vld [vmem:[%s8168_s7 + $0x38] sm:$0xff] }
0x103f   :  { %3516 = vxpose.xlu1.b32.end [2/2] (short) (narrow) %v3506_v52, 32 }
0x1063   :  { %v4344_v54 = vpop.xlane.xlu1 %4343 }
0x1064   :  { %6879 = vrcp.f32 %v4344_v54  ;;  %v6125_v54 = vld [vmem:[%s8168_s7 + $0x30] sm:$0xff] }
0x1067   :  { %v4341_v15 = vpop.xlane.xlu0 %4340 }
0x1068   :  { %v4350_v40 = vpop.xlane.xlu1 %4349  ;;  %6881 = vrcp.f32 %v4341_v15  ;;  %v6123_v15 = vld [vmem:[%s8168_s7 + $0x20] sm:$0xff] }
0x1069   :  { %6883 = vrcp.f32 %v4350_v40 }
0x106c   :  { %v4347_v14 = vpop.xlane.xlu1 %4346 }
0x106d   :  { %6885 = vrcp.f32 %v4347_v14 }
0x1071   :  { %v6880_v17 = vpop.eup %6879 }
0x1072   :  { %v4404_v11 = vmul.f32 %v6880_v17, %v7799_v0 }
0x1074   :  { %6600 = vmatpush3.xpose.msk.msra.mxu0 %vm1538_vm3, %v4404_v11 }
0x1075   :  { %v6882_v28 = vpop.eup %6881  ;;  %6601 = vmatprep.subr.mxu0 %v7021_v51  ;;  %v4356_v38 = vpop.xlane.xlu0 %4355 }
0x1076   :  { %v6884_v18 = vpop.eup %6883  ;;  %v4403_v30 = vmul.f32 %v6882_v28, %v7805_v1  ;;  %6887 = vrcp.f32 %v4356_v38 }
0x1077   :  { %v4406_v31 = vmul.f32 %v6884_v18, %v7807_v25 }
0x1078   :  { %6602 = vmatpush3.xpose.msk.msra.mxu0 %vm1538_vm3, %v4403_v30 }
0x1079   :  { %6607 = vmatpush3.xpose.msk.msra.mxu1 %vm1538_vm3, %v4406_v31  ;;  %6613 = vmatprep.subr.mxu0 %v7021_v51  ;;  %v4353_v50 = vpop.xlane.xlu1 %4352  ;;  %v4362_v1 = vpop.xlane.xlu0 %4361 }
0x107a   :  { %v6886_v36 = vpop.eup %6885  ;;  %6608 = vmatprep.subr.mxu1 %v7021_v51  ;;  %6889 = vrcp.f32 %v4353_v50 }
0x107b   :  { %v4405_v0 = vmul.f32 %v6886_v36, %v7814_v29  ;;  %6891 = vrcp.f32 %v4362_v1 }
0x107d   :  { %6609 = vmatpush3.xpose.msk.msra.mxu1 %vm1538_vm3, %v4405_v0  ;;  %v4368_v42 = vpop.xlane.xlu1 %4367  ;;  %v4359_v25 = vpop.xlane.xlu0 %4358 }
0x107e   :  { %6620 = vmatprep.subr.mxu1 %v7021_v51  ;;  %6893 = vrcp.f32 %v4368_v42 }
0x107f   :  { %6895 = vrcp.f32 %v4359_v25 }
0x1081   :  { %v4365_v35 = vpop.xlane.xlu0 %4364 }
0x1082   :  { %6897 = vrcp.f32 %v4365_v35 }
0x1083   :  { %v6888_v53 = vpop.eup %6887 }
0x1084   :  { %v4374_v20 = vpop.xlane.xlu1 %4373  ;;  %v4408_v27 = vmul.f32 %v6888_v53, %v7821_v33  ;;  %v6128_v53 = vld [vmem:[%s8169_s8 + $0x1] ss:$0 sm:$0xff] }
0x1085   :  { %6899 = vrcp.f32 %v4374_v20 }
0x1087   :  { %v6890_v34 = vpop.eup %6889 }
0x1088   :  { %v4371_v32 = vpop.xlane.xlu1 %4370  ;;  %v6892_v55 = vpop.eup %6891  ;;  %v4407_v61 = vmul.f32 %v6890_v34, %v7828_v10 }
0x1089   :  { %6901 = vrcp.f32 %v4371_v32  ;;  %v4410_v6 = vmul.f32 %v6892_v55, %v7825_v39 }
0x108b   :  { %v6894_v43 = vpop.eup %6893 }
0x108c   :  { %v6896_v33 = vpop.eup %6895  ;;  %v4412_v10 = vmul.f32 %v6894_v43, %v7838_v41 }
0x108d   :  { %v4380_v16 = vpop.xlane.xlu0 %4379  ;;  %v4409_v63 = vmul.f32 %v6896_v33, %v7834_v37 }
0x108e   :  { %6903 = vrcp.f32 %v4380_v16 }
0x108f   :  { %v6898_v57 = vpop.eup %6897 }
0x1090   :  { %v4411_v37 = vmul.f32 %v6898_v57, %v7846_v4 }
0x1091   :  { %v4377_v29 = vpop.xlane.xlu1 %4376  ;;  %v4386_v49 = vpop.xlane.xlu0 %4385 }
0x1092   :  { %6905 = vrcp.f32 %v4377_v29  ;;  %v6900_v45 = vpop.eup %6899 }
0x1093   :  { %6907 = vrcp.f32 %v4386_v49  ;;  %v4414_v41 = vmul.f32 %v6900_v45, %v7850_v46 }
0x1095   :  { %v4383_v58 = vpop.xlane.xlu0 %4382 }
0x1096   :  { %6909 = vrcp.f32 %v4383_v58  ;;  %v6902_v47 = vpop.eup %6901 }
0x1097   :  { %v4413_v4 = vmul.f32 %v6902_v47, %v7854_v59 }
0x109b   :  { %v6904_v19 = vpop.eup %6903 }
0x109c   :  { %v4416_v46 = vmul.f32 %v6904_v19, %v7858_v23 }
0x109f   :  { %v6906_v3 = vpop.eup %6905 }
0x10a0   :  { %v6908_v5 = vpop.eup %6907  ;;  %v4415_v52 = vmul.f32 %v6906_v3, %v7864_v7 }
0x10a1   :  { %v4418_v59 = vmul.f32 %v6908_v5, %v7862_v62 }
0x10a3   :  { %v6910_v2 = vpop.eup %6909 }
0x10a4   :  { %v4417_v7 = vmul.f32 %v6910_v2, %v7870_v21  ;;  %v6124_v21 = vld [vmem:[%s8168_s7 + $0x28] sm:$0xff] }
0x10b5   :  { %v3563_v39 = vpop.trf.xlu0 }
0x10b7   :  { %v3531_v22 = vpop.trf.xlu1 }
0x10b8   :  { %6604 = vmatmul.mubr.msk.f32.vlgmr.msra.gmra.mxu0 %vm1538_vm3, %v3531_v22 }
0x10b9   :  { %6614 = vmatpush3.xpose.msk.msra.mxu0 %vm1538_vm3, %v4408_v27  ;;  %6617 = vmatprep.mubr.msk.f32.mxu0 %vm7022_vm4, %v7021_v51  ;;  %v3564_v26 = vpop.trf.xlu0 }
0x10ba   :  { %6615 = vmatprep.subr.mxu0 %v7021_v51 }
0x10bb   :  { %v3532_v56 = vpop.trf.xlu1 }
0x10bc   :  { %6611 = vmatmul.mubr.msk.f32.vlgmr.msra.gmra.mxu1 %vm1538_vm3, %v3532_v56 }
0x10bd   :  { %6616 = vmatpush3.xpose.msk.msra.mxu0 %vm1538_vm3, %v4407_v61  ;;  %6621 = vmatpush3.xpose.msk.msra.mxu1 %vm1538_vm3, %v4410_v6  ;;  %v3565_v23 = vpop.trf.xlu0 }
0x10be   :  { %6622 = vmatprep.subr.mxu1 %v7021_v51  ;;  %6627 = vmatprep.subr.mxu0 %v7021_v51 }
0x10bf   :  { %v3533_v60 = vpop.trf.xlu1  ;;  %6624 = vmatprep.mubr.msk.f32.mxu1 %vm7022_vm4, %v7021_v51 }
0x10c0   :  { %6618 = vmatmul.mubr.msk.f32.vlgmr.msra.gmra.mxu0 %vm1538_vm3, %v3533_v60 }
0x10c1   :  { %6623 = vmatpush3.xpose.msk.msra.mxu1 %vm1538_vm3, %v4409_v63  ;;  %6628 = vmatpush3.xpose.msk.msra.mxu0 %vm1538_vm3, %v4412_v10  ;;  %v3566_v62 = vpop.trf.xlu0 }
0x10c2   :  { %6629 = vmatprep.subr.mxu0 %v7021_v51  ;;  %6634 = vmatprep.subr.mxu1 %v7021_v51 }
0x10c3   :  { %v3534_v24 = vpop.trf.xlu1  ;;  %6631 = vmatprep.mubr.msk.f32.mxu0 %vm7022_vm4, %v7021_v51 }
0x10c4   :  { %6625 = vmatmul.mubr.msk.f32.vlgmr.msra.gmra.mxu1 %vm1538_vm3, %v3534_v24 }
0x10c5   :  { %6630 = vmatpush3.xpose.msk.msra.mxu0 %vm1538_vm3, %v4411_v37  ;;  %6635 = vmatpush3.xpose.msk.msra.mxu1 %vm1538_vm3, %v4414_v41 }
0x10c6   :  { %6636 = vmatprep.subr.mxu1 %v7021_v51  ;;  %6641 = vmatprep.subr.mxu0 %v7021_v51 }
0x10c7   :  { %6638 = vmatprep.mubr.msk.f32.mxu1 %vm7022_vm4, %v7021_v51 }
0x10c8   :  { %6632 = vmatmul.mubr.msk.f32.vlgmr.msra.gmra.mxu0 %vm1538_vm3, %v3563_v39 }
0x10c9   :  { %6637 = vmatpush3.xpose.msk.msra.mxu1 %vm1538_vm3, %v4413_v4  ;;  %6642 = vmatpush3.xpose.msk.msra.mxu0 %vm1538_vm3, %v4416_v46 }
0x10ca   :  { %6643 = vmatprep.subr.mxu0 %v7021_v51  ;;  %6648 = vmatprep.subr.mxu1 %v7021_v51 }
0x10cb   :  { %6645 = vmatprep.mubr.msk.f32.mxu0 %vm7022_vm4, %v7021_v51 }
0x10cc   :  { %6639 = vmatmul.mubr.msk.f32.vlgmr.msra.gmra.mxu1 %vm1538_vm3, %v3564_v26 }
0x10cd   :  { %6644 = vmatpush3.xpose.msk.msra.mxu0 %vm1538_vm3, %v4415_v52  ;;  %6649 = vmatpush3.xpose.msk.msra.mxu1 %vm1538_vm3, %v4418_v59 }
0x10ce   :  { %6650 = vmatprep.subr.mxu1 %v7021_v51  ;;  %6652 = vmatprep.mubr.msk.f32.mxu1 %vm7022_vm4, %v7021_v51 }
0x10cf   :  { %6655 = vmatprep.subr.mxu0 %v6126_v13 }
0x10d0   :  { %6646 = vmatmul.mubr.msk.f32.vlgmr.msra.gmra.mxu0 %vm1538_vm3, %v3565_v23 }
0x10d1   :  { %6651 = vmatpush3.xpose.msk.msra.mxu1 %vm1538_vm3, %v4417_v7  ;;  %6656 = vmatpush3.msra.mxu0 %v6126_v13  ;;  %v6139_v13 = vld [vmem:[%s8172_s11 + $0x30] sm:$0xff] }
0x10d2   :  { %6657 = vmatprep.subr.mxu0 %v6125_v54 }
0x10d3   :  { %6658 = vmatpush3.msra.mxu0 %v6125_v54  ;;  %v6138_v54 = vld [vmem:[%s8172_s11 + $0x28] sm:$0xff] }
0x10d4   :  { %6653 = vmatmul.mubr.msk.f32.vlgmr.msra.gmra.mxu1 %vm1538_vm3, %v3566_v62  ;;  %6659 = vmatprep.subr.mxu0 %v6124_v21  ;;  %v6140_v62 = vld [vmem:[%s8172_s11 + $0x38] sm:$0xff] }
0x10d5   :  { %6660 = vmatpush3.msra.mxu0 %v6124_v21  ;;  %6669 = vmatprep.subr.mxu1 %v6140_v62  ;;  %v6137_v21 = vld [vmem:[%s8172_s11 + $0x20] sm:$0xff] }
0x10d6   :  { %6661 = vmatprep.subr.mxu0 %v6123_v15  ;;  %6670 = vmatpush3.msra.mxu1 %v6140_v62 }
0x10d7   :  { %6662 = vmatpush3.msra.mxu0 %v6123_v15  ;;  %6671 = vmatprep.subr.mxu1 %v6139_v13 }
0x10d8   :  { %6672 = vmatpush3.msra.mxu1 %v6139_v13 }
0x10d9   :  { %6673 = vmatprep.subr.mxu1 %v6138_v54 }
0x10da   :  { %6674 = vmatpush3.msra.mxu1 %v6138_v54 }
0x10db   :  { %6675 = vmatprep.subr.mxu1 %v6137_v21 }
0x10dc   :  { %6676 = vmatpush3.msra.mxu1 %v6137_v21 }
0x1178   :  { %v4494_v40 = vpop.f32.mrf.mxu0 }
0x1179   :  { %5051 = vxpose.xlu0.b32.start [1/4] (short) (narrow) %v4494_v40, 16 }
0x117a   :  { %v6605_v14 = vpop.f32.mrf.mxu0 }
0x117c   :  { %v4573_v17 = vpop.f32.mrf.mxu1 }
0x117d   :  { %5052 = vxpose.xlu0.b32.cont [2/4] (short) (narrow) %v4573_v17, 16 }
0x117e   :  { %v6612_v11 = vpop.f32.mrf.mxu1 }
0x1180   :  { %v4652_v28 = vpop.f32.mrf.mxu0 }
0x1181   :  { %5053 = vxpose.xlu0.b32.cont [3/4] (short) (narrow) %v4652_v28, 16 }
0x1182   :  { %v6619_v18 = vpop.f32.mrf.mxu0 }
0x1184   :  { %v4731_v30 = vpop.f32.mrf.mxu1 }
0x1185   :  { %5054 = vxpose.xlu0.b32.end [4/4] (short) (narrow) %v4731_v30, 16 }
0x1186   :  { %v6626_v31 = vpop.f32.mrf.mxu1 }
0x1188   :  { %v4810_v36 = vpop.f32.mrf.mxu0 }
0x1189   :  { %5083 = vxpose.xlu1.b32.start [1/4] (short) (narrow) %v4810_v36, 16 }
0x118a   :  { %v6633_v0 = vpop.f32.mrf.mxu0 }
0x118c   :  { %v4889_v38 = vpop.f32.mrf.mxu1 }
0x118d   :  { %5084 = vxpose.xlu1.b32.cont [2/4] (short) (narrow) %v4889_v38, 16 }
0x118e   :  { %v6640_v50 = vpop.f32.mrf.mxu1 }
0x1190   :  { %v4968_v1 = vpop.f32.mrf.mxu0 }
0x1191   :  { %5085 = vxpose.xlu1.b32.cont [3/4] (short) (narrow) %v4968_v1, 16  ;;  %v6135_v1 = vld [vmem:[%s8170_s9 + $0x1] ss:$0 sm:$0xff] }
0x1192   :  { %v6647_v42 = vpop.f32.mrf.mxu0 }
0x1194   :  { %v5047_v25 = vpop.f32.mrf.mxu1 }
0x1195   :  { %5086 = vxpose.xlu1.b32.end [4/4] (short) (narrow) %v5047_v25, 16 }
0x1196   :  { %v6654_v20 = vpop.f32.mrf.mxu1 }
0x11f5   :  { %v5067_v35 = vpop.trf.xlu0 }
0x11f6   :  { %6663 = vmatprep.mubr.msk.f32.mxu0 %vm222_vm1, %v5067_v35 }
0x11f9   :  { %v5068_v32 = vpop.trf.xlu0 }
0x11fa   :  { %6664 = vmatmul.mubr.msk.f32.vlgmr.msra.gmra.mxu0 %vm222_vm1, %v5068_v32  ;;  %v6136_v32 = vld [vmem:[%s8171_s10 + $0x1] ss:$0 sm:$0xff] }
0x1205   :  { %v5099_v16 = vpop.trf.xlu1 }
0x1206   :  { %6666 = vmatprep.mubr.msk.f32.mxu0 %vm222_vm1, %v5099_v16 }
0x1209   :  { %v5100_v29 = vpop.trf.xlu1 }
0x120a   :  { %6667 = vmatmul.mubr.msk.f32.gmra.mxu0 %vm222_vm1, %v5100_v29 }
0x12ba   :  { %v6665_v49 = vpop.f32.mrf.mxu0 }
0x12bb   :  { %v5212_v34 = vadd.f32 %v6665_v49, %v6128_v53 }
0x12bc   :  { %v5206_v22 = vpop.f32.mrf.mxu0 }
0x12bd   :  { %v7960_v27 = vadd.f32 %v5212_v34, %v7631_v48  ;;  %v5207_v55 = vadd.f32 %v6128_v53, %v5206_v22 }
0x12bf   :  { %v7963_v43 = vadd.f32 %v5207_v55, %v7634_v44  ;;  %v5236_v58 = vsel %vm222_vm1, %v7960_v27, 0.0 }
0x12c0   :  { %5237 = vadd.xlane.f32.xlu1 %v5236_v58 }
0x12c1   :  { %v5233_v56 = vsel %vm222_vm1, %v7963_v43, 0.0 }
0x12c2   :  { %5234 = vadd.xlane.f32.xlu0 %v5233_v56 }
0x12ca   :  { %v6668_v61 = vpop.f32.mrf.mxu0 }
0x12cb   :  { %v5222_v6 = vadd.f32 %v6668_v61, %v6128_v53 }
0x12cc   :  { %v5216_v33 = vpop.f32.mrf.mxu0 }
0x12cd   :  { %v7970_v57 = vadd.f32 %v5222_v6, %v7641_v9  ;;  %v5217_v48 = vadd.f32 %v6128_v53, %v5216_v33  ;;  %v6154_v33 = vld [vmem:[%s8174_s13 + $0x78] sm:$0xff] }
0x12ce   :  { %6683 = vmatprep.subr.mxu0 %v6154_v33 }
0x12cf   :  { %v7973_v60 = vadd.f32 %v5217_v48, %v7644_v8  ;;  %v5242_v44 = vsel %vm222_vm1, %v7970_v57, 0.0  ;;  %6684 = vmatpush3.msra.mxu0 %v6154_v33  ;;  %v6153_v48 = vld [vmem:[%s8174_s13 + $0x70] sm:$0xff] }
0x12d0   :  { %5243 = vadd.xlane.f32.xlu0 %v5242_v44  ;;  %6685 = vmatprep.subr.mxu0 %v6153_v48  ;;  %v6152_v44 = vld [vmem:[%s8174_s13 + $0x68] sm:$0xff] }
0x12d1   :  { %v5239_v63 = vsel %vm222_vm1, %v7973_v60, 0.0  ;;  %6686 = vmatpush3.msra.mxu0 %v6153_v48 }
0x12d2   :  { %5240 = vadd.xlane.f32.xlu1 %v5239_v63  ;;  %6687 = vmatprep.subr.mxu0 %v6152_v44  ;;  %v6151_v63 = vld [vmem:[%s8174_s13 + $0x60] sm:$0xff] }
0x12d3   :  { %6688 = vmatpush3.msra.mxu0 %v6152_v44 }
0x12d4   :  { %6689 = vmatprep.subr.mxu0 %v6151_v63 }
0x12d5   :  { %6690 = vmatpush3.msra.mxu0 %v6151_v63 }
0x1349   :  { %v5238_v10 = vpop.xlane.xlu1 %5237 }
0x134a   :  { %v5246_v39 = vmul.f32 0.03125, %v5238_v10  ;;  %v6150_v10 = vld [vmem:[%s8174_s13 + $0x58] sm:$0xff] }
0x134b   :  { %v5235_v45 = vpop.xlane.xlu0 %5234  ;;  %6691 = vmatprep.subr.mxu0 %v6150_v10 }
0x134c   :  { %v5250_v47 = vsub.f32 %v7960_v27, %v5246_v39  ;;  %v5245_v24 = vmul.f32 0.03125, %v5235_v45  ;;  %6692 = vmatpush3.msra.mxu0 %v6150_v10  ;;  %v6149_v39 = vld [vmem:[%s8174_s13 + $0x50] sm:$0xff]  ;;  %v6148_v45 = vld [vmem:[%s8174_s13 + $0x48] sm:$0xff] }
0x134d   :  { %6693 = vmatprep.subr.mxu0 %v6149_v39 }
0x134e   :  { %v5249_v9 = vsub.f32 %v7963_v43, %v5245_v24  ;;  %v5254_v37 = vmul.f32 %v5250_v47, %v5250_v47  ;;  %6694 = vmatpush3.msra.mxu0 %v6149_v39  ;;  %v6142_v24 = vld [vmem:[%s8173_s12 + $0x1] ss:$0 sm:$0xff] }
0x134f   :  { %6695 = vmatprep.subr.mxu0 %v6148_v45 }
0x1350   :  { %v5260_v8 = vsel %vm222_vm1, %v5254_v37, 0.0  ;;  %v5253_v41 = vmul.f32 %v5249_v9, %v5249_v9  ;;  %6696 = vmatpush3.msra.mxu0 %v6148_v45 }
0x1351   :  { %5261 = vadd.xlane.f32.xlu0 %v5260_v8 }
0x1352   :  { %v5257_v19 = vsel %vm222_vm1, %v5253_v41, 0.0 }
0x1353   :  { %5258 = vadd.xlane.f32.xlu1 %v5257_v19 }
0x1359   :  { %v5244_v26 = vpop.xlane.xlu0 %5243 }
0x135a   :  { %v5248_v3 = vmul.f32 0.03125, %v5244_v26 }
0x135b   :  { %v5241_v4 = vpop.xlane.xlu1 %5240 }
0x135c   :  { %v5252_v46 = vsub.f32 %v7970_v57, %v5248_v3  ;;  %v5247_v5 = vmul.f32 0.03125, %v5241_v4 }
0x135e   :  { %v5251_v52 = vsub.f32 %v7973_v60, %v5247_v5  ;;  %v5256_v59 = vmul.f32 %v5252_v46, %v5252_v46 }
0x1360   :  { %v5266_v23 = vsel %vm222_vm1, %v5256_v59, 0.0  ;;  %v5255_v2 = vmul.f32 %v5251_v52, %v5251_v52 }
0x1361   :  { %5267 = vadd.xlane.f32.xlu0 %v5266_v23 }
0x1362   :  { %v5263_v7 = vsel %vm222_vm1, %v5255_v2, 0.0 }
0x1363   :  { %5264 = vadd.xlane.f32.xlu1 %v5263_v7 }
0x13da   :  { %v5262_v15 = vpop.xlane.xlu0 %5261 }
0x13db   :  { %v5270_v40 = vmul.f32 0.03125, %v5262_v15 }
0x13dc   :  { %v5259_v14 = vpop.xlane.xlu1 %5258 }
0x13dd   :  { %v5274_v17 = vadd.f32 1e-05, %v5270_v40  ;;  %v5269_v11 = vmul.f32 0.03125, %v5259_v14 }
0x13df   :  { %6911 = vrsqrt.f32 %v5274_v17  ;;  %v5273_v28 = vadd.f32 1e-05, %v5269_v11 }
0x13e1   :  { %6913 = vrsqrt.f32 %v5273_v28 }
0x13ea   :  { %v5268_v18 = vpop.xlane.xlu0 %5267 }
0x13eb   :  { %v5272_v30 = vmul.f32 0.03125, %v5268_v18 }
0x13ec   :  { %v6912_v31 = vpop.eup %6911  ;;  %v5265_v36 = vpop.xlane.xlu1 %5264 }
0x13ed   :  { %v5282_v0 = vmul.f32 %v6912_v31, %v5250_v47  ;;  %v5276_v38 = vadd.f32 1e-05, %v5272_v30  ;;  %v5271_v50 = vmul.f32 0.03125, %v5265_v36  ;;  %v6147_v47 = vld [vmem:[%s8174_s13 + $0x40] sm:$0xff] }
0x13ee   :  { %v6914_v42 = vpop.eup %6913  ;;  %6697 = vmatprep.subr.mxu0 %v6147_v47 }
0x13ef   :  { %6915 = vrsqrt.f32 %v5276_v38  ;;  %v5275_v25 = vadd.f32 1e-05, %v5271_v50  ;;  %v5281_v20 = vmul.f32 %v6914_v42, %v5249_v9  ;;  %v5292_v35 = vmul.f32 %v6135_v1, %v5282_v0  ;;  %6698 = vmatpush3.msra.mxu0 %v6147_v47 }
0x13f1   :  { %6917 = vrsqrt.f32 %v5275_v25  ;;  %v5291_v16 = vmul.f32 %v6135_v1, %v5281_v20  ;;  %v5302_v53 = vadd.f32 %v6136_v32, %v5292_v35 }
0x13f3   :  { %v5301_v29 = vadd.f32 %v6136_v32, %v5291_v16 }
0x13f5   :  { %6677 = vmatprep.mubr.msk.f32.mxu1 %vm222_vm1, %v5301_v29 }
0x13f6   :  { %6678 = vmatmul.mubr.msk.f32.vlgmr.msra.gmra.mxu1 %vm222_vm1, %v5302_v53 }
0x13fc   :  { %v6916_v49 = vpop.eup %6915 }
0x13fd   :  { %v5284_v34 = vmul.f32 %v6916_v49, %v5252_v46 }
0x13fe   :  { %v6918_v22 = vpop.eup %6917 }
0x13ff   :  { %v5283_v55 = vmul.f32 %v6918_v22, %v5251_v52  ;;  %v5294_v58 = vmul.f32 %v6135_v1, %v5284_v34 }
0x1401   :  { %v5293_v56 = vmul.f32 %v6135_v1, %v5283_v55  ;;  %v5304_v6 = vadd.f32 %v6136_v32, %v5294_v58 }
0x1403   :  { %v5303_v61 = vadd.f32 %v6136_v32, %v5293_v56 }
0x1405   :  { %6680 = vmatprep.mubr.msk.f32.mxu1 %vm222_vm1, %v5303_v61 }
0x1406   :  { %6681 = vmatmul.mubr.msk.f32.gmra.mxu1 %vm222_vm1, %v5304_v6 }
0x14b6   :  { %v6679_v9 = vpop.f32.mrf.mxu1 }
0x14b7   :  { %v8036_v37 = vadd.f32 %v6679_v9, %v6142_v24 }
0x14b8   :  { %v5396_v8 = vpop.f32.mrf.mxu1 }
0x14b9   :  { %v8039_v41 = vmul.f32 0.70710677, %v8036_v37  ;;  %v8041_v19 = vadd.f32 %v6142_v24, %v5396_v8 }
0x14bb   :  { %v5432_v26 = vand.u32 2147483647, %v8039_v41  ;;  %v8045_v3 = vmul.f32 0.70710677, %v8041_v19  ;;  %vm5424_vm9 = vcmp.ge.f32.partialorder %v8039_v41, 0.0 }
0x14bd   :  { %v5436_v4 = vmul.f32 0.3275911, %v5432_v26  ;;  %v5431_v46 = vand.u32 2147483647, %v8045_v3  ;;  %v5484_v23 = vsub.f32 0.0, %v5432_v26  ;;  %vm5423_vm10 = vcmp.ge.f32.partialorder %v8045_v3, 0.0 }
0x14be   :  { %v5427_v41 = vsel %vm5423_vm10, 1.0, %v7023_v12  ;;  %v5416_v3 = vmul.f32 0.5, %v8036_v37 }
0x14bf   :  { %v5440_v5 = vadd.f32 1.0, %v5436_v4  ;;  %v5435_v52 = vmul.f32 0.3275911, %v5431_v46  ;;  %v5488_v21 = vmul.f32 %v5484_v23, %v5432_v26  ;;  %v5483_v15 = vsub.f32 0.0, %v5431_v46 }
0x14c0   :  { %v5428_v23 = vsel %vm5424_vm9, 1.0, %v7023_v12 }
0x14c1   :  { %6919 = vrcp.f32 %v5440_v5  ;;  %v5439_v59 = vadd.f32 1.0, %v5435_v52  ;;  %v5493_v18 = vmul.f32 1.442695, %v5488_v21  ;;  %v5487_v30 = vmul.f32 %v5483_v15, %v5431_v46 }
0x14c3   :  { %6921 = vrcp.f32 %v5439_v59  ;;  %v5491_v25 = vmul.f32 1.442695, %v5487_v30 }
0x14c6   :  { %v6682_v2 = vpop.f32.mrf.mxu1 }
0x14c7   :  { %v8048_v7 = vadd.f32 %v6682_v2, %v6142_v24 }
0x14c8   :  { %v5406_v62 = vpop.f32.mrf.mxu1 }
0x14c9   :  { %v8051_v13 = vmul.f32 0.70710677, %v8048_v7  ;;  %v8053_v54 = vadd.f32 %v6142_v24, %v5406_v62 }
0x14cb   :  { %v5434_v40 = vand.u32 2147483647, %v8051_v13  ;;  %v8057_v14 = vmul.f32 0.70710677, %v8053_v54  ;;  %vm5426_vm11 = vcmp.ge.f32.partialorder %v8051_v13, 0.0  ;;  %v5418_v13 = vmul.f32 0.5, %v8048_v7 }
0x14cc   :  { %v5430_v37 = vsel %vm5426_vm11, 1.0, %v7023_v12  ;;  %v5638_v7 = vld [vmem:[%s8176_s15 + $0x8] sm:$0xff] }
0x14cd   :  { %v5438_v17 = vmul.f32 0.3275911, %v5434_v40  ;;  %v5433_v11 = vand.u32 2147483647, %v8057_v14  ;;  %v5486_v53 = vsub.f32 0.0, %v5434_v40  ;;  %vm5425_vm12 = vcmp.ge.f32.partialorder %v8057_v14, 0.0 }
0x14ce   :  { %v6920_v28 = vpop.eup %6919  ;;  %v5640_v14 = vld [vmem:[%s8176_s15 + $0x18] sm:$0xff] }
0x14cf   :  { %v5448_v31 = vmul.f32 1.0614054, %v6920_v28  ;;  %v5442_v36 = vadd.f32 1.0, %v5438_v17  ;;  %v5437_v0 = vmul.f32 0.3275911, %v5433_v11  ;;  %v5485_v55 = vsub.f32 0.0, %v5433_v11  ;;  %6705 = vmatprep.subr.mxu1 %v5640_v14 }
0x14d0   :  { %v6922_v38 = vpop.eup %6921  ;;  %v5490_v56 = vmul.f32 %v5486_v53, %v5434_v40  ;;  %6706 = vmatpush3.msra.mxu1 %v5640_v14 }
0x14d1   :  { %v5452_v50 = vadd.f32 -1.4531521, %v5448_v31  ;;  %6923 = vrcp.f32 %v5442_v36  ;;  %v5441_v1 = vadd.f32 1.0, %v5437_v0  ;;  %v5447_v42 = vmul.f32 1.0614054, %v6922_v38 }
0x14d2   :  { %6925 = vpow2.f32 %v5493_v18  ;;  %v5489_v44 = vmul.f32 %v5485_v55, %v5433_v11  ;;  %v5497_v39 = vmul.f32 1.442695, %v5490_v56  ;;  %v5415_v36 = vmul.f32 0.5, %v8041_v19 }
0x14d3   :  { %v5456_v20 = vmul.f32 %v6920_v28, %v5452_v50  ;;  %v5451_v35 = vadd.f32 -1.4531521, %v5447_v42  ;;  %6927 = vrcp.f32 %v5441_v1  ;;  %v5429_v56 = vsel %vm5425_vm12, 1.0, %v7023_v12  ;;  %v5639_v12 = vld [vmem:[%s8176_s15 + $0x10] sm:$0xff] }
0x14d4   :  { %6929 = vpow2.f32 %v5491_v25  ;;  %v5495_v46 = vmul.f32 1.442695, %v5489_v44  ;;  %6707 = vmatprep.subr.mxu1 %v5639_v12 }
0x14d5   :  { %v5460_v32 = vadd.f32 1.4214138, %v5456_v20  ;;  %v5455_v16 = vmul.f32 %v6922_v38, %v5451_v35  ;;  %6931 = vpow2.f32 %v5497_v39  ;;  %6708 = vmatpush3.msra.mxu1 %v5639_v12 }
0x14d6   :  { %6933 = vpow2.f32 %v5495_v46  ;;  %6709 = vmatprep.subr.mxu1 %v5638_v7 }
0x14d7   :  { %v5464_v29 = vmul.f32 %v6920_v28, %v5460_v32  ;;  %v5459_v49 = vadd.f32 1.4214138, %v5455_v16  ;;  %6710 = vmatpush3.msra.mxu1 %v5638_v7 }
0x14d9   :  { %v5468_v34 = vadd.f32 -0.28449672, %v5464_v29  ;;  %v5463_v22 = vmul.f32 %v6922_v38, %v5459_v49 }
0x14db   :  { %v5472_v58 = vmul.f32 %v6920_v28, %v5468_v34  ;;  %v5467_v61 = vadd.f32 -0.28449672, %v5463_v22 }
0x14dd   :  { %v5476_v6 = vadd.f32 0.2548296, %v5472_v58  ;;  %v5471_v48 = vmul.f32 %v6922_v38, %v5467_v61 }
0x14de   :  { %v6924_v33 = vpop.eup %6923 }
0x14df   :  { %v5480_v63 = vmul.f32 %v6920_v28, %v5476_v6  ;;  %v5450_v10 = vmul.f32 1.0614054, %v6924_v33  ;;  %v6926_v45 = vpop.eup %6925  ;;  %v5475_v47 = vadd.f32 0.2548296, %v5471_v48 }
0x14e0   :  { %v6928_v24 = vpop.eup %6927 }
0x14e1   :  { %v5500_v9 = vmul.f32 %v6926_v45, %v5480_v63  ;;  %v5454_v8 = vadd.f32 -1.4531521, %v5450_v10  ;;  %v5479_v26 = vmul.f32 %v6922_v38, %v5475_v47  ;;  %v5449_v4 = vmul.f32 1.0614054, %v6928_v24  ;;  %v6930_v5 = vpop.eup %6929  ;;  %v6156_v10 = vld [vmem:[%s8175_s14 + $0x1] ss:$0 sm:$0xff] }
0x14e2   :  { %v6932_v16 = vpop.eup %6931 }
0x14e3   :  { %v5504_v52 = vsub.f32 1.0, %v5500_v9  ;;  %v5458_v59 = vmul.f32 %v6924_v33, %v5454_v8  ;;  %v5499_v2 = vmul.f32 %v6930_v5, %v5479_v26  ;;  %v5453_v62 = vadd.f32 -1.4531521, %v5449_v4  ;;  %v6934_v49 = vpop.eup %6933 }
0x14e5   :  { %v5508_v21 = vmul.f32 %v5504_v52, %v5428_v23  ;;  %v5462_v15 = vadd.f32 1.4214138, %v5458_v59  ;;  %v5503_v40 = vsub.f32 1.0, %v5499_v2  ;;  %v5457_v17 = vmul.f32 %v6928_v24, %v5453_v62 }
0x14e7   :  { %v5466_v11 = vmul.f32 %v6924_v33, %v5462_v15  ;;  %v5507_v28 = vmul.f32 %v5503_v40, %v5427_v41  ;;  %v5461_v18 = vadd.f32 1.4214138, %v5457_v17  ;;  %v5512_v30 = vadd.f32 1.0, %v5508_v21 }
0x14e9   :  { %v5470_v31 = vadd.f32 -0.28449672, %v5466_v11  ;;  %v5511_v0 = vadd.f32 1.0, %v5507_v28  ;;  %v5465_v38 = vmul.f32 %v6928_v24, %v5461_v18  ;;  %v5516_v25 = vmul.f32 %v5512_v30, %v5416_v3 }
0x14eb   :  { %v5474_v50 = vmul.f32 %v6924_v33, %v5470_v31  ;;  %v5515_v1 = vmul.f32 %v5511_v0, %v5415_v36  ;;  %v5469_v42 = vadd.f32 -0.28449672, %v5465_v38 }
0x14ed   :  { %v5478_v20 = vadd.f32 0.2548296, %v5474_v50  ;;  %v5473_v35 = vmul.f32 %v6928_v24, %v5469_v42  ;;  %6699 = vmatprep.mubr.msk.f32.mxu0 %vm116_vm0, %v5515_v1 }
0x14ee   :  { %6700 = vmatmul.mubr.msk.f32.vlgmr.msra.gmra.mxu0 %vm116_vm0, %v5516_v25 }
0x14ef   :  { %v5482_v32 = vmul.f32 %v6924_v33, %v5478_v20  ;;  %v5477_v29 = vadd.f32 0.2548296, %v5473_v35  ;;  %v5417_v33 = vmul.f32 0.5, %v8053_v54  ;;  %v5637_v54 = vld [vmem:[%s8176_s15] sm:$0xff] }
0x14f0   :  { %6711 = vmatprep.subr.mxu1 %v5637_v54 }
0x14f1   :  { %v5502_v19 = vmul.f32 %v6932_v16, %v5482_v32  ;;  %v5481_v53 = vmul.f32 %v6928_v24, %v5477_v29  ;;  %6712 = vmatpush3.msra.mxu1 %v5637_v54 }
0x14f2   :  { %6719 = vmatprep.subr.mxu1 %v7021_v51 }
0x14f3   :  { %v5506_v34 = vsub.f32 1.0, %v5502_v19  ;;  %v5501_v22 = vmul.f32 %v6934_v49, %v5481_v53 }
0x14f5   :  { %v5510_v55 = vmul.f32 %v5506_v34, %v5430_v37  ;;  %v5505_v58 = vsub.f32 1.0, %v5501_v22 }
0x14f7   :  { %v5509_v61 = vmul.f32 %v5505_v58, %v5429_v56  ;;  %v5514_v6 = vadd.f32 1.0, %v5510_v55 }
0x14f9   :  { %v5513_v48 = vadd.f32 1.0, %v5509_v61  ;;  %v5518_v63 = vmul.f32 %v5514_v6, %v5418_v13 }
0x14fb   :  { %v5517_v44 = vmul.f32 %v5513_v48, %v5417_v33 }
0x14fd   :  { %6702 = vmatprep.mubr.msk.f32.mxu0 %vm116_vm0, %v5517_v44 }
0x14fe   :  { %6703 = vmatmul.mubr.msk.f32.gmra.mxu0 %vm116_vm0, %v5518_v63 }
0x15ae   :  { %v6701_v39 = vpop.f32.mrf.mxu0 }
0x15af   :  { %v5620_v45 = vadd.f32 %v6701_v39, %v6156_v10 }
0x15b0   :  { %v5614_v47 = vpop.f32.mrf.mxu0 }
0x15b1   :  { %v5615_v24 = vadd.f32 %v6156_v10, %v5614_v47  ;;  %v8096_v8 = vadd.f32 %v5620_v45, %v7960_v27  ;;  %v7024_v27 = vmov 0  }
0x15b2   :  { %6742 = vset.pattern.permute.xlu0 %v7024_v27  ;;  %6741 = vset.pattern.permute.xlu1 %v7024_v27 }
0x15b3   :  { %v8093_v9 = vadd.f32 %v5615_v24, %v7963_v43  ;;  %v6161_v43 = vld [vmem:[#allocation2] ss:$0 sm:$0xff] }
0x15b5   :  { %6713 = vmatprep.mubr.msk.f32.mxu1 %vm222_vm1, %v8093_v9 }
0x15b6   :  { %6714 = vmatmul.mubr.msk.f32.vlgmr.msra.gmra.mxu1 %vm222_vm1, %v8096_v8 }
0x15be   :  { %v6704_v26 = vpop.f32.mrf.mxu0 }
0x15bf   :  { %v5630_v4 = vadd.f32 %v6704_v26, %v6156_v10 }
0x15c0   :  { %v5624_v46 = vpop.f32.mrf.mxu0 }
0x15c1   :  { %v5625_v5 = vadd.f32 %v6156_v10, %v5624_v46  ;;  %v8106_v59 = vadd.f32 %v5630_v4, %v7970_v57 }
0x15c3   :  { %v8103_v52 = vadd.f32 %v5625_v5, %v7973_v60 }
0x15c5   :  { %6716 = vmatprep.mubr.msk.f32.mxu1 %vm222_vm1, %v8103_v52 }
0x15c6   :  { %6717 = vmatmul.mubr.msk.f32.gmra.mxu1 %vm222_vm1, %v8106_v59 }
0x15c7   :  { %6727 = vmatprep.mubr.msk.f32.mxu1 %vm7022_vm4, %v7021_v51 }
0x1676   :  { %v6715_v23 = vpop.f32.mrf.mxu1 }
0x1677   :  { %v5732_v2 = vadd.f32 %v6715_v23, %v6161_v43 }
0x1678   :  { %v5726_v60 = vpop.f32.mrf.mxu1 }
0x1679   :  { %v5746_v62 = vmul.f32 0.17677669, %v5732_v2  ;;  %v5727_v21 = vadd.f32 %v6161_v43, %v5726_v60 }
0x167b   :  { %v5745_v57 = vmul.f32 0.17677669, %v5727_v21  ;;  %v5751_v15 = vsel %vm5749_vm13, %v5746_v62, -inf }
0x167d   :  { %v5750_v40 = vsel %vm5749_vm13, %v5745_v57, -inf }
0x167e   :  { %v5752_v17 = vmax.f32 %v5750_v40, %v5751_v15 }
0x1680   :  { %v5753_v41 = vrot.slane %v5752_v17, 4 }
0x1682   :  { %v5754_v11 = vmax.f32 %v5752_v17, %v5753_v41 }
0x1684   :  { %v5755_v28 = vrot.slane %v5754_v11, 2 }
0x1686   :  { %v5756_v18 = vmax.f32 %v5754_v11, %v5755_v28  ;;  %v6718_v30 = vpop.f32.mrf.mxu1 }
0x1687   :  { %v5742_v31 = vadd.f32 %v6718_v30, %v6161_v43 }
0x1688   :  { %v5757_v36 = vrot.slane %v5756_v18, 1  ;;  %v5736_v0 = vpop.f32.mrf.mxu1 }
0x1689   :  { %v5748_v38 = vmul.f32 0.17677669, %v5742_v31  ;;  %v5737_v3 = vadd.f32 %v6161_v43, %v5736_v0 }
0x168a   :  { %v5758_v50 = vmax.f32 %v5756_v18, %v5757_v36 }
0x168b   :  { %v5747_v1 = vmul.f32 0.17677669, %v5737_v3  ;;  %v5760_v20 = vsel %vm5749_vm13, %v5748_v38, -inf }
0x168c   :  { %v5768_v42 = vsub.f32 %v5745_v57, %v5758_v50  ;;  %v5769_v25 = vsub.f32 %v5746_v62, %v5758_v50 }
0x168d   :  { %v5759_v35 = vsel %vm5749_vm13, %v5747_v1, -inf }
0x168e   :  { %v5772_v32 = vmul.f32 1.442695, %v5768_v42  ;;  %v5774_v16 = vmul.f32 1.442695, %v5769_v25  ;;  %v5761_v29 = vmax.f32 %v5759_v35, %v5760_v20 }
0x1690   :  { %6935 = vpow2.f32 %v5772_v32  ;;  %v5762_v19 = vrot.slane %v5761_v29, 4 }
0x1691   :  { %6937 = vpow2.f32 %v5774_v16 }
0x1692   :  { %v5763_v53 = vmax.f32 %v5761_v29, %v5762_v19 }
0x1694   :  { %v5764_v49 = vrot.slane %v5763_v53, 2 }
0x1696   :  { %v5765_v34 = vmax.f32 %v5763_v53, %v5764_v49 }
0x1698   :  { %v5766_v37 = vrot.slane %v5765_v34, 1 }
0x169a   :  { %v5767_v22 = vmax.f32 %v5765_v34, %v5766_v37 }
0x169c   :  { %v5770_v55 = vsub.f32 %v5747_v1, %v5767_v22  ;;  %v5771_v58 = vsub.f32 %v5748_v38, %v5767_v22 }
0x169d   :  { %v6936_v56 = vpop.eup %6935 }
0x169e   :  { %v6938_v61 = vpop.eup %6937  ;;  %v5780_v6 = vsel %vm5749_vm13, %v6936_v56, 0.0  ;;  %v5776_v33 = vmul.f32 1.442695, %v5770_v55  ;;  %v5778_v48 = vmul.f32 1.442695, %v5771_v58 }
0x169f   :  { %v5781_v13 = vsel %vm5749_vm13, %v6938_v61, 0.0 }
0x16a0   :  { %v5782_v44 = vadd.f32 %v5781_v13, %v5780_v6  ;;  %6939 = vpow2.f32 %v5776_v33  ;;  %v5902_v13 = vld [vmem:[%s8180_s19 + $0x18] sm:$0xff] }
0x16a1   :  { %6941 = vpow2.f32 %v5778_v48  ;;  %6720 = vmatpush3.msra.mxu1 %v5902_v13 }
0x16a2   :  { %v5783_v63 = vrot.slane %v5782_v44, 4  ;;  %6721 = vmatprep.subr.mxu1 %v7021_v51 }
0x16a4   :  { %v5784_v14 = vadd.f32 %v5783_v63, %v5782_v44  ;;  %v5901_v44 = vld [vmem:[%s8180_s19 + $0x10] sm:$0xff]  ;;  %v5900_v63 = vld [vmem:[%s8180_s19 + $0x8] sm:$0xff] }
0x16a5   :  { %6722 = vmatpush3.msra.mxu1 %v5901_v44 }
0x16a6   :  { %v5785_v12 = vrot.slane %v5784_v14, 2  ;;  %6723 = vmatprep.subr.mxu1 %v7021_v51 }
0x16a7   :  { %6724 = vmatpush3.msra.mxu1 %v5900_v63 }
0x16a8   :  { %v5786_v7 = vadd.f32 %v5785_v12, %v5784_v14  ;;  %v5899_v14 = vld [vmem:[%s8180_s19] sm:$0xff]  ;;  %6725 = vmatprep.subr.mxu1 %v7021_v51 }
0x16a9   :  { %6726 = vmatpush3.msra.mxu1 %v5899_v14 }
0x16aa   :  { %v5787_v54 = vrot.slane %v5786_v7, 1 }
0x16ac   :  { %v5788_v10 = vadd.f32 %v5787_v54, %v5786_v7 }
0x16ad   :  { %v6940_v39 = vpop.eup %6939 }
0x16ae   :  { %v6942_v45 = vpop.eup %6941  ;;  %v5789_v47 = vsel %vm5749_vm13, %v6940_v39, 0.0  ;;  %6943 = vrcp.f32 %v5788_v10 }
0x16af   :  { %v5790_v24 = vsel %vm5749_vm13, %v6942_v45, 0.0 }
0x16b0   :  { %v5791_v26 = vadd.f32 %v5790_v24, %v5789_v47  ;;  %v6166_v47 = vld [vmem:[%s8178_s17] ss:$0 sm:$0xff]  ;;  %s5993_s17 = sshll.u32 %s7025_s6, 4  ;;  %s5994_s17 = int_to_ptr.vmem [resolvable:$true] %s5993_s17 }
0x16b1   :  { %s6989_s23 = scalar_lea.vmem %s5994_s17, 32  ;;  %p6994_p11 = scmp.lt.s32.totalorder %s5994_s17, %s5994_s17 }
0x16b2   :  { %v5792_v4 = vrot.slane %v5791_v26, 4  ;;  %p6990_p10 = scmp.ne.s32.totalorder %s5994_s17, %s6989_s23  ;;  %p6995_p12 = scmp.lt.s32.totalorder %s6989_s23, %s6989_s23 }
0x16b4   :  { %v5793_v46 = vadd.f32 %v5792_v4, %v5791_v26  ;;  %p6996_p13 = por %p6995_p12, %p6994_p11 }
0x16b6   :  { %v5794_v5 = vrot.slane %v5793_v46, 2  ;;  %p6997_p0 = pnand %p6996_p13, %p6990_p10 }
0x16b8   :  { %v5795_v27 = vadd.f32 %v5794_v5, %v5793_v46  ;;  %v6167_v46 = vld [vmem:[%s8179_s18] ss:$0 sm:$0xff] }
0x16ba   :  { %v5796_v43 = vrot.slane %v5795_v27, 1 }
0x16bb   :  { %v6944_v23 = vpop.eup %6943 }
0x16bc   :  { %v5801_v2 = vmul.f32 %v6944_v23, %v6938_v61  ;;  %v5800_v60 = vmul.f32 %v6944_v23, %v6936_v56  ;;  %v5797_v62 = vadd.f32 %v5796_v43, %v5795_v27  ;;  %v6168_v23 = vld [vmem:[%s8181_s20] ss:$0 sm:$0xff] }
0x16be   :  { %5811 = vperm.xlu0 %6742, %v5801_v2   ;;  %5806 = vperm.xlu1 %6741, %v5800_v60   ;;  %6945 = vrcp.f32 %v5797_v62 }
0x16cb   :  { %v6946_v21 = vpop.eup %6945 }
0x16cc   :  { %v5802_v57 = vmul.f32 %v6946_v21, %v6940_v39  ;;  %v5803_v15 = vmul.f32 %v6946_v21, %v6942_v45 }
0x16ce   :  { %5816 = vperm.xlu1 %6741, %v5802_v57  }
0x16d2   :  { %5821 = vperm.xlu1 %6741, %v5803_v15  }
0x1739   :  { %v5812_v40 = vpop.permute.xlu0 %5811  ;;  %v5807_v17 = vpop.permute.xlu1 %5806 }
0x173a   :  { %v5825_v41 = vmul.f32 %v5812_v40, %v8096_v8  ;;  %v5824_v11 = vmul.f32 %v5807_v17, %v8093_v9 }
0x173c   :  { %v5829_v28 = vsel %vm222_vm1, %v5825_v41, 0.0  ;;  %v5828_v18 = vsel %vm222_vm1, %v5824_v11, 0.0 }
0x173d   :  { %v5830_v30 = vadd.f32 %v5829_v28, %v5828_v18 }
0x173f   :  { %v5831_v31 = vrot.slane %v5830_v30, 4 }
0x1741   :  { %v5832_v38 = vadd.f32 %v5831_v31, %v5830_v30 }
0x1743   :  { %v5833_v8 = vrot.slane %v5832_v38, 2 }
0x1745   :  { %v5834_v20 = vadd.f32 %v5833_v8, %v5832_v38 }
0x1747   :  { %v5835_v29 = vrot.slane %v5834_v20, 1 }
0x1749   :  { %v5817_v36 = vpop.permute.xlu1 %5816  ;;  %v5836_v53 = vadd.f32 %v5835_v29, %v5834_v20 }
0x174a   :  { %v5826_v0 = vmul.f32 %v5817_v36, %v8103_v52 }
0x174c   :  { %v5837_v1 = vsel %vm222_vm1, %v5826_v0, 0.0 }
0x174d   :  { %v5822_v3 = vpop.permute.xlu1 %5821 }
0x174e   :  { %v5827_v50 = vmul.f32 %v5822_v3, %v8106_v59 }
0x1750   :  { %v5838_v42 = vsel %vm222_vm1, %v5827_v50, 0.0 }
0x1751   :  { %v5839_v25 = vadd.f32 %v5838_v42, %v5837_v1 }
0x1753   :  { %v5840_v9 = vrot.slane %v5839_v25, 4 }
0x1755   :  { %v5841_v35 = vadd.f32 %v5840_v9, %v5839_v25 }
0x1757   :  { %v5842_v32 = vrot.slane %v5841_v35, 2 }
0x1759   :  { %v5843_v16 = vadd.f32 %v5842_v32, %v5841_v35 }
0x175b   :  { %v5844_v19 = vrot.slane %v5843_v16, 1 }
0x175d   :  { %v5845_v52 = vadd.f32 %v5844_v19, %v5843_v16 }
0x175f   :  { %v5851_v49 = vsel %vm5850_vm14, %v5845_v52, %v5836_v53 }
0x1760   :  { %v5854_v59 = vsel %vm5853_vm15, %v5851_v49, 0.0 }
0x1761   :  { %5855 = vadd.xlane.f32.xlu1 %v5854_v59 }
0x17ea   :  { %v5856_v34 = vpop.xlane.xlu1 %5855 }
0x17eb   :  { %v5857_v37 = vmul.f32 0.03125, %v5856_v34 }
0x17ed   :  { %v5859_v22 = vrot.slane %v5857_v37, 1  ;;  %v5862_v55 = vsub.f32 %v5836_v53, %v5857_v37 }
0x17ef   :  { %v5863_v58 = vsub.f32 %v5845_v52, %v5859_v22  ;;  %v5864_v61 = vmul.f32 %v5862_v55, %v5862_v55 }
0x17f1   :  { %v5865_v56 = vmul.f32 %v5863_v58, %v5863_v58 }
0x17f3   :  { %v5868_v6 = vrot.slane %v5865_v56, 7 }
0x17f5   :  { %v5869_v33 = vsel %vm5850_vm14, %v5868_v6, %v5864_v61 }
0x17f6   :  { %v5871_v48 = vsel %vm5853_vm15, %v5869_v33, 0.0 }
0x17f7   :  { %5872 = vadd.xlane.f32.xlu0 %v5871_v48 }
0x1880   :  { %v5873_v12 = vpop.xlane.xlu0 %5872 }
0x1881   :  { %v5874_v7 = vmul.f32 0.03125, %v5873_v12 }
0x1883   :  { %v5875_v54 = vadd.f32 1e-05, %v5874_v7 }
0x1885   :  { %6947 = vrsqrt.f32 %v5875_v54 }
0x1892   :  { %v6948_v10 = vpop.eup %6947 }
0x1893   :  { %v5878_v39 = vrot.slane %v6948_v10, 1  ;;  %v5881_v45 = vmul.f32 %v6948_v10, %v5862_v55 }
0x1895   :  { %v5882_v24 = vmul.f32 %v5878_v39, %v5863_v58  ;;  %v5889_v26 = vmul.f32 %v6166_v47, %v5881_v45 }
0x1897   :  { %v5890_v4 = vmul.f32 %v6166_v47, %v5882_v24  ;;  %v5897_v5 = vadd.f32 %v6167_v46, %v5889_v26 }
0x1899   :  { %v5898_v51 = vadd.f32 %v6167_v46, %v5890_v4 }
0x189b   :  { %v5912_v27 = vrot.slane %v5898_v51, 7 }
0x189d   :  { %v5913_v43 = vsel %vm5850_vm14, %v5912_v27, %v5897_v5 }
0x189e   :  { %6728 = vmatmul.mubr.msk.f32.vlgmr.msra.gmra.mxu1 %vm222_vm1, %v5913_v43 }
0x195e   :  { %v5982_v2 = vpop.f32.mrf.mxu1 }
0x195f   :  { %v5983_v60 = vadd.f32 %v6168_v23, %v5982_v2 }
0x1960   :  { %v6729_v62 = vpop.f32.mrf.mxu1 }
0x1961   :  { %5986 = vst [vmem:[#allocation8] sm:$0x3] %v5983_v60 }
0x1962   :  { %7000 = shalt.err (!%p6997_p0)
}
0x1963   :  { %5996 = dma.vmem_to_hbm [thread:$0]  %s5994_s17, 32, %s8182_s21, [#allocation5]  }
0x1964   :  { %7013 = dma.done.wait [#allocation5], 32  }
0x1965   :  { %7014 = vsyncadd [#allocation5], 4294967264 }
0x1966   :  { %6000 = vsyncpa [#allocation4], 1 }
0x1967   :  { %6001 = vsyncpa [#allocation7], 1 }
0x1968   :  { %6002 = vsyncpa [#allocation5], 1 }

</bundles_post_ra>
